<compile_context>
chip_gen: v7x
topology: tpu7x:2x2x1
jax: 0.10.0
libtpu: 0.0.40
codegen_flags: <defaults>
</compile_context>

<pallas_src>
import functools

import jax
import jax.numpy as jnp
import numpy as np
from jax.experimental import pallas as pl
from jax.experimental.pallas import tpu as pltpu

EPS = 1e-5
LANES = 128


def _round_up(x, m):
    return ((x + m - 1) // m) * m


def _pick_tile_h(H, W, cin_p, cout_p, budget_bytes=4 * 1024 * 1024):
    """Largest divisor of H whose tile fits a conservative per-buffer VMEM budget."""
    per_row = (W + 2) * cin_p * 2 + 2 * W * cout_p * 4   # bf16 input row + f32 out/acc rows
    cap = max(1, budget_bytes // max(per_row, 1))
    th = 1
    for d in range(1, H + 1):
        if H % d == 0 and d <= cap:
            th = d
    return th


# ------------------------------- kernels ------------------------------------

def _conv_relu_stats_kernel(x_ref, w_ref, z_ref, st_ref):
    """Conv3x3(pad=1, no bias) + ReLU + per-tile BN statistics.

    x_ref : (1, TH+2, W+2, Cin)  bf16  zero-padded halo tile (NHWC)
    w_ref : (3, 3, Cin, Cout)    bf16  HWIO
    z_ref : (1, TH, W, Cout)     f32   conv+ReLU activation tile
    st_ref: (1, 2, Cout)         f32   [sum, sum_of_squares] over this tile
    """
    _, hh, wp2, cin = x_ref.shape
    th, w = hh - 2, wp2 - 2
    cout = w_ref.shape[-1]

    # 9 shifted (TH*W, Cin) @ (Cin, Cout) bf16 matmuls into one f32 accumulator.
    acc = jnp.zeros((th * w, cout), jnp.float32)
    for dy in range(3):
        for dx in range(3):
            win = x_ref[:, dy:dy + th, dx:dx + w, :].reshape(th * w, cin)
            acc = acc + jnp.dot(win, w_ref[dy, dx],
                                preferred_element_type=jnp.float32)

    z = jnp.maximum(acc, 0.0)                                    # ReLU
    z_ref[...] = z.reshape(1, th, w, cout)

    # Single-pass BN statistics for this tile (reduced across tiles outside).
    st_ref[:, 0:1, :] = jnp.sum(z, axis=0, keepdims=True).reshape(1, 1, cout)
    st_ref[:, 1:2, :] = jnp.sum(z * z, axis=0, keepdims=True).reshape(1, 1, cout)


def _bn_apply_kernel(z_ref, st_ref, g_ref, b_ref, y_ref, *, inv_count):
    """BatchNorm2d (training-mode batch stats, biased var) as fused scale/shift.

    z_ref : (1, TH, W, Cout) f32   conv+ReLU activation tile
    st_ref: (2, Cout)        f32   reduced [sum, sum_sq] over all N*H*W
    g_ref : (1, Cout) f32,  b_ref: (1, Cout) f32
    """
    cout = z_ref.shape[-1]
    mean = st_ref[0:1, :] * inv_count                            # (1, Cout)
    var = jnp.maximum(st_ref[1:2, :] * inv_count - mean * mean, 0.0)
    scale = g_ref[...] * jax.lax.rsqrt(var + EPS)                # gamma / sqrt(var+eps)
    shift = b_ref[...] - mean * scale                            # beta - mean*scale
    y = z_ref[...] * scale.reshape(1, 1, 1, cout) + shift.reshape(1, 1, 1, cout)
    y_ref[...] = y.astype(y_ref.dtype)


# --------------------------- block wrapper -----------------------------------

def _conv_relu_bn_block(x_nhwc, w_hwio, gamma, beta, tile_h, out_dtype):
    """One Conv3x3 -> ReLU -> BatchNorm2d block on a channel-padded NHWC input."""
    N, H, W, cin_p = x_nhwc.shape
    cout_p = w_hwio.shape[-1]
    nH = H // tile_h
    n_tiles = N * nH

    # Zero padding + per-tile 2-row halo (glue; duplicates 2 rows per tile so
    # all BlockSpecs stay plain Blocked and double-buffer cleanly).
    xp = jnp.pad(x_nhwc, ((0, 0), (1, 1), (1, 1), (0, 0)))
    x_tiles = jnp.stack(
        [xp[:, i * tile_h:i * tile_h + tile_h + 2] for i in range(nH)], axis=1)
    x_tiles = x_tiles.reshape(n_tiles, tile_h + 2, W + 2, cin_p)

    flops = 2 * N * H * W * 9 * cin_p * cout_p
    bytes_accessed = (x_tiles.size * 2 + w_hwio.size * 2
                      + N * H * W * cout_p * 4 + n_tiles * 2 * cout_p * 4)

    # Phase 1: conv + ReLU + per-tile stats.
    z, stats = pl.pallas_call(
        _conv_relu_stats_kernel,
        grid=(N, nH),
        in_specs=[
            pl.BlockSpec((1, tile_h + 2, W + 2, cin_p),
                         lambda n, i: (n * nH + i, 0, 0, 0)),
            pl.BlockSpec((3, 3, cin_p, cout_p), lambda n, i: (0, 0, 0, 0)),
        ],
        out_specs=[
            pl.BlockSpec((1, tile_h, W, cout_p), lambda n, i: (n, i, 0, 0)),
            pl.BlockSpec((1, 2, cout_p), lambda n, i: (n * nH + i, 0, 0)),
        ],
        out_shape=[
            jax.ShapeDtypeStruct((N, H, W, cout_p), jnp.float32),
            jax.ShapeDtypeStruct((n_tiles, 2, cout_p), jnp.float32),
        ],
        compiler_params=pltpu.CompilerParams(
            dimension_semantics=("parallel", "parallel"),
            vmem_limit_bytes=32 * 1024 * 1024),
        cost_estimate=pl.CostEstimate(flops=flops, transcendentals=0,
                                      bytes_accessed=bytes_accessed),
    )(x_tiles, w_hwio)

    # Cross-tile reduction of the tiny per-tile stats (O(C) glue).
    stats_sum = jnp.sum(stats, axis=0)                           # (2, Cout)

    # Phase 2: BN apply (fused multiply-add).
    y = pl.pallas_call(
        functools.partial(_bn_apply_kernel, inv_count=1.0 / float(N * H * W)),
        grid=(N, nH),
        in_specs=[
            pl.BlockSpec((1, tile_h, W, cout_p), lambda n, i: (n, i, 0, 0)),
            pl.BlockSpec((2, cout_p), lambda n, i: (0, 0)),
            pl.BlockSpec((1, cout_p), lambda n, i: (0, 0)),
            pl.BlockSpec((1, cout_p), lambda n, i: (0, 0)),
        ],
        out_specs=pl.BlockSpec((1, tile_h, W, cout_p), lambda n, i: (n, i, 0, 0)),
        out_shape=jax.ShapeDtypeStruct((N, H, W, cout_p), out_dtype),
        compiler_params=pltpu.CompilerParams(
            dimension_semantics=("parallel", "parallel"),
            vmem_limit_bytes=32 * 1024 * 1024),
    )(z, stats_sum, gamma, beta)
    return y


# ----------------------------- public API ------------------------------------

def double_conv(x_nchw, w1_oihw, g1, b1, w2_oihw, g2, b2):
    """DoubleConv forward.  x: (N, Cin, H, W);  conv weights in OIHW like nn.Conv2d."""
    N, Cin, H, W = x_nchw.shape
    mid = w1_oihw.shape[0]
    out = w2_oihw.shape[0]
    cin_p = _round_up(Cin, LANES)
    mid_p = _round_up(mid, LANES)
    out_p = _round_up(out, LANES)

    # NCHW -> NHWC, pad channels to 128-lane multiples, bf16 matmul operands.
    x = jnp.transpose(x_nchw, (0, 2, 3, 1))
    x = jnp.pad(x, ((0, 0), (0, 0), (0, 0), (0, cin_p - Cin))).astype(jnp.bfloat16)

    def prep_w(w_oihw, ci_p, co_p):
        w = jnp.transpose(w_oihw, (2, 3, 1, 0))                  # OIHW -> HWIO
        w = jnp.pad(w, ((0, 0), (0, 0),
                        (0, ci_p - w.shape[2]), (0, co_p - w.shape[3])))
        return w.astype(jnp.bfloat16)

    def prep_gb(g, b, c_p):
        c = g.shape[0]
        gp = jnp.pad(g.astype(jnp.float32), (0, c_p - c), constant_values=1.0)
        bp = jnp.pad(b.astype(jnp.float32), (0, c_p - c))
        return gp.reshape(1, c_p), bp.reshape(1, c_p)

    w1p = prep_w(w1_oihw, cin_p, mid_p)
    w2p = prep_w(w2_oihw, mid_p, out_p)
    g1p, b1p = prep_gb(g1, b1, mid_p)
    g2p, b2p = prep_gb(g2, b2, out_p)

    tile_h = _pick_tile_h(H, W, max(cin_p, mid_p), max(mid_p, out_p))

    # Block 1: mid activation stays channel-padded bf16 (it is conv2's MXU operand).
    y1 = _conv_relu_bn_block(x, w1p, g1p, b1p, tile_h, jnp.bfloat16)
    # Block 2: final output in f32.
    y2 = _conv_relu_bn_block(y1, w2p, g2p, b2p, tile_h, jnp.float32)

    # TODO(synk): fuse block-1's BN apply into block-2's conv kernel (fold scale1
    # into w2 + boundary-corrected shift) to save one activation HBM round trip.
    return jnp.transpose(y2[..., :out], (0, 3, 1, 2))


# ---------------- pure-JAX references (correctness check only) ---------------

def _ref_block(x_nchw, w_oihw, gamma, beta):
    y = jax.lax.conv_general_dilated(
        x_nchw, w_oihw, window_strides=(1, 1), padding=((1, 1), (1, 1)),
        dimension_numbers=('NCHW', 'OIHW', 'NCHW'))
    y = jnp.maximum(y, 0.0)
    mean = jnp.mean(y, axis=(0, 2, 3), keepdims=True)
    var = jnp.var(y, axis=(0, 2, 3), keepdims=True)   # biased, like torch BN train
    yhat = (y - mean) * jax.lax.rsqrt(var + EPS)
    return yhat * gamma.reshape(1, -1, 1, 1) + beta.reshape(1, -1, 1, 1)


def double_conv_ref_f32(x, w1, g1, b1, w2, g2, b2):
    return _ref_block(_ref_block(x, w1, g1, b1), w2, g2, b2)


def double_conv_ref_bf16(x, w1, g1, b1, w2, g2, b2):
    """Same math with matmul operands rounded to bf16 at the same points as the kernel."""
    r = lambda a: a.astype(jnp.bfloat16).astype(jnp.float32)
    y1 = _ref_block(r(x), r(w1), g1, b1)
    return _ref_block(r(y1), r(w2), g2, b2)


if __name__ == "__main__":
    N, CIN, H, W = 2, 4, 16, 16
    MID, OUT = 8, 8

    key = jax.random.PRNGKey(0)
    kx, k1, k2 = jax.random.split(key, 3)

    x = jax.random.normal(kx, (N, CIN, H, W), jnp.float32)
    # nn.Conv2d weights (OIHW, bias=False).
    w1 = jax.random.normal(k1, (MID, CIN, 3, 3), jnp.float32) * 0.1
    w2 = jax.random.normal(k2, (OUT, MID, 3, 3), jnp.float32) * 0.1
    # nn.BatchNorm2d default init: gamma=1, beta=0.
    g1, b1 = jnp.ones((MID,), jnp.float32), jnp.zeros((MID,), jnp.float32)
    g2, b2 = jnp.ones((OUT,), jnp.float32), jnp.zeros((OUT,), jnp.float32)

    y = jax.jit(double_conv)(x, w1, g1, b1, w2, g2, b2)
    jax.block_until_ready(y)
    assert y.shape == (N, OUT, H, W), y.shape

    # Exact-semantics check at matched (bf16-operand) precision.
    y_ref_bf16 = double_conv_ref_bf16(x, w1, g1, b1, w2, g2, b2)
    np.testing.assert_allclose(np.asarray(y), np.asarray(y_ref_bf16),
                               rtol=1e-2, atol=1e-2)

    # Sanity check vs. the pure-f32 PyTorch-semantics reference (difference is
    # only the deliberate bf16 rounding of the MXU operands).
    y_ref = double_conv_ref_f32(x, w1, g1, b1, w2, g2, b2)
    rel = float(jnp.sqrt(jnp.sum((y - y_ref) ** 2) / jnp.sum(y_ref ** 2)))
    assert rel < 0.1, rel

    print("KERNEL_OK")
</pallas_src>

<mosaic_0001>
module attributes {stable_mosaic.version = 11 : i64} {
  func.func @_conv_relu_stats_kernel(%arg0: i32, %arg1: i32, %arg2: memref<1x18x18x128xbf16, #tpu.memory_space<vmem>>, %arg3: memref<3x3x128x128xbf16, #tpu.memory_space<vmem>>, %arg4: memref<1x16x16x128xf32, #tpu.memory_space<vmem>>, %arg5: memref<1x2x128xf32, #tpu.memory_space<vmem>>) attributes {dimension_semantics = [#tpu.dimension_semantics<parallel>, #tpu.dimension_semantics<parallel>], iteration_bounds = array<i64: 2, 1>, scalar_prefetch = 0 : i64, scratch_operands = 0 : i64, tpu.core_type = #tpu.core_type<tc>, window_params = [{transform_indices = @transform_0, window_bounds = array<i64: 1, 18, 18, 128>}, {pipeline_mode = #tpu.pipeline_mode<synchronous>, transform_indices = @transform_1, window_bounds = array<i64: 3, 3, 128, 128>}, {transform_indices = @transform_2, window_bounds = array<i64: 1, 16, 16, 128>}, {transform_indices = @transform_3, window_bounds = array<i64: 1, 2, 128>}]} {
    %cst = arith.constant 0.000000e+00 : f32
    %0 = vector.broadcast %cst : f32 to vector<256x128xf32>
    %c0 = arith.constant 0 : index
    %c0_0 = arith.constant 0 : index
    %c0_1 = arith.constant 0 : index
    %c0_2 = arith.constant 0 : index
    %1 = vector.load %arg2[%c0, %c0_0, %c0_1, %c0_2] : memref<1x18x18x128xbf16, #tpu.memory_space<vmem>>, vector<1x16x16x128xbf16>
    %2 = vector.shape_cast %1 : vector<1x16x16x128xbf16> to vector<256x128xbf16>
    %c0_3 = arith.constant 0 : index
    %c0_4 = arith.constant 0 : index
    %c0_5 = arith.constant 0 : index
    %c0_6 = arith.constant 0 : index
    %3 = vector.load %arg3[%c0_3, %c0_4, %c0_5, %c0_6] : memref<3x3x128x128xbf16, #tpu.memory_space<vmem>>, vector<1x1x128x128xbf16>
    %4 = vector.shape_cast %3 : vector<1x1x128x128xbf16> to vector<128x128xbf16>
    %cst_7 = arith.constant dense<0.000000e+00> : vector<256x128xf32>
    %5 = tpu.matmul %2, %4, %cst_7 {dimension_numbers = #tpu.dot_dimension_numbers<[1], [0], [0], [1], [0, 0, 1, 1], [], []>} : vector<256x128xbf16>, vector<128x128xbf16>, vector<256x128xf32> -> vector<256x128xf32>
    %6 = arith.addf %0, %5 : vector<256x128xf32>
    %c0_8 = arith.constant 0 : index
    %c0_9 = arith.constant 0 : index
    %c1 = arith.constant 1 : index
    %c0_10 = arith.constant 0 : index
    %7 = vector.load %arg2[%c0_8, %c0_9, %c1, %c0_10] : memref<1x18x18x128xbf16, #tpu.memory_space<vmem>>, vector<1x16x16x128xbf16>
    %8 = vector.shape_cast %7 : vector<1x16x16x128xbf16> to vector<256x128xbf16>
    %c0_11 = arith.constant 0 : index
    %c1_12 = arith.constant 1 : index
    %c0_13 = arith.constant 0 : index
    %c0_14 = arith.constant 0 : index
    %9 = vector.load %arg3[%c0_11, %c1_12, %c0_13, %c0_14] : memref<3x3x128x128xbf16, #tpu.memory_space<vmem>>, vector<1x1x128x128xbf16>
    %10 = vector.shape_cast %9 : vector<1x1x128x128xbf16> to vector<128x128xbf16>
    %cst_15 = arith.constant dense<0.000000e+00> : vector<256x128xf32>
    %11 = tpu.matmul %8, %10, %cst_15 {dimension_numbers = #tpu.dot_dimension_numbers<[1], [0], [0], [1], [0, 0, 1, 1], [], []>} : vector<256x128xbf16>, vector<128x128xbf16>, vector<256x128xf32> -> vector<256x128xf32>
    %12 = arith.addf %6, %11 : vector<256x128xf32>
    %c0_16 = arith.constant 0 : index
    %c0_17 = arith.constant 0 : index
    %c2 = arith.constant 2 : index
    %c0_18 = arith.constant 0 : index
    %13 = vector.load %arg2[%c0_16, %c0_17, %c2, %c0_18] : memref<1x18x18x128xbf16, #tpu.memory_space<vmem>>, vector<1x16x16x128xbf16>
    %14 = vector.shape_cast %13 : vector<1x16x16x128xbf16> to vector<256x128xbf16>
    %c0_19 = arith.constant 0 : index
    %c2_20 = arith.constant 2 : index
    %c0_21 = arith.constant 0 : index
    %c0_22 = arith.constant 0 : index
    %15 = vector.load %arg3[%c0_19, %c2_20, %c0_21, %c0_22] : memref<3x3x128x128xbf16, #tpu.memory_space<vmem>>, vector<1x1x128x128xbf16>
    %16 = vector.shape_cast %15 : vector<1x1x128x128xbf16> to vector<128x128xbf16>
    %cst_23 = arith.constant dense<0.000000e+00> : vector<256x128xf32>
    %17 = tpu.matmul %14, %16, %cst_23 {dimension_numbers = #tpu.dot_dimension_numbers<[1], [0], [0], [1], [0, 0, 1, 1], [], []>} : vector<256x128xbf16>, vector<128x128xbf16>, vector<256x128xf32> -> vector<256x128xf32>
    %18 = arith.addf %12, %17 : vector<256x128xf32>
    %c0_24 = arith.constant 0 : index
    %c1_25 = arith.constant 1 : index
    %c0_26 = arith.constant 0 : index
    %c0_27 = arith.constant 0 : index
    %19 = vector.load %arg2[%c0_24, %c1_25, %c0_26, %c0_27] : memref<1x18x18x128xbf16, #tpu.memory_space<vmem>>, vector<1x16x16x128xbf16>
    %20 = vector.shape_cast %19 : vector<1x16x16x128xbf16> to vector<256x128xbf16>
    %c1_28 = arith.constant 1 : index
    %c0_29 = arith.constant 0 : index
    %c0_30 = arith.constant 0 : index
    %c0_31 = arith.constant 0 : index
    %21 = vector.load %arg3[%c1_28, %c0_29, %c0_30, %c0_31] : memref<3x3x128x128xbf16, #tpu.memory_space<vmem>>, vector<1x1x128x128xbf16>
    %22 = vector.shape_cast %21 : vector<1x1x128x128xbf16> to vector<128x128xbf16>
    %cst_32 = arith.constant dense<0.000000e+00> : vector<256x128xf32>
    %23 = tpu.matmul %20, %22, %cst_32 {dimension_numbers = #tpu.dot_dimension_numbers<[1], [0], [0], [1], [0, 0, 1, 1], [], []>} : vector<256x128xbf16>, vector<128x128xbf16>, vector<256x128xf32> -> vector<256x128xf32>
    %24 = arith.addf %18, %23 : vector<256x128xf32>
    %c0_33 = arith.constant 0 : index
    %c1_34 = arith.constant 1 : index
    %c1_35 = arith.constant 1 : index
    %c0_36 = arith.constant 0 : index
    %25 = vector.load %arg2[%c0_33, %c1_34, %c1_35, %c0_36] : memref<1x18x18x128xbf16, #tpu.memory_space<vmem>>, vector<1x16x16x128xbf16>
    %26 = vector.shape_cast %25 : vector<1x16x16x128xbf16> to vector<256x128xbf16>
    %c1_37 = arith.constant 1 : index
    %c1_38 = arith.constant 1 : index
    %c0_39 = arith.constant 0 : index
    %c0_40 = arith.constant 0 : index
    %27 = vector.load %arg3[%c1_37, %c1_38, %c0_39, %c0_40] : memref<3x3x128x128xbf16, #tpu.memory_space<vmem>>, vector<1x1x128x128xbf16>
    %28 = vector.shape_cast %27 : vector<1x1x128x128xbf16> to vector<128x128xbf16>
    %cst_41 = arith.constant dense<0.000000e+00> : vector<256x128xf32>
    %29 = tpu.matmul %26, %28, %cst_41 {dimension_numbers = #tpu.dot_dimension_numbers<[1], [0], [0], [1], [0, 0, 1, 1], [], []>} : vector<256x128xbf16>, vector<128x128xbf16>, vector<256x128xf32> -> vector<256x128xf32>
    %30 = arith.addf %24, %29 : vector<256x128xf32>
    %c0_42 = arith.constant 0 : index
    %c1_43 = arith.constant 1 : index
    %c2_44 = arith.constant 2 : index
    %c0_45 = arith.constant 0 : index
    %31 = vector.load %arg2[%c0_42, %c1_43, %c2_44, %c0_45] : memref<1x18x18x128xbf16, #tpu.memory_space<vmem>>, vector<1x16x16x128xbf16>
    %32 = vector.shape_cast %31 : vector<1x16x16x128xbf16> to vector<256x128xbf16>
    %c1_46 = arith.constant 1 : index
    %c2_47 = arith.constant 2 : index
    %c0_48 = arith.constant 0 : index
    %c0_49 = arith.constant 0 : index
    %33 = vector.load %arg3[%c1_46, %c2_47, %c0_48, %c0_49] : memref<3x3x128x128xbf16, #tpu.memory_space<vmem>>, vector<1x1x128x128xbf16>
    %34 = vector.shape_cast %33 : vector<1x1x128x128xbf16> to vector<128x128xbf16>
    %cst_50 = arith.constant dense<0.000000e+00> : vector<256x128xf32>
    %35 = tpu.matmul %32, %34, %cst_50 {dimension_numbers = #tpu.dot_dimension_numbers<[1], [0], [0], [1], [0, 0, 1, 1], [], []>} : vector<256x128xbf16>, vector<128x128xbf16>, vector<256x128xf32> -> vector<256x128xf32>
    %36 = arith.addf %30, %35 : vector<256x128xf32>
    %c0_51 = arith.constant 0 : index
    %c2_52 = arith.constant 2 : index
    %c0_53 = arith.constant 0 : index
    %c0_54 = arith.constant 0 : index
    %37 = vector.load %arg2[%c0_51, %c2_52, %c0_53, %c0_54] : memref<1x18x18x128xbf16, #tpu.memory_space<vmem>>, vector<1x16x16x128xbf16>
    %38 = vector.shape_cast %37 : vector<1x16x16x128xbf16> to vector<256x128xbf16>
    %c2_55 = arith.constant 2 : index
    %c0_56 = arith.constant 0 : index
    %c0_57 = arith.constant 0 : index
    %c0_58 = arith.constant 0 : index
    %39 = vector.load %arg3[%c2_55, %c0_56, %c0_57, %c0_58] : memref<3x3x128x128xbf16, #tpu.memory_space<vmem>>, vector<1x1x128x128xbf16>
    %40 = vector.shape_cast %39 : vector<1x1x128x128xbf16> to vector<128x128xbf16>
    %cst_59 = arith.constant dense<0.000000e+00> : vector<256x128xf32>
    %41 = tpu.matmul %38, %40, %cst_59 {dimension_numbers = #tpu.dot_dimension_numbers<[1], [0], [0], [1], [0, 0, 1, 1], [], []>} : vector<256x128xbf16>, vector<128x128xbf16>, vector<256x128xf32> -> vector<256x128xf32>
    %42 = arith.addf %36, %41 : vector<256x128xf32>
    %c0_60 = arith.constant 0 : index
    %c2_61 = arith.constant 2 : index
    %c1_62 = arith.constant 1 : index
    %c0_63 = arith.constant 0 : index
    %43 = vector.load %arg2[%c0_60, %c2_61, %c1_62, %c0_63] : memref<1x18x18x128xbf16, #tpu.memory_space<vmem>>, vector<1x16x16x128xbf16>
    %44 = vector.shape_cast %43 : vector<1x16x16x128xbf16> to vector<256x128xbf16>
    %c2_64 = arith.constant 2 : index
    %c1_65 = arith.constant 1 : index
    %c0_66 = arith.constant 0 : index
    %c0_67 = arith.constant 0 : index
    %45 = vector.load %arg3[%c2_64, %c1_65, %c0_66, %c0_67] : memref<3x3x128x128xbf16, #tpu.memory_space<vmem>>, vector<1x1x128x128xbf16>
    %46 = vector.shape_cast %45 : vector<1x1x128x128xbf16> to vector<128x128xbf16>
    %cst_68 = arith.constant dense<0.000000e+00> : vector<256x128xf32>
    %47 = tpu.matmul %44, %46, %cst_68 {dimension_numbers = #tpu.dot_dimension_numbers<[1], [0], [0], [1], [0, 0, 1, 1], [], []>} : vector<256x128xbf16>, vector<128x128xbf16>, vector<256x128xf32> -> vector<256x128xf32>
    %48 = arith.addf %42, %47 : vector<256x128xf32>
    %c0_69 = arith.constant 0 : index
    %c2_70 = arith.constant 2 : index
    %c2_71 = arith.constant 2 : index
    %c0_72 = arith.constant 0 : index
    %49 = vector.load %arg2[%c0_69, %c2_70, %c2_71, %c0_72] : memref<1x18x18x128xbf16, #tpu.memory_space<vmem>>, vector<1x16x16x128xbf16>
    %50 = vector.shape_cast %49 : vector<1x16x16x128xbf16> to vector<256x128xbf16>
    %c2_73 = arith.constant 2 : index
    %c2_74 = arith.constant 2 : index
    %c0_75 = arith.constant 0 : index
    %c0_76 = arith.constant 0 : index
    %51 = vector.load %arg3[%c2_73, %c2_74, %c0_75, %c0_76] : memref<3x3x128x128xbf16, #tpu.memory_space<vmem>>, vector<1x1x128x128xbf16>
    %52 = vector.shape_cast %51 : vector<1x1x128x128xbf16> to vector<128x128xbf16>
    %cst_77 = arith.constant dense<0.000000e+00> : vector<256x128xf32>
    %53 = tpu.matmul %50, %52, %cst_77 {dimension_numbers = #tpu.dot_dimension_numbers<[1], [0], [0], [1], [0, 0, 1, 1], [], []>} : vector<256x128xbf16>, vector<128x128xbf16>, vector<256x128xf32> -> vector<256x128xf32>
    %54 = arith.addf %48, %53 : vector<256x128xf32>
    %cst_78 = arith.constant 0.000000e+00 : f32
    %55 = vector.broadcast %cst_78 : f32 to vector<256x128xf32>
    %56 = arith.maximumf %54, %55 : vector<256x128xf32>
    %57 = vector.shape_cast %56 : vector<256x128xf32> to vector<1x16x16x128xf32>
    %c0_79 = arith.constant 0 : index
    %c0_80 = arith.constant 0 : index
    %c0_81 = arith.constant 0 : index
    %c0_82 = arith.constant 0 : index
    %58 = vector.load %arg4[%c0_79, %c0_80, %c0_81, %c0_82] : memref<1x16x16x128xf32, #tpu.memory_space<vmem>>, vector<1x16x16x128xf32>
    tpu.vector_store %arg4[%c0_79, %c0_80, %c0_81, %c0_82], %57 {strides = array<i32>} : memref<1x16x16x128xf32, #tpu.memory_space<vmem>>, vector<1x16x16x128xf32>,
    %cst_83 = arith.constant dense<0.000000e+00> : vector<128xf32>
    %59 = vector.multi_reduction <add>, %56, %cst_83 [0] : vector<256x128xf32> to vector<128xf32>
    %60 = vector.shape_cast %59 : vector<128xf32> to vector<1x128xf32>
    %61 = vector.shape_cast %60 : vector<1x128xf32> to vector<1x1x128xf32>
    %c0_84 = arith.constant 0 : index
    %c0_85 = arith.constant 0 : index
    %c0_86 = arith.constant 0 : index
    %62 = vector.load %arg5[%c0_84, %c0_85, %c0_86] : memref<1x2x128xf32, #tpu.memory_space<vmem>>, vector<1x1x128xf32>
    tpu.vector_store %arg5[%c0_84, %c0_85, %c0_86], %61 {strides = array<i32>} : memref<1x2x128xf32, #tpu.memory_space<vmem>>, vector<1x1x128xf32>,
    %63 = arith.mulf %56, %56 : vector<256x128xf32>
    %cst_87 = arith.constant dense<0.000000e+00> : vector<128xf32>
    %64 = vector.multi_reduction <add>, %63, %cst_87 [0] : vector<256x128xf32> to vector<128xf32>
    %65 = vector.shape_cast %64 : vector<128xf32> to vector<1x128xf32>
    %66 = vector.shape_cast %65 : vector<1x128xf32> to vector<1x1x128xf32>
    %c0_88 = arith.constant 0 : index
    %c1_89 = arith.constant 1 : index
    %c0_90 = arith.constant 0 : index
    %67 = vector.load %arg5[%c0_88, %c1_89, %c0_90] : memref<1x2x128xf32, #tpu.memory_space<vmem>>, vector<1x1x128xf32>
    tpu.vector_store %arg5[%c0_88, %c1_89, %c0_90], %66 {strides = array<i32>} : memref<1x2x128xf32, #tpu.memory_space<vmem>>, vector<1x1x128xf32>,
    return
  }
  func.func @transform_0(%arg0: i32, %arg1: i32) -> (i32, i32, i32, i32) {
    %c1_i32 = arith.constant 1 : i32
    %0 = arith.muli %arg0, %c1_i32 : i32
    %1 = arith.addi %0, %arg1 : i32
    %c0_i32 = arith.constant 0 : i32
    %c0_i32_0 = arith.constant 0 : i32
    %c0_i32_1 = arith.constant 0 : i32
    %c0_i32_2 = arith.constant 0 : i32
    return %1, %c0_i32, %c0_i32_0, %c0_i32_1 : i32, i32, i32, i32
  }
  func.func @transform_1(%arg0: i32, %arg1: i32) -> (i32, i32, i32, i32) {
    %c0_i32 = arith.constant 0 : i32
    %c0_i32_0 = arith.constant 0 : i32
    %c0_i32_1 = arith.constant 0 : i32
    %c0_i32_2 = arith.constant 0 : i32
    %c0_i32_3 = arith.constant 0 : i32
    return %c0_i32, %c0_i32_0, %c0_i32_1, %c0_i32_2 : i32, i32, i32, i32
  }
  func.func @transform_2(%arg0: i32, %arg1: i32) -> (i32, i32, i32, i32) {
    %c0_i32 = arith.constant 0 : i32
    %c0_i32_0 = arith.constant 0 : i32
    %c0_i32_1 = arith.constant 0 : i32
    return %arg0, %arg1, %c0_i32, %c0_i32_0 : i32, i32, i32, i32
  }
  func.func @transform_3(%arg0: i32, %arg1: i32) -> (i32, i32, i32) {
    %c1_i32 = arith.constant 1 : i32
    %0 = arith.muli %arg0, %c1_i32 : i32
    %1 = arith.addi %0, %arg1 : i32
    %c0_i32 = arith.constant 0 : i32
    %c0_i32_0 = arith.constant 0 : i32
    %c0_i32_1 = arith.constant 0 : i32
    return %1, %c0_i32, %c0_i32_0 : i32, i32, i32
  }
}

module attributes {stable_mosaic.version = 11 : i64} {
  func.func @_bn_apply_kernel(%arg0: i32, %arg1: i32, %arg2: memref<1x16x16x128xf32, #tpu.memory_space<vmem>>, %arg3: memref<2x128xf32, #tpu.memory_space<vmem>>, %arg4: memref<1x128xf32, #tpu.memory_space<vmem>>, %arg5: memref<1x128xf32, #tpu.memory_space<vmem>>, %arg6: memref<1x16x16x128xbf16, #tpu.memory_space<vmem>>) attributes {dimension_semantics = [#tpu.dimension_semantics<parallel>, #tpu.dimension_semantics<parallel>], iteration_bounds = array<i64: 2, 1>, scalar_prefetch = 0 : i64, scratch_operands = 0 : i64, tpu.core_type = #tpu.core_type<tc>, window_params = [{transform_indices = @transform_0, window_bounds = array<i64: 1, 16, 16, 128>}, {pipeline_mode = #tpu.pipeline_mode<synchronous>, transform_indices = @transform_1, window_bounds = array<i64: 2, 128>}, {pipeline_mode = #tpu.pipeline_mode<synchronous>, transform_indices = @transform_2, window_bounds = array<i64: 1, 128>}, {pipeline_mode = #tpu.pipeline_mode<synchronous>, transform_indices = @transform_3, window_bounds = array<i64: 1, 128>}, {transform_indices = @transform_4, window_bounds = array<i64: 1, 16, 16, 128>}]} {
    %c0 = arith.constant 0 : index
    %c0_0 = arith.constant 0 : index
    %0 = vector.load %arg3[%c0, %c0_0] : memref<2x128xf32, #tpu.memory_space<vmem>>, vector<1x128xf32>
    %cst = arith.constant 0.001953125 : f32
    %1 = vector.broadcast %cst : f32 to vector<1x128xf32>
    %2 = arith.mulf %0, %1 : vector<1x128xf32>
    %c1 = arith.constant 1 : index
    %c0_1 = arith.constant 0 : index
    %3 = vector.load %arg3[%c1, %c0_1] : memref<2x128xf32, #tpu.memory_space<vmem>>, vector<1x128xf32>
    %cst_2 = arith.constant 0.001953125 : f32
    %4 = vector.broadcast %cst_2 : f32 to vector<1x128xf32>
    %5 = arith.mulf %3, %4 : vector<1x128xf32>
    %6 = arith.mulf %2, %2 : vector<1x128xf32>
    %7 = arith.subf %5, %6 : vector<1x128xf32>
    %cst_3 = arith.constant 0.000000e+00 : f32
    %8 = vector.broadcast %cst_3 : f32 to vector<1x128xf32>
    %9 = arith.maximumf %7, %8 : vector<1x128xf32>
    %c0_4 = arith.constant 0 : index
    %c0_5 = arith.constant 0 : index
    %10 = vector.load %arg4[%c0_4, %c0_5] : memref<1x128xf32, #tpu.memory_space<vmem>>, vector<1x128xf32>
    %cst_6 = arith.constant 9.99999974E-6 : f32
    %11 = vector.broadcast %cst_6 : f32 to vector<1x128xf32>
    %12 = arith.addf %9, %11 : vector<1x128xf32>
    %13 = math.rsqrt %12 : vector<1x128xf32>
    %14 = arith.mulf %10, %13 : vector<1x128xf32>
    %c0_7 = arith.constant 0 : index
    %c0_8 = arith.constant 0 : index
    %15 = vector.load %arg5[%c0_7, %c0_8] : memref<1x128xf32, #tpu.memory_space<vmem>>, vector<1x128xf32>
    %16 = arith.mulf %2, %14 : vector<1x128xf32>
    %17 = arith.subf %15, %16 : vector<1x128xf32>
    %c0_9 = arith.constant 0 : index
    %c0_10 = arith.constant 0 : index
    %c0_11 = arith.constant 0 : index
    %c0_12 = arith.constant 0 : index
    %18 = vector.load %arg2[%c0_9, %c0_10, %c0_11, %c0_12] : memref<1x16x16x128xf32, #tpu.memory_space<vmem>>, vector<1x16x16x128xf32>
    %19 = vector.shape_cast %14 : vector<1x128xf32> to vector<1x1x1x128xf32>
    %20 = vector.broadcast %19 : vector<1x1x1x128xf32> to vector<1x16x16x128xf32>
    %21 = arith.mulf %18, %20 : vector<1x16x16x128xf32>
    %22 = vector.shape_cast %17 : vector<1x128xf32> to vector<1x1x1x128xf32>
    %23 = vector.broadcast %22 : vector<1x1x1x128xf32> to vector<1x16x16x128xf32>
    %24 = arith.addf %21, %23 : vector<1x16x16x128xf32>
    %25 = arith.truncf %24 : vector<1x16x16x128xf32> to vector<1x16x16x128xbf16>
    %c0_13 = arith.constant 0 : index
    %c0_14 = arith.constant 0 : index
    %c0_15 = arith.constant 0 : index
    %c0_16 = arith.constant 0 : index
    %26 = vector.load %arg6[%c0_13, %c0_14, %c0_15, %c0_16] : memref<1x16x16x128xbf16, #tpu.memory_space<vmem>>, vector<1x16x16x128xbf16>
    tpu.vector_store %arg6[%c0_13, %c0_14, %c0_15, %c0_16], %25 {strides = array<i32>} : memref<1x16x16x128xbf16, #tpu.memory_space<vmem>>, vector<1x16x16x128xbf16>,
    return
  }
  func.func @transform_0(%arg0: i32, %arg1: i32) -> (i32, i32, i32, i32) {
    %c0_i32 = arith.constant 0 : i32
    %c0_i32_0 = arith.constant 0 : i32
    %c0_i32_1 = arith.constant 0 : i32
    return %arg0, %arg1, %c0_i32, %c0_i32_0 : i32, i32, i32, i32
  }
  func.func @transform_1(%arg0: i32, %arg1: i32) -> (i32, i32) {
    %c0_i32 = arith.constant 0 : i32
    %c0_i32_0 = arith.constant 0 : i32
    %c0_i32_1 = arith.constant 0 : i32
    return %c0_i32, %c0_i32_0 : i32, i32
  }
  func.func @transform_2(%arg0: i32, %arg1: i32) -> (i32, i32) {
    %c0_i32 = arith.constant 0 : i32
    %c0_i32_0 = arith.constant 0 : i32
    %c0_i32_1 = arith.constant 0 : i32
    return %c0_i32, %c0_i32_0 : i32, i32
  }
  func.func @transform_3(%arg0: i32, %arg1: i32) -> (i32, i32) {
    %c0_i32 = arith.constant 0 : i32
    %c0_i32_0 = arith.constant 0 : i32
    %c0_i32_1 = arith.constant 0 : i32
    return %c0_i32, %c0_i32_0 : i32, i32
  }
  func.func @transform_4(%arg0: i32, %arg1: i32) -> (i32, i32, i32, i32) {
    %c0_i32 = arith.constant 0 : i32
    %c0_i32_0 = arith.constant 0 : i32
    %c0_i32_1 = arith.constant 0 : i32
    return %arg0, %arg1, %c0_i32, %c0_i32_0 : i32, i32, i32, i32
  }
}

module attributes {stable_mosaic.version = 11 : i64} {
  func.func @_bn_apply_kernel(%arg0: i32, %arg1: i32, %arg2: memref<1x16x16x128xf32, #tpu.memory_space<vmem>>, %arg3: memref<2x128xf32, #tpu.memory_space<vmem>>, %arg4: memref<1x128xf32, #tpu.memory_space<vmem>>, %arg5: memref<1x128xf32, #tpu.memory_space<vmem>>, %arg6: memref<1x16x16x128xf32, #tpu.memory_space<vmem>>) attributes {dimension_semantics = [#tpu.dimension_semantics<parallel>, #tpu.dimension_semantics<parallel>], iteration_bounds = array<i64: 2, 1>, scalar_prefetch = 0 : i64, scratch_operands = 0 : i64, tpu.core_type = #tpu.core_type<tc>, window_params = [{transform_indices = @transform_0, window_bounds = array<i64: 1, 16, 16, 128>}, {pipeline_mode = #tpu.pipeline_mode<synchronous>, transform_indices = @transform_1, window_bounds = array<i64: 2, 128>}, {pipeline_mode = #tpu.pipeline_mode<synchronous>, transform_indices = @transform_2, window_bounds = array<i64: 1, 128>}, {pipeline_mode = #tpu.pipeline_mode<synchronous>, transform_indices = @transform_3, window_bounds = array<i64: 1, 128>}, {transform_indices = @transform_4, window_bounds = array<i64: 1, 16, 16, 128>}]} {
    %c0 = arith.constant 0 : index
    %c0_0 = arith.constant 0 : index
    %0 = vector.load %arg3[%c0, %c0_0] : memref<2x128xf32, #tpu.memory_space<vmem>>, vector<1x128xf32>
    %cst = arith.constant 0.001953125 : f32
    %1 = vector.broadcast %cst : f32 to vector<1x128xf32>
    %2 = arith.mulf %0, %1 : vector<1x128xf32>
    %c1 = arith.constant 1 : index
    %c0_1 = arith.constant 0 : index
    %3 = vector.load %arg3[%c1, %c0_1] : memref<2x128xf32, #tpu.memory_space<vmem>>, vector<1x128xf32>
    %cst_2 = arith.constant 0.001953125 : f32
    %4 = vector.broadcast %cst_2 : f32 to vector<1x128xf32>
    %5 = arith.mulf %3, %4 : vector<1x128xf32>
    %6 = arith.mulf %2, %2 : vector<1x128xf32>
    %7 = arith.subf %5, %6 : vector<1x128xf32>
    %cst_3 = arith.constant 0.000000e+00 : f32
    %8 = vector.broadcast %cst_3 : f32 to vector<1x128xf32>
    %9 = arith.maximumf %7, %8 : vector<1x128xf32>
    %c0_4 = arith.constant 0 : index
    %c0_5 = arith.constant 0 : index
    %10 = vector.load %arg4[%c0_4, %c0_5] : memref<1x128xf32, #tpu.memory_space<vmem>>, vector<1x128xf32>
    %cst_6 = arith.constant 9.99999974E-6 : f32
    %11 = vector.broadcast %cst_6 : f32 to vector<1x128xf32>
    %12 = arith.addf %9, %11 : vector<1x128xf32>
    %13 = math.rsqrt %12 : vector<1x128xf32>
    %14 = arith.mulf %10, %13 : vector<1x128xf32>
    %c0_7 = arith.constant 0 : index
    %c0_8 = arith.constant 0 : index
    %15 = vector.load %arg5[%c0_7, %c0_8] : memref<1x128xf32, #tpu.memory_space<vmem>>, vector<1x128xf32>
    %16 = arith.mulf %2, %14 : vector<1x128xf32>
    %17 = arith.subf %15, %16 : vector<1x128xf32>
    %c0_9 = arith.constant 0 : index
    %c0_10 = arith.constant 0 : index
    %c0_11 = arith.constant 0 : index
    %c0_12 = arith.constant 0 : index
    %18 = vector.load %arg2[%c0_9, %c0_10, %c0_11, %c0_12] : memref<1x16x16x128xf32, #tpu.memory_space<vmem>>, vector<1x16x16x128xf32>
    %19 = vector.shape_cast %14 : vector<1x128xf32> to vector<1x1x1x128xf32>
    %20 = vector.broadcast %19 : vector<1x1x1x128xf32> to vector<1x16x16x128xf32>
    %21 = arith.mulf %18, %20 : vector<1x16x16x128xf32>
    %22 = vector.shape_cast %17 : vector<1x128xf32> to vector<1x1x1x128xf32>
    %23 = vector.broadcast %22 : vector<1x1x1x128xf32> to vector<1x16x16x128xf32>
    %24 = arith.addf %21, %23 : vector<1x16x16x128xf32>
    %c0_13 = arith.constant 0 : index
    %c0_14 = arith.constant 0 : index
    %c0_15 = arith.constant 0 : index
    %c0_16 = arith.constant 0 : index
    %25 = vector.load %arg6[%c0_13, %c0_14, %c0_15, %c0_16] : memref<1x16x16x128xf32, #tpu.memory_space<vmem>>, vector<1x16x16x128xf32>
    tpu.vector_store %arg6[%c0_13, %c0_14, %c0_15, %c0_16], %24 {strides = array<i32>} : memref<1x16x16x128xf32, #tpu.memory_space<vmem>>, vector<1x16x16x128xf32>,
    return
  }
  func.func @transform_0(%arg0: i32, %arg1: i32) -> (i32, i32, i32, i32) {
    %c0_i32 = arith.constant 0 : i32
    %c0_i32_0 = arith.constant 0 : i32
    %c0_i32_1 = arith.constant 0 : i32
    return %arg0, %arg1, %c0_i32, %c0_i32_0 : i32, i32, i32, i32
  }
  func.func @transform_1(%arg0: i32, %arg1: i32) -> (i32, i32) {
    %c0_i32 = arith.constant 0 : i32
    %c0_i32_0 = arith.constant 0 : i32
    %c0_i32_1 = arith.constant 0 : i32
    return %c0_i32, %c0_i32_0 : i32, i32
  }
  func.func @transform_2(%arg0: i32, %arg1: i32) -> (i32, i32) {
    %c0_i32 = arith.constant 0 : i32
    %c0_i32_0 = arith.constant 0 : i32
    %c0_i32_1 = arith.constant 0 : i32
    return %c0_i32, %c0_i32_0 : i32, i32
  }
  func.func @transform_3(%arg0: i32, %arg1: i32) -> (i32, i32) {
    %c0_i32 = arith.constant 0 : i32
    %c0_i32_0 = arith.constant 0 : i32
    %c0_i32_1 = arith.constant 0 : i32
    return %c0_i32, %c0_i32_0 : i32, i32
  }
  func.func @transform_4(%arg0: i32, %arg1: i32) -> (i32, i32, i32, i32) {
    %c0_i32 = arith.constant 0 : i32
    %c0_i32_0 = arith.constant 0 : i32
    %c0_i32_1 = arith.constant 0 : i32
    return %arg0, %arg1, %c0_i32, %c0_i32_0 : i32, i32, i32, i32
  }
}

</mosaic_0001>

<bundles_post_ra>
// kernel: double_conv.7
= control target key start
LH: loop header
LB: loop body
LE: loop exit
PB: predicated region body
PF: predicated region fallthrough
CT: control target
= control target key end

     0   :  { %s580_s15 = smov 0   ;;  %s582_s16 = smov 0   ;;  %s768_s0 = inlined_call_operand.vmem [shape: f32[2,16,16,128], index: 0, kind: input, shape index: {}]   ;;  %s769_s1 = inlined_call_operand.vmem [shape: f32[2,128], index: 1, kind: input, shape index: {}]   ;;  %s770_s2 = inlined_call_operand.vmem [shape: f32[1,128], index: 2, kind: input, shape index: {}]   ;;  %s771_s3 = inlined_call_operand.vmem [shape: f32[1,128], index: 3, kind: input, shape index: {}]   ;;  %s772_s4 = inlined_call_operand.vmem [shape: f32[2,16,16,128], index: 4, kind: output, shape index: {}]  }
   0x1   :  { %s584_s17 = smov 0  }
   0x2 LB: > { %s26_s18 = sadd.s32 1, %s549_s16  ;;  %p496_p0 = scmp.ge.s32.totalorder %s553_s17, 1  ;;  %s553_s17 = sphi %s584_s17, %s14_s17   ;;  %s549_s16 = sphi %s582_s16, %s774_s16   ;;  %s545_s15 = sphi %s580_s15, %s773_s15  }
   0x3   : > { %p28_p1 = scmp.ge.s32.totalorder %s26_s18, 2  ;;  %p184_p2 = scmp.lt.s32.totalorder %s553_s17, 3 }
   0x5   : > { %s776_s18 = smov (%p28_p1, %s26_s18), 0  ;;  %p185_p3 = pnand %p496_p0, %p184_p2 }
   0x6   : > { %v242_v0 = vld [vmem:[%s769_s1] sm:$0x1] (!%p185_p3)  ;;  %v244_v1 = vld [vmem:[%s769_s1 + $0x1] sm:$0x1] (!%p185_p3)  ;;  %p221_p4 = scmp.lt.s32.totalorder (!%p185_p3), %s545_s15, 1  ;;  %v289_v8 = vlaneseq (!%p185_p3) }
   0x7   : > { %188 = sbr.rel (%p185_p3) target bundleno = 55 (0x37), region = 36  ;;  %v243_v2 = vmul.f32 (!%p185_p3), 0.001953125, %v242_v0  ;;  %v245_v3 = vmul.f32 (!%p185_p3), 0.001953125, %v244_v1  ;;  %v249_v10 = vld [vmem:[%s770_s2] sm:$0x1] (!%p185_p3) }
   0x8   : > { %v290_v9 = vshrl.u32 (!%p185_p3), %v289_v8, 7  ;;  %v253_v14 = vld [vmem:[%s771_s3] sm:$0x1] (!%p185_p3) }
   0x9   : > { %v246_v4 = vmul.f32 (!%p185_p3), %v243_v2, %v243_v2 }
   0xa   : > { %v291_v11 = vsub.s32 (!%p185_p3), 0, %v290_v9 }
   0xb   : > { %v247_v5 = vsub.f32 (!%p185_p3), %v245_v3, %v246_v4 }
   0xd   : > { %v248_v6 = vmax.f32 (!%p185_p3), %v247_v5, 0.0 }
   0xe   : > { %s778_s15 = smov (!%p221_p4, %s545_s15), 1 }
   0xf   : > { %v250_v7 = vadd.f32 1e-05, %v248_v6  ;;  %s503_s23 = sshll.u32 %s778_s15, 8 }
  0x10   : > { %s612_s26 = scalar_lea.vmem %s768_s0, %s503_s23  ;;  %s653_s7 = scalar_lea.vmem %s772_s4, %s503_s23 }
  0x11   : > { %529 = vrsqrt.f32 %v250_v7  ;;  %v256_v15 = vld [vmem:[%s612_s26] sm:$0xff]  ;;  %v257_v16 = vld [vmem:[%s612_s26 + $0x8] sm:$0xff]  ;;  %v258_v17 = vld [vmem:[%s612_s26 + $0x10] sm:$0xff] }
  0x12   : > { %v259_v18 = vld [vmem:[%s612_s26 + $0x18] sm:$0xff]  ;;  %v260_v19 = vld [vmem:[%s612_s26 + $0x20] sm:$0xff]  ;;  %v261_v22 = vld [vmem:[%s612_s26 + $0x28] sm:$0xff] }
  0x13   : > { %v262_v23 = vld [vmem:[%s612_s26 + $0x30] sm:$0xff]  ;;  %v263_v24 = vld [vmem:[%s612_s26 + $0x38] sm:$0xff]  ;;  %v264_v25 = vld [vmem:[%s612_s26 + $0x40] sm:$0xff] }
  0x14   : > { %v265_v26 = vld [vmem:[%s612_s26 + $0x48] sm:$0xff]  ;;  %v266_v27 = vld [vmem:[%s612_s26 + $0x50] sm:$0xff]  ;;  %v267_v32 = vld [vmem:[%s612_s26 + $0x58] sm:$0xff] }
  0x15   : > { %v268_v33 = vld [vmem:[%s612_s26 + $0x60] sm:$0xff]  ;;  %v269_v34 = vld [vmem:[%s612_s26 + $0x68] sm:$0xff]  ;;  %v270_v51 = vld [vmem:[%s612_s26 + $0x70] sm:$0xff] }
  0x16   : > { %v271_v52 = vld [vmem:[%s612_s26 + $0x78] sm:$0xff]  ;;  %v272_v53 = vld [vmem:[%s612_s26 + $0x80] sm:$0xff]  ;;  %v273_v58 = vld [vmem:[%s612_s26 + $0x88] sm:$0xff] }
  0x17   : > { %v274_v59 = vld [vmem:[%s612_s26 + $0x90] sm:$0xff]  ;;  %v275_v60 = vld [vmem:[%s612_s26 + $0x98] sm:$0xff]  ;;  %v276_v1 = vld [vmem:[%s612_s26 + $0xa0] sm:$0xff] }
  0x1b   : > { %v530_v12 = vpop.eup %529 }
  0x1c   : > { %v252_v13 = vmul.f32 %v530_v12, %v249_v10  ;;  %v279_v12 = vld [vmem:[%s612_s26 + $0xb8] sm:$0xff] }
  0x1e   : > { %v254_v20 = vmul.f32 %v252_v13, %v243_v2  ;;  %v625_v21 = vrot.slane %v252_v13, %v291_v11  ;;  %v277_v2 = vld [vmem:[%s612_s26 + $0xa8] sm:$0xff]  ;;  %v280_v13 = vld [vmem:[%s612_s26 + $0xc0] sm:$0xff] }
  0x20   : > { %v255_v28 = vsub.f32 %v253_v14, %v254_v20  ;;  %v294_v29 = vmul.f32 %v625_v21, %v256_v15  ;;  %v295_v30 = vmul.f32 %v625_v21, %v257_v16  ;;  %v296_v31 = vmul.f32 %v625_v21, %v258_v17  ;;  %v283_v20 = vld [vmem:[%s612_s26 + $0xd8] sm:$0xff] }
  0x21   : > { %v297_v35 = vmul.f32 %v625_v21, %v259_v18  ;;  %v298_v36 = vmul.f32 %v625_v21, %v260_v19  ;;  %v299_v37 = vmul.f32 %v625_v21, %v261_v22  ;;  %v300_v38 = vmul.f32 %v625_v21, %v262_v23  ;;  %v281_v18 = vld [vmem:[%s612_s26 + $0xc8] sm:$0xff]  ;;  %v282_v19 = vld [vmem:[%s612_s26 + $0xd0] sm:$0xff] }
  0x22   : > { %v643_v39 = vrot.slane %v255_v28, %v291_v11  ;;  %v301_v40 = vmul.f32 %v625_v21, %v263_v24  ;;  %v302_v41 = vmul.f32 %v625_v21, %v264_v25  ;;  %v303_v42 = vmul.f32 %v625_v21, %v265_v26  ;;  %v278_v11 = vld [vmem:[%s612_s26 + $0xb0] sm:$0xff]  ;;  %v284_v26 = vld [vmem:[%s612_s26 + $0xe0] sm:$0xff] }
  0x23   : > { %v304_v43 = vmul.f32 %v625_v21, %v266_v27  ;;  %v305_v44 = vmul.f32 %v625_v21, %v267_v32  ;;  %v306_v45 = vmul.f32 %v625_v21, %v268_v33  ;;  %v307_v46 = vmul.f32 %v625_v21, %v269_v34  ;;  %v285_v27 = vld [vmem:[%s612_s26 + $0xe8] sm:$0xff] }
  0x24   : > { %v332_v47 = vadd.f32 %v643_v39, %v294_v29  ;;  %v333_v48 = vadd.f32 %v643_v39, %v295_v30  ;;  %v334_v49 = vadd.f32 %v643_v39, %v296_v31  ;;  %v335_v50 = vadd.f32 %v643_v39, %v297_v35 }
  0x25   : > { %v336_v54 = vadd.f32 %v643_v39, %v298_v36  ;;  %v337_v55 = vadd.f32 %v643_v39, %v299_v37  ;;  %v338_v56 = vadd.f32 %v643_v39, %v300_v38  ;;  %v339_v57 = vadd.f32 %v643_v39, %v301_v40  ;;  %v286_v36 = vld [vmem:[%s612_s26 + $0xf0] sm:$0xff]  ;;  %v287_v37 = vld [vmem:[%s612_s26 + $0xf8] sm:$0xff] }
  0x26   : > { %364 = vst [vmem:[%s653_s7] sm:$0xff] %v332_v47  ;;  %365 = vst [vmem:[%s653_s7 + $0x8] sm:$0xff] %v333_v48  ;;  %v340_v61 = vadd.f32 %v643_v39, %v302_v41  ;;  %v341_v62 = vadd.f32 %v643_v39, %v303_v42  ;;  %v342_v63 = vadd.f32 %v643_v39, %v304_v43 }
  0x27   : > { %366 = vst [vmem:[%s653_s7 + $0x10] sm:$0xff] %v334_v49  ;;  %367 = vst [vmem:[%s653_s7 + $0x18] sm:$0xff] %v335_v50  ;;  %v343_v0 = vadd.f32 %v643_v39, %v305_v44  ;;  %v344_v3 = vadd.f32 %v643_v39, %v306_v45  ;;  %v345_v4 = vadd.f32 %v643_v39, %v307_v46 }
  0x28   : > { %368 = vst [vmem:[%s653_s7 + $0x20] sm:$0xff] %v336_v54  ;;  %369 = vst [vmem:[%s653_s7 + $0x28] sm:$0xff] %v337_v55  ;;  %v308_v5 = vmul.f32 %v625_v21, %v270_v51  ;;  %v309_v6 = vmul.f32 %v625_v21, %v271_v52  ;;  %v310_v7 = vmul.f32 %v625_v21, %v272_v53 }
  0x29   : > { %370 = vst [vmem:[%s653_s7 + $0x30] sm:$0xff] %v338_v56  ;;  %371 = vst [vmem:[%s653_s7 + $0x38] sm:$0xff] %v339_v57  ;;  %v311_v8 = vmul.f32 %v625_v21, %v273_v58  ;;  %v312_v9 = vmul.f32 %v625_v21, %v274_v59  ;;  %v313_v10 = vmul.f32 %v625_v21, %v275_v60 }
  0x2a   : > { %372 = vst [vmem:[%s653_s7 + $0x40] sm:$0xff] %v340_v61  ;;  %373 = vst [vmem:[%s653_s7 + $0x48] sm:$0xff] %v341_v62  ;;  %v346_v14 = vadd.f32 %v643_v39, %v308_v5  ;;  %v347_v15 = vadd.f32 %v643_v39, %v309_v6  ;;  %v314_v16 = vmul.f32 %v625_v21, %v276_v1 }
  0x2b   : > { %374 = vst [vmem:[%s653_s7 + $0x50] sm:$0xff] %v342_v63  ;;  %375 = vst [vmem:[%s653_s7 + $0x58] sm:$0xff] %v343_v0  ;;  %v315_v17 = vmul.f32 %v625_v21, %v277_v2  ;;  %v348_v22 = vadd.f32 %v643_v39, %v310_v7  ;;  %v349_v23 = vadd.f32 %v643_v39, %v311_v8 }
  0x2c   : > { %376 = vst [vmem:[%s653_s7 + $0x60] sm:$0xff] %v344_v3  ;;  %377 = vst [vmem:[%s653_s7 + $0x68] sm:$0xff] %v345_v4  ;;  %v350_v24 = vadd.f32 %v643_v39, %v312_v9  ;;  %v351_v25 = vadd.f32 %v643_v39, %v313_v10  ;;  %v352_v28 = vadd.f32 %v643_v39, %v314_v16 }
  0x2d   : > { %378 = vst [vmem:[%s653_s7 + $0x70] sm:$0xff] %v346_v14  ;;  %379 = vst [vmem:[%s653_s7 + $0x78] sm:$0xff] %v347_v15  ;;  %v353_v29 = vadd.f32 %v643_v39, %v315_v17  ;;  %v316_v30 = vmul.f32 %v625_v21, %v278_v11  ;;  %v317_v31 = vmul.f32 %v625_v21, %v279_v12 }
  0x2e   : > { %380 = vst [vmem:[%s653_s7 + $0x80] sm:$0xff] %v348_v22  ;;  %381 = vst [vmem:[%s653_s7 + $0x88] sm:$0xff] %v349_v23  ;;  %v318_v32 = vmul.f32 %v625_v21, %v280_v13  ;;  %v319_v33 = vmul.f32 %v625_v21, %v281_v18  ;;  %v320_v34 = vmul.f32 %v625_v21, %v282_v19 }
  0x2f   : > { %382 = vst [vmem:[%s653_s7 + $0x90] sm:$0xff] %v350_v24  ;;  %383 = vst [vmem:[%s653_s7 + $0x98] sm:$0xff] %v351_v25  ;;  %v321_v35 = vmul.f32 %v625_v21, %v283_v20  ;;  %v354_v38 = vadd.f32 %v643_v39, %v316_v30  ;;  %v355_v40 = vadd.f32 %v643_v39, %v317_v31 }
  0x30   : > { %384 = vst [vmem:[%s653_s7 + $0xa0] sm:$0xff] %v352_v28  ;;  %385 = vst [vmem:[%s653_s7 + $0xa8] sm:$0xff] %v353_v29  ;;  %v322_v41 = vmul.f32 %v625_v21, %v284_v26  ;;  %v323_v42 = vmul.f32 %v625_v21, %v285_v27  ;;  %v356_v43 = vadd.f32 %v643_v39, %v318_v32 }
  0x31   : > { %v357_v44 = vadd.f32 %v643_v39, %v319_v33  ;;  %v358_v45 = vadd.f32 %v643_v39, %v320_v34  ;;  %v359_v46 = vadd.f32 %v643_v39, %v321_v35  ;;  %386 = vst [vmem:[%s653_s7 + $0xb0] sm:$0xff] %v354_v38  ;;  %387 = vst [vmem:[%s653_s7 + $0xb8] sm:$0xff] %v355_v40 }
  0x32   : > { %v360_v47 = vadd.f32 %v643_v39, %v322_v41  ;;  %v361_v48 = vadd.f32 %v643_v39, %v323_v42  ;;  %v324_v49 = vmul.f32 %v625_v21, %v286_v36  ;;  %v325_v50 = vmul.f32 %v625_v21, %v287_v37  ;;  %388 = vst [vmem:[%s653_s7 + $0xc0] sm:$0xff] %v356_v43 }
  0x33   : > { %389 = vst [vmem:[%s653_s7 + $0xc8] sm:$0xff] %v357_v44  ;;  %390 = vst [vmem:[%s653_s7 + $0xd0] sm:$0xff] %v358_v45 }
  0x34   : > { %391 = vst [vmem:[%s653_s7 + $0xd8] sm:$0xff] %v359_v46  ;;  %392 = vst [vmem:[%s653_s7 + $0xe0] sm:$0xff] %v360_v47  ;;  %v362_v51 = vadd.f32 %v643_v39, %v324_v49  ;;  %v363_v52 = vadd.f32 %v643_v39, %v325_v50 }
  0x35   : > { %393 = vst [vmem:[%s653_s7 + $0xe8] sm:$0xff] %v361_v48 }
  0x36   : > { %394 = vst [vmem:[%s653_s7 + $0xf0] sm:$0xff] %v362_v51  ;;  %395 = vst [vmem:[%s653_s7 + $0xf8] sm:$0xff] %v363_v52 }
  0x37 PF: > { %s14_s17 = sadd.s32 1, %s553_s17   ;;  %s773_s15 = smov %s549_s16 }
  0x38   : > { %p11_p5 = scmp.ge.s32.totalorder %s14_s17, 4   ;;  %s774_s16 = smov %s776_s18 }
  0x3a   :  { %13 = sbr.rel (!%p11_p5) target bundleno = 2 (0x2), region = 66 }

// kernel: double_conv.5
= control target key start
LH: loop header
LB: loop body
LE: loop exit
PB: predicated region body
PF: predicated region fallthrough
CT: control target
= control target key end

     0   :  { %s867_s15 = smov 0   ;;  %s869_s16 = smov 0   ;;  %s1036_s0 = inlined_call_operand.vmem [shape: f32[2,16,16,128], index: 0, kind: input, shape index: {}]   ;;  %s1037_s1 = inlined_call_operand.vmem [shape: f32[2,128], index: 1, kind: input, shape index: {}]   ;;  %s1038_s2 = inlined_call_operand.vmem [shape: f32[1,128], index: 2, kind: input, shape index: {}]   ;;  %s1039_s3 = inlined_call_operand.vmem [shape: f32[1,128], index: 3, kind: input, shape index: {}]   ;;  %s1040_s4 = inlined_call_operand.vmem [shape: bf16[2,16,16,128], index: 4, kind: output, shape index: {}]  }
   0x1   :  { %s871_s17 = smov 0  }
   0x2 LB: > { %s26_s18 = sadd.s32 1, %s836_s16  ;;  %p624_p0 = scmp.ge.s32.totalorder %s840_s17, 1  ;;  %s840_s17 = sphi %s871_s17, %s14_s17   ;;  %s836_s16 = sphi %s869_s16, %s1042_s16   ;;  %s832_s15 = sphi %s867_s15, %s1041_s15  }
   0x3   : > { %p28_p1 = scmp.ge.s32.totalorder %s26_s18, 2  ;;  %p184_p2 = scmp.lt.s32.totalorder %s840_s17, 3 }
   0x5   : > { %s1044_s18 = smov (%p28_p1, %s26_s18), 0  ;;  %p185_p3 = pnand %p624_p0, %p184_p2 }
   0x6   : > { %v242_v0 = vld [vmem:[%s1037_s1] sm:$0x1] (!%p185_p3)  ;;  %v244_v1 = vld [vmem:[%s1037_s1 + $0x1] sm:$0x1] (!%p185_p3)  ;;  %p221_p4 = scmp.lt.s32.totalorder (!%p185_p3), %s832_s15, 1  ;;  %v289_v8 = vlaneseq (!%p185_p3) }
   0x7   : > { %188 = sbr.rel (%p185_p3) target bundleno = 57 (0x39), region = 36  ;;  %v243_v2 = vmul.f32 (!%p185_p3), 0.001953125, %v242_v0  ;;  %v245_v3 = vmul.f32 (!%p185_p3), 0.001953125, %v244_v1  ;;  %v249_v10 = vld [vmem:[%s1038_s2] sm:$0x1] (!%p185_p3) }
   0x8   : > { %v290_v9 = vshrl.u32 (!%p185_p3), %v289_v8, 7  ;;  %v253_v14 = vld [vmem:[%s1039_s3] sm:$0x1] (!%p185_p3) }
   0x9   : > { %v246_v4 = vmul.f32 (!%p185_p3), %v243_v2, %v243_v2 }
   0xa   : > { %v291_v11 = vsub.s32 (!%p185_p3), 0, %v290_v9 }
   0xb   : > { %v247_v5 = vsub.f32 (!%p185_p3), %v245_v3, %v246_v4 }
   0xd   : > { %v248_v6 = vmax.f32 (!%p185_p3), %v247_v5, 0.0 }
   0xe   : > { %s1046_s15 = smov (!%p221_p4, %s832_s15), 1 }
   0xf   : > { %v250_v7 = vadd.f32 1e-05, %v248_v6  ;;  %s663_s23 = sshll.u32 %s1046_s15, 8  ;;  %s664_s5 = sshll.u32 %s1046_s15, 7 }
  0x10   : > { %s897_s26 = scalar_lea.vmem %s1036_s0, %s663_s23  ;;  %s945_s8 = scalar_lea.vmem %s1040_s4, %s664_s5 }
  0x11   : > { %816 = vrsqrt.f32 %v250_v7  ;;  %v256_v15 = vld [vmem:[%s897_s26] sm:$0xff]  ;;  %v257_v16 = vld [vmem:[%s897_s26 + $0x8] sm:$0xff]  ;;  %v258_v17 = vld [vmem:[%s897_s26 + $0x10] sm:$0xff] }
  0x12   : > { %v259_v18 = vld [vmem:[%s897_s26 + $0x18] sm:$0xff]  ;;  %v260_v19 = vld [vmem:[%s897_s26 + $0x20] sm:$0xff]  ;;  %v261_v22 = vld [vmem:[%s897_s26 + $0x28] sm:$0xff] }
  0x13   : > { %v262_v23 = vld [vmem:[%s897_s26 + $0x30] sm:$0xff]  ;;  %v263_v24 = vld [vmem:[%s897_s26 + $0x38] sm:$0xff]  ;;  %v264_v25 = vld [vmem:[%s897_s26 + $0x40] sm:$0xff] }
  0x14   : > { %v265_v26 = vld [vmem:[%s897_s26 + $0x48] sm:$0xff]  ;;  %v266_v27 = vld [vmem:[%s897_s26 + $0x50] sm:$0xff]  ;;  %v267_v32 = vld [vmem:[%s897_s26 + $0x58] sm:$0xff] }
  0x15   : > { %v268_v33 = vld [vmem:[%s897_s26 + $0x60] sm:$0xff]  ;;  %v269_v34 = vld [vmem:[%s897_s26 + $0x68] sm:$0xff]  ;;  %v270_v55 = vld [vmem:[%s897_s26 + $0x70] sm:$0xff] }
  0x16   : > { %v271_v60 = vld [vmem:[%s897_s26 + $0x78] sm:$0xff]  ;;  %v272_v61 = vld [vmem:[%s897_s26 + $0x80] sm:$0xff]  ;;  %v273_v62 = vld [vmem:[%s897_s26 + $0x88] sm:$0xff] }
  0x17   : > { %v274_v3 = vld [vmem:[%s897_s26 + $0x90] sm:$0xff]  ;;  %v275_v4 = vld [vmem:[%s897_s26 + $0x98] sm:$0xff]  ;;  %v276_v9 = vld [vmem:[%s897_s26 + $0xa0] sm:$0xff] }
  0x1b   : > { %v817_v12 = vpop.eup %816 }
  0x1c   : > { %v252_v13 = vmul.f32 %v817_v12, %v249_v10 }
  0x1e   : > { %v254_v20 = vmul.f32 %v252_v13, %v243_v2  ;;  %v910_v21 = vrot.slane %v252_v13, %v291_v11 }
  0x20   : > { %v255_v28 = vsub.f32 %v253_v14, %v254_v20  ;;  %v294_v29 = vmul.f32 %v910_v21, %v256_v15  ;;  %v295_v30 = vmul.f32 %v910_v21, %v257_v16  ;;  %v296_v31 = vmul.f32 %v910_v21, %v258_v17  ;;  %v277_v14 = vld [vmem:[%s897_s26 + $0xa8] sm:$0xff]  ;;  %v278_v15 = vld [vmem:[%s897_s26 + $0xb0] sm:$0xff]  ;;  %v279_v20 = vld [vmem:[%s897_s26 + $0xb8] sm:$0xff] }
  0x21   : > { %v297_v35 = vmul.f32 %v910_v21, %v259_v18  ;;  %v298_v36 = vmul.f32 %v910_v21, %v260_v19  ;;  %v299_v37 = vmul.f32 %v910_v21, %v261_v22  ;;  %v300_v38 = vmul.f32 %v910_v21, %v262_v23 }
  0x22   : > { %v929_v39 = vrot.slane %v255_v28, %v291_v11  ;;  %v301_v40 = vmul.f32 %v910_v21, %v263_v24  ;;  %v302_v41 = vmul.f32 %v910_v21, %v264_v25  ;;  %v303_v42 = vmul.f32 %v910_v21, %v265_v26  ;;  %v280_v26 = vld [vmem:[%s897_s26 + $0xc0] sm:$0xff] }
  0x23   : > { %v304_v43 = vmul.f32 %v910_v21, %v266_v27  ;;  %v305_v44 = vmul.f32 %v910_v21, %v267_v32  ;;  %v306_v45 = vmul.f32 %v910_v21, %v268_v33  ;;  %v307_v46 = vmul.f32 %v910_v21, %v269_v34  ;;  %v282_v32 = vld [vmem:[%s897_s26 + $0xd0] sm:$0xff]  ;;  %v283_v33 = vld [vmem:[%s897_s26 + $0xd8] sm:$0xff] }
  0x24   : > { %v332_v47 = vadd.f32 %v929_v39, %v294_v29  ;;  %v333_v48 = vadd.f32 %v929_v39, %v295_v30  ;;  %v334_v49 = vadd.f32 %v929_v39, %v296_v31  ;;  %v335_v50 = vadd.f32 %v929_v39, %v297_v35  ;;  %v281_v31 = vld [vmem:[%s897_s26 + $0xc8] sm:$0xff] }
  0x25   : > { %v336_v51 = vadd.f32 %v929_v39, %v298_v36  ;;  %v337_v52 = vadd.f32 %v929_v39, %v299_v37  ;;  %v338_v53 = vadd.f32 %v929_v39, %v300_v38  ;;  %v339_v54 = vadd.f32 %v929_v39, %v301_v40  ;;  %v284_v38 = vld [vmem:[%s897_s26 + $0xe0] sm:$0xff]  ;;  %v285_v40 = vld [vmem:[%s897_s26 + $0xe8] sm:$0xff] }
  0x26   : > { %v700_v56 = vpack.c.bf16 %v333_v48, %v332_v47  ;;  %v705_v57 = vpack.c.bf16 %v335_v50, %v334_v49  ;;  %v340_v58 = vadd.f32 %v929_v39, %v302_v41  ;;  %v341_v59 = vadd.f32 %v929_v39, %v303_v42  ;;  %v286_v49 = vld [vmem:[%s897_s26 + $0xf0] sm:$0xff]  ;;  %v287_v50 = vld [vmem:[%s897_s26 + $0xf8] sm:$0xff] }
  0x27   : > { %v710_v63 = vpack.c.bf16 %v337_v52, %v336_v51  ;;  %v715_v0 = vpack.c.bf16 %v339_v54, %v338_v53  ;;  %v342_v1 = vadd.f32 %v929_v39, %v304_v43  ;;  %v343_v2 = vadd.f32 %v929_v39, %v305_v44 }
  0x28   : > { %701 = vst [vmem:[%s945_s8] sm:$0xff] %v700_v56   ;;  %777 = vst [vmem:[%s945_s8 + $0x8] sm:$0xff] %v705_v57   ;;  %v720_v5 = vpack.c.bf16 %v341_v59, %v340_v58  ;;  %v344_v6 = vadd.f32 %v929_v39, %v306_v45  ;;  %v345_v7 = vadd.f32 %v929_v39, %v307_v46 }
  0x29   : > { %v308_v8 = vmul.f32 %v910_v21, %v270_v55  ;;  %778 = vst [vmem:[%s945_s8 + $0x10] sm:$0xff] %v710_v63   ;;  %779 = vst [vmem:[%s945_s8 + $0x18] sm:$0xff] %v715_v0   ;;  %v725_v10 = vpack.c.bf16 %v343_v2, %v342_v1  ;;  %v309_v11 = vmul.f32 %v910_v21, %v271_v60 }
  0x2a   : > { %v310_v12 = vmul.f32 %v910_v21, %v272_v61  ;;  %v311_v13 = vmul.f32 %v910_v21, %v273_v62  ;;  %780 = vst [vmem:[%s945_s8 + $0x20] sm:$0xff] %v720_v5   ;;  %v730_v16 = vpack.c.bf16 %v345_v7, %v344_v6  ;;  %v312_v18 = vmul.f32 %v910_v21, %v274_v3 }
  0x2b   : > { %v346_v17 = vadd.f32 %v929_v39, %v308_v8  ;;  %v313_v19 = vmul.f32 %v910_v21, %v275_v4  ;;  %781 = vst [vmem:[%s945_s8 + $0x28] sm:$0xff] %v725_v10   ;;  %v347_v22 = vadd.f32 %v929_v39, %v309_v11  ;;  %v314_v25 = vmul.f32 %v910_v21, %v276_v9 }
  0x2c   : > { %v348_v23 = vadd.f32 %v929_v39, %v310_v12  ;;  %v349_v24 = vadd.f32 %v929_v39, %v311_v13  ;;  %782 = vst [vmem:[%s945_s8 + $0x30] sm:$0xff] %v730_v16   ;;  %v350_v27 = vadd.f32 %v929_v39, %v312_v18  ;;  %v315_v29 = vmul.f32 %v910_v21, %v277_v14 }
  0x2d   : > { %v351_v28 = vadd.f32 %v929_v39, %v313_v19  ;;  %v316_v30 = vmul.f32 %v910_v21, %v278_v15  ;;  %v735_v34 = vpack.c.bf16 %v347_v22, %v346_v17  ;;  %v352_v36 = vadd.f32 %v929_v39, %v314_v25 }
  0x2e   : > { %v740_v35 = vpack.c.bf16 %v349_v24, %v348_v23  ;;  %v317_v37 = vmul.f32 %v910_v21, %v279_v20  ;;  %v353_v42 = vadd.f32 %v929_v39, %v315_v29  ;;  %v318_v44 = vmul.f32 %v910_v21, %v280_v26 }
  0x2f   : > { %v745_v41 = vpack.c.bf16 %v351_v28, %v350_v27  ;;  %v354_v43 = vadd.f32 %v929_v39, %v316_v30  ;;  %783 = vst [vmem:[%s945_s8 + $0x38] sm:$0xff] %v735_v34   ;;  %v319_v46 = vmul.f32 %v910_v21, %v281_v31  ;;  %v320_v47 = vmul.f32 %v910_v21, %v282_v32 }
  0x30   : > { %784 = vst [vmem:[%s945_s8 + $0x40] sm:$0xff] %v740_v35   ;;  %v355_v45 = vadd.f32 %v929_v39, %v317_v37  ;;  %v321_v48 = vmul.f32 %v910_v21, %v283_v33  ;;  %v750_v51 = vpack.c.bf16 %v353_v42, %v352_v36  ;;  %v356_v52 = vadd.f32 %v929_v39, %v318_v44 }
  0x31   : > { %785 = vst [vmem:[%s945_s8 + $0x48] sm:$0xff] %v745_v41   ;;  %v322_v53 = vmul.f32 %v910_v21, %v284_v38  ;;  %v323_v54 = vmul.f32 %v910_v21, %v285_v40  ;;  %v357_v56 = vadd.f32 %v929_v39, %v319_v46  ;;  %v358_v57 = vadd.f32 %v929_v39, %v320_v47 }
  0x32   : > { %v755_v55 = vpack.c.bf16 %v355_v45, %v354_v43  ;;  %v359_v58 = vadd.f32 %v929_v39, %v321_v48  ;;  %786 = vst [vmem:[%s945_s8 + $0x50] sm:$0xff] %v750_v51   ;;  %v324_v61 = vmul.f32 %v910_v21, %v286_v49  ;;  %v325_v62 = vmul.f32 %v910_v21, %v287_v50 }
  0x33   : > { %v360_v59 = vadd.f32 %v929_v39, %v322_v53  ;;  %v361_v60 = vadd.f32 %v929_v39, %v323_v54  ;;  %v760_v63 = vpack.c.bf16 %v357_v56, %v356_v52 }
  0x34   : > { %787 = vst [vmem:[%s945_s8 + $0x58] sm:$0xff] %v755_v55   ;;  %v765_v0 = vpack.c.bf16 %v359_v58, %v358_v57  ;;  %v362_v2 = vadd.f32 %v929_v39, %v324_v61  ;;  %v363_v3 = vadd.f32 %v929_v39, %v325_v62 }
  0x35   : > { %v770_v1 = vpack.c.bf16 %v361_v60, %v360_v59  ;;  %788 = vst [vmem:[%s945_s8 + $0x60] sm:$0xff] %v760_v63  }
  0x36   : > { %789 = vst [vmem:[%s945_s8 + $0x68] sm:$0xff] %v765_v0   ;;  %v775_v4 = vpack.c.bf16 %v363_v3, %v362_v2 }
  0x37   : > { %790 = vst [vmem:[%s945_s8 + $0x70] sm:$0xff] %v770_v1  }
  0x38   : > { %791 = vst [vmem:[%s945_s8 + $0x78] sm:$0xff] %v775_v4  }
  0x39 PF: > { %s14_s17 = sadd.s32 1, %s840_s17   ;;  %s1041_s15 = smov %s836_s16 }
  0x3a   : > { %p11_p5 = scmp.ge.s32.totalorder %s14_s17, 4   ;;  %s1042_s16 = smov %s1044_s18 }
  0x3c   :  { %13 = sbr.rel (!%p11_p5) target bundleno = 2 (0x2), region = 66 }

// kernel: double_conv.4
= control target key start
LH: loop header
LB: loop body
LE: loop exit
PB: predicated region body
PF: predicated region fallthrough
CT: control target
= control target key end

     0   :  { %s7097_s12 = smov 0   ;;  %s7099_s13 = smov 0   ;;  %s8948_s0 = inlined_call_operand.vmem [shape: bf16[2,18,18,128], index: 0, kind: input, shape index: {}]   ;;  %s8949_s1 = inlined_call_operand.vmem [shape: bf16[3,3,128,128], index: 1, kind: input, shape index: {}]   ;;  %s8950_s2 = inlined_call_operand.vmem [shape: f32[2,16,16,128], index: 2, kind: output, shape index: {0}]   ;;  %s8951_s3 = inlined_call_operand.vmem [shape: f32[2,2,128], index: 3, kind: output, shape index: {1}]  }
   0x1   :  { %s7101_s14 = smov 0  }
   0x2 LB: > { %s26_s15 = sadd.s32 1, %s7071_s13  ;;  %p5326_p0 = scmp.ge.s32.totalorder %s7075_s14, 1  ;;  %s7075_s14 = sphi %s7101_s14, %s14_s14   ;;  %s7071_s13 = sphi %s7099_s13, %s9019_s13   ;;  %s7067_s12 = sphi %s7097_s12, %s9018_s12  }
   0x3   : > { %p28_p1 = scmp.ge.s32.totalorder %s26_s15, 2  ;;  %p160_p2 = scmp.lt.s32.totalorder %s7075_s14, 3 }
   0x5   : > { %s9021_s15 = smov (%p28_p1, %s26_s15), 0  ;;  %p161_p3 = pnand %p5326_p0, %p160_p2 }
   0x7   : > { %164 = sbr.rel (%p161_p3) target bundleno = 606 (0x25e), region = 28 }
   0xe   : > { %v6863_v0 = vld [vmem:[%s8949_s1 + $0x40] sm:$0xff]   ;;  %p196_p4 = scmp.lt.s32.totalorder %s7067_s12, 1  ;;  %v6865_v2 = vld [vmem:[%s8949_s1 + $0x48] sm:$0xff]   ;;  %v6867_v4 = vld [vmem:[%s8949_s1 + $0x50] sm:$0xff]   ;;  %vm284_vm0 = vsmask.f32 3328 }
   0xf   : > { %v6864_v1 = vld [vmem:[%s8949_s1 + $0x100] sm:$0xff]   ;;  %6134 = vmatprep.subr.bf16.mxu1 %v6863_v0  ;;  %v6866_v3 = vld [vmem:[%s8949_s1 + $0x108] sm:$0xff]   ;;  %v6868_v5 = vld [vmem:[%s8949_s1 + $0x110] sm:$0xff]   ;;  %vm285_vm1 = vsmask.f32 7440  ;;  %vm1314_vm3 = vcmask 1042432  }
  0x10   : > { %6326 = vmatprep.subr.bf16.mxu0 %v6864_v1  ;;  %6135 = vmatpush3.bf16.msra.mxu1 %v6863_v0  ;;  %s9023_s12 = smov (!%p196_p4, %s7067_s12), 1  ;;  %v6869_v6 = vld [vmem:[%s8949_s1 + $0x58] sm:$0xff]   ;;  %v6871_v8 = vld [vmem:[%s8949_s1 + $0x60] sm:$0xff]   ;;  %v6873_v10 = vld [vmem:[%s8949_s1 + $0x68] sm:$0xff]   ;;  %vm1315_vm4 = vcmask 1046532  }
  0x11   : > { %6327 = vmatpush3.bf16.msra.mxu0 %v6864_v1  ;;  %6136 = vmatprep.subr.bf16.mxu1 %v6865_v2  ;;  %v6870_v7 = vld [vmem:[%s8949_s1 + $0x118] sm:$0xff]   ;;  %s6838_s5 = smul.u32 216, %s9023_s12  ;;  %v6872_v9 = vld [vmem:[%s8949_s1 + $0x120] sm:$0xff]   ;;  %v6874_v11 = vld [vmem:[%s8949_s1 + $0x128] sm:$0xff]   ;;  %s5330_s28 = sshll.u32 %s9023_s12, 1 }
  0x12   : > { %6328 = vmatprep.subr.bf16.mxu0 %v6866_v3  ;;  %v6875_v25 = vld [vmem:[%s8949_s1 + $0x70] sm:$0xff]   ;;  %v6877_v36 = vld [vmem:[%s8949_s1 + $0x78] sm:$0xff]   ;;  %vm7183_vm2 = vmor %vm284_vm0, %vm285_vm1  ;;  %s217_s4 = scalar_lea.vmem %s8951_s3, %s5330_s28 }
  0x13   : > { %s7151_s16 = scalar_lea.vmem %s8948_s0, %s6838_s5  ;;  %v6876_v30 = vld [vmem:[%s8949_s1 + $0x130] sm:$0xff]   ;;  %v6878_v51 = vld [vmem:[%s8949_s1 + $0x138] sm:$0xff]   ;;  %vm7429_vm5 = vmor %vm1314_vm3, %vm1315_vm4 }
  0x14   : > { %6137 = vmatpush3.bf16.msra.mxu1 %v6865_v2  ;;  %v220_v12 = vld [vmem:[%s7151_s16] sm:$0xf]  ;;  %v221_v13 = vld [vmem:[%s7151_s16 + $0x4] sm:$0xf]  ;;  %v268_v14 = vld [vmem:[%s7151_s16 + $0x8] sm:$0x1] }
  0x15   : > { %6329 = vmatpush3.bf16.msra.mxu0 %v6866_v3  ;;  %6138 = vmatprep.subr.bf16.mxu1 %v6867_v4  ;;  %v288_v15 = vshrl.u32 %v220_v12, 16  ;;  %v291_v16 = vshll.u32 %v220_v12, 16  ;;  %v297_v17 = vshll.u32 %v221_v13, 16  ;;  %v301_v18 = vshrl.u32 %v221_v13, 16  ;;  %v5523_v20 = vld [vmem:[%s7151_s16 + $0xc] sm:$0xf] }
  0x16   : > { %6330 = vmatprep.subr.bf16.mxu0 %v6868_v5  ;;  %v307_v19 = vshll.u32 %v268_v14, 16  ;;  %v7164_v23 = vld [vmem:[%s7151_s16 + $0x10] sm:$0xf]  ;;  %v7167_v24 = vld [vmem:[%s7151_s16 + $0x14] sm:$0x1]  ;;  %v2187_v29 = vshrl.u32 %v5523_v20, 16 }
  0x17   : > { %v290_v21 = vrot.slane %v288_v15, 4  ;;  %v293_v22 = vrot.slane %v291_v16, 5  ;;  %v299_v26 = vrot.slane %v297_v17, 5  ;;  %v303_v27 = vrot.slane %v301_v18, 4  ;;  %v222_v35 = vld [vmem:[%s7151_s16 + $0xc] sm:$0xf] }
  0x18   : > { %6139 = vmatpush3.bf16.msra.mxu1 %v6867_v4  ;;  %v309_v28 = vrot.slane %v307_v19, 5  ;;  %v2190_v32 = vshll.u32 %v5523_v20, 16  ;;  %v2196_v33 = vshll.u32 %v7164_v23, 16  ;;  %v2200_v34 = vshrl.u32 %v7164_v23, 16  ;;  %v223_v42 = vld [vmem:[%s7151_s16 + $0x10] sm:$0xf] }
  0x19   : > { %6331 = vmatpush3.bf16.msra.mxu0 %v6868_v5  ;;  %6140 = vmatprep.subr.bf16.mxu1 %v6869_v6  ;;  %v294_v31 = vor.u32 %v293_v22, %v290_v21  ;;  %v304_v38 = vor.u32 %v303_v27, %v299_v26  ;;  %v2189_v39 = vrot.slane %v2187_v29, 4  ;;  %v2206_v40 = vshll.u32 %v7167_v24, 16  ;;  %v269_v55 = vld [vmem:[%s7151_s16 + $0x14] sm:$0x1]  ;;  %v5526_v57 = vld [vmem:[%s7151_s16 + $0x18] sm:$0xf] }
  0x1a   : > { %6332 = vmatprep.subr.bf16.mxu0 %v6870_v7  ;;  %v2961_v41 = vrot.slane %v7167_v24, 5  ;;  %v2192_v44 = vrot.slane %v2190_v32, 5  ;;  %v2198_v45 = vrot.slane %v2196_v33, 5  ;;  %v2202_v46 = vrot.slane %v2200_v34, 4  ;;  %v7200_v62 = vld [vmem:[%s7151_s16 + $0x1c] sm:$0xf] }
  0x1b   : > { %v295_v43 = vrot.slane %v294_v31, 4  ;;  %v305_v47 = vrot.slane %v304_v38, 4  ;;  %v2208_v48 = vrot.slane %v2206_v40, 5  ;;  %v312_v49 = vshrl.u32 %v222_v35, 16  ;;  %v6879_v3 = vld [vmem:[%s8949_s1] sm:$0xff]  }
  0x1c   : > { %6141 = vmatpush3.bf16.msra.mxu1 %v6869_v6  ;;  %v315_v50 = vshll.u32 %v222_v35, 16  ;;  %v2193_v53 = vor.u32 %v2192_v44, %v2189_v39  ;;  %v2203_v54 = vor.u32 %v2202_v46, %v2198_v45  ;;  %v321_v56 = vshll.u32 %v223_v42, 16  ;;  %v7208_v4 = vld [vmem:[%s8949_s1 + $0x140] sm:$0xff]   ;;  %v224_v21 = vld [vmem:[%s7151_s16 + $0x18] sm:$0xf]  ;;  %v6882_v46 = vld [vmem:[%s8949_s1 + $0x8] sm:$0xff]  }
  0x1d   : > { %6333 = vmatpush3.bf16.msra.mxu0 %v6870_v7  ;;  %6142 = vmatprep.subr.bf16.mxu1 %v6871_v8  ;;  %v300_v52 = vsel %vm7183_vm2, %v295_v43, %v299_v26  ;;  %v310_v58 = vsel %vm7183_vm2, %v305_v47, %v309_v28  ;;  %v314_v59 = vrot.slane %v312_v49, 4  ;;  %v325_v61 = vshrl.u32 %v223_v42, 16  ;;  %v225_v28 = vld [vmem:[%s7151_s16 + $0x1c] sm:$0xf]  ;;  %v270_v33 = vld [vmem:[%s7151_s16 + $0x20] sm:$0x1] }
  0x1e   : > { %6334 = vmatprep.subr.bf16.mxu0 %v6872_v9  ;;  %v317_v60 = vrot.slane %v315_v50, 5  ;;  %v5347_v63 = vcombine.low %v300_v52, %v310_v58  ;;  %v2194_v0 = vrot.slane %v2193_v53, 4  ;;  %v2204_v1 = vrot.slane %v2203_v54, 4  ;;  %v5529_v39 = vld [vmem:[%s7151_s16 + $0x24] sm:$0xf] }
  0x1f   : > { %v323_v2 = vrot.slane %v321_v56, 5  ;;  %v327_v6 = vrot.slane %v325_v61, 4  ;;  %v331_v7 = vshll.u32 %v269_v55, 16  ;;  %v2214_v12 = vshll.u32 %v5526_v57, 16  ;;  %v226_v52 = vld [vmem:[%s7151_s16 + $0x24] sm:$0xf] }
  0x20   : > { %6143 = vmatpush3.bf16.msra.mxu1 %v6871_v8  ;;  %v318_v5 = vor.u32 %v317_v60, %v314_v59  ;;  %v7211_v8 = vld [vmem:[%s7151_s16 + $0x20] sm:$0x1]  ;;  %6150 = vmatprep.mubr.bf16.mxu1 %v5347_v63  ;;  %v2220_v19 = vshll.u32 %v7200_v62, 16  ;;  %v2224_v20 = vshrl.u32 %v7200_v62, 16  ;;  %v2965_v27 = vrot.slane %v7200_v62, 5  ;;  %v6881_v63 = vld [vmem:[%s8949_s1 + $0x148] sm:$0xff]  }
  0x21   : > { %6335 = vmatpush3.bf16.msra.mxu0 %v6872_v9  ;;  %6144 = vmatprep.subr.bf16.mxu1 %v6873_v10  ;;  %v2199_v9 = vsel %vm7183_vm2, %v2194_v0, %v2198_v45  ;;  %v328_v15 = vor.u32 %v327_v6, %v323_v2  ;;  %v333_v16 = vrot.slane %v331_v7, 5  ;;  %v2216_v18 = vrot.slane %v2214_v12, 5  ;;  %v7236_v45 = vld [vmem:[%s7151_s16 + $0x28] sm:$0xf] }
  0x22   : > { %6336 = vmatprep.subr.bf16.mxu0 %v6874_v11  ;;  %v319_v14 = vrot.slane %v318_v5, 4  ;;  %v2230_v26 = vshll.u32 %v7211_v8, 16  ;;  %v2226_v31 = vrot.slane %v2224_v20, 4  ;;  %v2968_v32 = vrot.slane %v7211_v8, 5  ;;  %v227_v5 = vld [vmem:[%s7151_s16 + $0x28] sm:$0xf] }
  0x23   : > { %v336_v38 = vshrl.u32 %v224_v21, 16  ;;  %v339_v44 = vshll.u32 %v224_v21, 16  ;;  %v349_v49 = vshrl.u32 %v225_v28, 16  ;;  %v355_v50 = vshll.u32 %v270_v33, 16  ;;  %v7267_v33 = vld [vmem:[%s7151_s16 + $0x34] sm:$0xf] }
  0x24   : > { %6145 = vmatpush3.bf16.msra.mxu1 %v6873_v10  ;;  %v2209_v10 = vsel %vm7183_vm2, %v2204_v1, %v2208_v48  ;;  %v324_v22 = vsel %vm7183_vm2, %v319_v14, %v323_v2  ;;  %v2232_v35 = vrot.slane %v2230_v26, 5  ;;  %v345_v48 = vshll.u32 %v225_v28, 16 }
  0x25   : > { %6337 = vmatpush3.bf16.msra.mxu0 %v6874_v11  ;;  %6146 = vmatprep.subr.bf16.mxu1 %v6875_v25  ;;  %v2211_v11 = vshrl.u32 %v5526_v57, 16  ;;  %v5587_v13 = vcombine.low %v2199_v9, %v2209_v10  ;;  %v338_v47 = vrot.slane %v336_v38, 4  ;;  %v341_v55 = vrot.slane %v339_v44, 5 }
  0x26   : > { %6338 = vmatprep.subr.bf16.mxu0 %v6876_v30  ;;  %v2235_v56 = vshrl.u32 %v5529_v39, 16  ;;  %v347_v57 = vrot.slane %v345_v48, 5  ;;  %v351_v58 = vrot.slane %v349_v49, 4  ;;  %v357_v59 = vrot.slane %v355_v50, 5  ;;  %v6884_v48 = vld [vmem:[%s8949_s1 + $0x158] sm:$0xff]  }
  0x27   : > { %v2213_v17 = vrot.slane %v2211_v11, 4  ;;  %6342 = vmatprep.mubr.bf16.mxu0 %v5587_v13  ;;  %v2238_v60 = vshll.u32 %v5529_v39, 16  ;;  %v342_v0 = vor.u32 %v341_v55, %v338_v47  ;;  %v2244_v2 = vshll.u32 %v7236_v45, 16  ;;  %v271_v11 = vld [vmem:[%s7151_s16 + $0x2c] sm:$0x1] }
  0x28   : > { %6147 = vmatpush3.bf16.msra.mxu1 %v6875_v25  ;;  %v329_v25 = vrot.slane %v328_v15, 4  ;;  %v2237_v1 = vrot.slane %v2235_v56, 4  ;;  %v352_v7 = vor.u32 %v351_v58, %v347_v57  ;;  %v2248_v10 = vshrl.u32 %v7236_v45, 16 }
  0x29   : > { %6339 = vmatpush3.bf16.msra.mxu0 %v6876_v30  ;;  %6148 = vmatprep.subr.bf16.mxu1 %v6877_v36  ;;  %v2217_v29 = vor.u32 %v2216_v18, %v2213_v17  ;;  %v2222_v30 = vrot.slane %v2220_v19, 5  ;;  %v2240_v9 = vrot.slane %v2238_v60, 5  ;;  %v343_v12 = vrot.slane %v342_v0, 4  ;;  %v6891_v60 = vld [vmem:[%s8949_s1 + $0x20] sm:$0xff]  }
  0x2a   : > { %6340 = vmatprep.subr.bf16.mxu0 %v6878_v51  ;;  %v334_v34 = vsel %vm7183_vm2, %v329_v25, %v333_v16  ;;  %v2246_v13 = vrot.slane %v2244_v2, 5  ;;  %v360_v15 = vshrl.u32 %v226_v52, 16  ;;  %v5532_v16 = vld [vmem:[%s7151_s16 + $0x30] sm:$0xf]  ;;  %v353_v17 = vrot.slane %v352_v7, 4 }
  0x2b   : > { %v5348_v40 = vcombine.low %v324_v22, %v334_v34  ;;  %v2218_v42 = vrot.slane %v2217_v29, 4  ;;  %v2227_v43 = vor.u32 %v2226_v31, %v2222_v30  ;;  %v2241_v18 = vor.u32 %v2240_v9, %v2237_v1  ;;  %v6888_v34 = vld [vmem:[%s8949_s1 + $0x18] sm:$0xff]  }
  0x2c   : > { %6149 = vmatpush3.bf16.msra.mxu1 %v6877_v36  ;;  %v7232_v36 = vrot.slane %v2965_v27, 4  ;;  %v2250_v19 = vrot.slane %v2248_v10, 4  ;;  %v363_v20 = vshll.u32 %v226_v52, 16  ;;  %v348_v21 = vsel %vm7183_vm2, %v343_v12, %v347_v57  ;;  %v272_v2 = vld [vmem:[%s7151_s16 + $0x38] sm:$0x1] }
  0x2d   : > { %6341 = vmatpush3.bf16.msra.mxu0 %v6878_v51  ;;  %6182 = vmatprep.subr.bf16.mxu1 %v6879_v3  ;;  %v7242_v51 = vld [vmem:[%s7151_s16 + $0x2c] sm:$0x1]  ;;  %v2223_v53 = vsel %vm7183_vm2, %v2218_v42, %v2222_v30  ;;  %v2228_v54 = vrot.slane %v2227_v43, 4  ;;  %v362_v25 = vrot.slane %v360_v15, 4  ;;  %v369_v26 = vshll.u32 %v227_v5, 16 }
  0x2e   : > { %6374 = vmatprep.subr.bf16.mxu0 %v7208_v4  ;;  %v2254_v14 = vshll.u32 %v7242_v51, 16  ;;  %v358_v28 = vsel %vm7183_vm2, %v353_v17, %v357_v59  ;;  %v2242_v29 = vrot.slane %v2241_v18, 4  ;;  %v2251_v30 = vor.u32 %v2250_v19, %v2246_v13  ;;  %v229_v59 = vld [vmem:[%s7151_s16 + $0x34] sm:$0xf]  ;;  %v5535_v9 = vld [vmem:[%s7151_s16 + $0x3c] sm:$0xf] }
  0x2f   : > { %6151 = vmatmul.mubr.bf16.vlgmr.msra.gmra.mrb[0].mxu1 %v5348_v40  ;;  %v2233_v61 = vsel %vm7183_vm2, %v2228_v54, %v2232_v35  ;;  %v365_v31 = vrot.slane %v363_v20, 5  ;;  %v5349_v35 = vcombine.low %v348_v21, %v358_v28  ;;  %v371_v38 = vrot.slane %v369_v26, 5  ;;  %v228_v54 = vld [vmem:[%s7151_s16 + $0x30] sm:$0xf]  ;;  %v7301_v19 = vld [vmem:[%s7151_s16 + $0x40] sm:$0xf] }
  0x30   : > { %6183 = vmatpush3.bf16.msra.mxu1 %v6879_v3  ;;  %v6885_v3 = vld [vmem:[%s8949_s1 + $0x10] sm:$0xff]   ;;  %v5588_v6 = vcombine.low %v2223_v53, %v2233_v61  ;;  %v2256_v22 = vrot.slane %v2254_v14, 5  ;;  %v373_v39 = vshrl.u32 %v227_v5, 16  ;;  %v379_v40 = vshll.u32 %v271_v11, 16  ;;  %v6893_v14 = vld [vmem:[%s8949_s1 + $0x28] sm:$0xff]   ;;  %v6886_v20 = vld [vmem:[%s8949_s1 + $0x160] sm:$0xff]  }
  0x31   : > { %6184 = vmatprep.subr.bf16.mxu1 %v6882_v46  ;;  %v2247_v42 = vsel %vm7183_vm2, %v2242_v29, %v2246_v13  ;;  %v2252_v43 = vrot.slane %v2251_v30, 4  ;;  %v366_v44 = vor.u32 %v365_v31, %v362_v25  ;;  %v2259_v47 = vshrl.u32 %v5532_v16, 16  ;;  %6154 = vmatprep.mubr.bf16.mxu1 %v5349_v35  ;;  %v7309_v28 = vld [vmem:[%s7151_s16 + $0x44] sm:$0x1]  ;;  %v6895_v35 = vld [vmem:[%s8949_s1 + $0x30] sm:$0xff]  }
  0x32   : > { %6343 = vmatmul.mubr.bf16.vlgmr.msra.gmra.mrb[0].mxu0 %v5588_v6  ;;  %v375_v49 = vrot.slane %v373_v39, 4  ;;  %v381_v50 = vrot.slane %v379_v40, 5  ;;  %v2262_v52 = vshll.u32 %v5532_v16, 16  ;;  %v2268_v53 = vshll.u32 %v7267_v33, 16 }
  0x33   : > { %6375 = vmatpush3.bf16.msra.mxu0 %v7208_v4  ;;  %v6883_v4 = vld [vmem:[%s8949_s1 + $0x150] sm:$0xff]   ;;  %v2257_v55 = vsel %vm7183_vm2, %v2252_v43, %v2256_v22  ;;  %v367_v56 = vrot.slane %v366_v44, 4  ;;  %v2261_v57 = vrot.slane %v2259_v47, 4  ;;  %v2272_v58 = vshrl.u32 %v7267_v33, 16 }
  0x34   : > { %6185 = vmatpush3.bf16.msra.mxu1 %v6882_v46  ;;  %6376 = vmatprep.subr.bf16.mxu0 %v6881_v63  ;;  %v7278_v46 = vld [vmem:[%s7151_s16 + $0x38] sm:$0x1]  ;;  %v5589_v61 = vcombine.low %v2247_v42, %v2257_v55  ;;  %v2264_v0 = vrot.slane %v2262_v52, 5  ;;  %v2270_v1 = vrot.slane %v2268_v53, 5  ;;  %v384_v7 = vshrl.u32 %v228_v54, 16 }
  0x35   : > { %6186 = vmatprep.subr.bf16.mxu1 %v6885_v3  ;;  %v372_v5 = vsel %vm7183_vm2, %v367_v56, %v371_v38  ;;  %v2278_v6 = vshll.u32 %v7278_v46, 16  ;;  %v387_v12 = vshll.u32 %v228_v54, 16  ;;  %v393_v13 = vshll.u32 %v229_v59, 16  ;;  %v231_v55 = vld [vmem:[%s7151_s16 + $0x40] sm:$0xf] }
  0x36   : > { %6346 = vmatprep.mubr.bf16.mxu0 %v5589_v61  ;;  %v2265_v11 = vor.u32 %v2264_v0, %v2261_v57  ;;  %v386_v17 = vrot.slane %v384_v7, 4  ;;  %v397_v18 = vshrl.u32 %v229_v59, 16  ;;  %v2283_v40 = vshrl.u32 %v5535_v9, 16 }
  0x37   : > { %6377 = vmatpush3.bf16.msra.mxu0 %v6881_v63  ;;  %v376_v63 = vor.u32 %v375_v49, %v371_v38  ;;  %v2280_v16 = vrot.slane %v2278_v6, 5  ;;  %v389_v25 = vrot.slane %v387_v12, 5  ;;  %v395_v26 = vrot.slane %v393_v13, 5 }
  0x38   : > { %6187 = vmatpush3.bf16.msra.mxu1 %v6885_v3  ;;  %6378 = vmatprep.subr.bf16.mxu0 %v6883_v4  ;;  %v2274_v3 = vrot.slane %v2272_v58, 4  ;;  %v2266_v22 = vrot.slane %v2265_v11, 4  ;;  %v399_v31 = vrot.slane %v397_v18, 4  ;;  %v2286_v42 = vshll.u32 %v5535_v9, 16  ;;  %v5538_v9 = vld [vmem:[%s7151_s16 + $0x48] sm:$0xf] }
  0x39   : > { %6188 = vmatprep.subr.bf16.mxu1 %v6888_v34  ;;  %v377_v10 = vrot.slane %v376_v63, 4  ;;  %v390_v39 = vor.u32 %v389_v25, %v386_v17  ;;  %v2292_v49 = vshll.u32 %v7301_v19, 16  ;;  %v2285_v53 = vrot.slane %v2283_v40, 4  ;;  %v273_v63 = vld [vmem:[%s7151_s16 + $0x44] sm:$0x1] }
  0x3a   : > { %v2275_v15 = vor.u32 %v2274_v3, %v2270_v1  ;;  %v2271_v38 = vsel %vm7183_vm2, %v2266_v22, %v2270_v1  ;;  %v400_v44 = vor.u32 %v399_v31, %v395_v26  ;;  %v2288_v54 = vrot.slane %v2286_v42, 5  ;;  %v7342_v22 = vld [vmem:[%s7151_s16 + $0x50] sm:$0x1]  ;;  %v6890_v31 = vld [vmem:[%s8949_s1 + $0x178] sm:$0xff]  }
  0x3b   : > { %6379 = vmatpush3.bf16.msra.mxu0 %v6883_v4  ;;  %v382_v21 = vsel %vm7183_vm2, %v377_v10, %v381_v50  ;;  %v403_v4 = vshll.u32 %v272_v2, 16  ;;  %v391_v52 = vrot.slane %v390_v39, 4  ;;  %v2294_v57 = vrot.slane %v2292_v49, 5  ;;  %v6897_v2 = vld [vmem:[%s8949_s1 + $0x38] sm:$0xff]  }
  0x3c   : > { %6189 = vmatpush3.bf16.msra.mxu1 %v6888_v34  ;;  %6380 = vmatprep.subr.bf16.mxu0 %v6884_v48  ;;  %v5350_v29 = vcombine.low %v372_v5, %v382_v21  ;;  %v2276_v30 = vrot.slane %v2275_v15, 4  ;;  %v230_v34 = vld [vmem:[%s7151_s16 + $0x3c] sm:$0xf]  ;;  %v401_v56 = vrot.slane %v400_v44, 4  ;;  %v2296_v58 = vshrl.u32 %v7301_v19, 16  ;;  %v6889_v15 = vld [vmem:[%s8949_s1 + $0x170] sm:$0xff]  }
  0x3d   : > { %6190 = vmatprep.subr.bf16.mxu1 %v6891_v60  ;;  %v405_v47 = vrot.slane %v403_v4, 5  ;;  %v2302_v59 = vshll.u32 %v7309_v28, 16  ;;  %v2289_v61 = vor.u32 %v2288_v54, %v2285_v53  ;;  %v408_v0 = vshrl.u32 %v230_v34, 16  ;;  %v7353_v4 = vld [vmem:[%s8949_s1 + $0x80] sm:$0xff]   ;;  %v233_v53 = vld [vmem:[%s7151_s16 + $0x4c] sm:$0xf] }
  0x3e   : > { %6155 = vmatmul.mubr.bf16.gmra.mrb[4].mxu1 %v5350_v29  ;;  %v2281_v43 = vsel %vm7183_vm2, %v2276_v30, %v2280_v16  ;;  %v411_v1 = vshll.u32 %v230_v34, 16  ;;  %v2298_v3 = vrot.slane %v2296_v58, 4  ;;  %v417_v7 = vshll.u32 %v231_v55, 16  ;;  %v232_v30 = vld [vmem:[%s7151_s16 + $0x48] sm:$0xf] }
  0x3f   : > { %6381 = vmatpush3.bf16.msra.mxu0 %v6884_v48  ;;  %v5590_v50 = vcombine.low %v2271_v38, %v2281_v43  ;;  %v6887_v48 = vld [vmem:[%s8949_s1 + $0x168] sm:$0xff]   ;;  %v406_v5 = vsel %vm7183_vm2, %v401_v56, %v405_v47  ;;  %v2304_v6 = vrot.slane %v2302_v59, 5  ;;  %v2290_v11 = vrot.slane %v2289_v61, 4  ;;  %v274_v54 = vld [vmem:[%s7151_s16 + $0x50] sm:$0x1] }
  0x40   : > { %6191 = vmatpush3.bf16.msra.mxu1 %v6891_v60  ;;  %6382 = vmatprep.subr.bf16.mxu0 %v6886_v20  ;;  %v396_v60 = vsel %vm7183_vm2, %v391_v52, %v395_v26  ;;  %v410_v12 = vrot.slane %v408_v0, 4  ;;  %v413_v13 = vrot.slane %v411_v1, 5  ;;  %v2299_v16 = vor.u32 %v2298_v3, %v2294_v57  ;;  %v5541_v58 = vld [vmem:[%s7151_s16 + $0x54] sm:$0xf]  ;;  %v7367_v0 = vld [vmem:[%s7151_s16 + $0x58] sm:$0xf] }
  0x41   : > { %6192 = vmatprep.subr.bf16.mxu1 %v6893_v14  ;;  %6347 = vmatmul.mubr.bf16.gmra.mrb[4].mxu0 %v5590_v50  ;;  %v5351_v10 = vcombine.low %v396_v60, %v406_v5  ;;  %v419_v17 = vrot.slane %v417_v7, 5  ;;  %v421_v18 = vshrl.u32 %v231_v55, 16  ;;  %v427_v21 = vshll.u32 %v273_v63, 16 }
  0x42   : > { %v414_v25 = vor.u32 %v413_v13, %v410_v12  ;;  %v2307_v26 = vshrl.u32 %v5538_v9, 16  ;;  %v2310_v29 = vshll.u32 %v5538_v9, 16  ;;  %v2300_v34 = vrot.slane %v2299_v16, 4 }
  0x43   : > { %6383 = vmatpush3.bf16.msra.mxu0 %v6886_v20  ;;  %6158 = vmatprep.mubr.bf16.mxu1 %v5351_v10  ;;  %v2295_v20 = vsel %vm7183_vm2, %v2290_v11, %v2294_v57  ;;  %v429_v38 = vrot.slane %v427_v21, 5  ;;  %v2326_v52 = vshll.u32 %v7342_v22, 16  ;;  %v432_v61 = vshrl.u32 %v232_v30, 16 }
  0x44   : > { %6193 = vmatpush3.bf16.msra.mxu1 %v6893_v14  ;;  %v7336_v14 = vld [vmem:[%s7151_s16 + $0x4c] sm:$0xf]  ;;  %6384 = vmatprep.subr.bf16.mxu0 %v6887_v48  ;;  %v415_v40 = vrot.slane %v414_v25, 4  ;;  %v2309_v42 = vrot.slane %v2307_v26, 4  ;;  %v2312_v43 = vrot.slane %v2310_v29, 5  ;;  %v2305_v47 = vsel %vm7183_vm2, %v2300_v34, %v2304_v6  ;;  %v7372_v6 = vld [vmem:[%s8949_s1 + $0x180] sm:$0xff]  }
  0x45   : > { %6194 = vmatprep.subr.bf16.mxu1 %v6895_v35  ;;  %v2316_v39 = vshll.u32 %v7336_v14, 16  ;;  %v2320_v44 = vshrl.u32 %v7336_v14, 16  ;;  %v5591_v55 = vcombine.low %v2295_v20, %v2305_v47  ;;  %v2328_v60 = vrot.slane %v2326_v52, 5  ;;  %v7379_v20 = vld [vmem:[%s7151_s16 + $0x5c] sm:$0x1] }
  0x46   : > { %v2313_v56 = vor.u32 %v2312_v43, %v2309_v42  ;;  %v435_v63 = vshll.u32 %v232_v30, 16  ;;  %v445_v3 = vshrl.u32 %v233_v53, 16  ;;  %v434_v9 = vrot.slane %v432_v61, 4  ;;  %v235_v43 = vld [vmem:[%s7151_s16 + $0x58] sm:$0xf] }
  0x47   : > { %6385 = vmatpush3.bf16.msra.mxu0 %v6887_v48  ;;  %v2318_v50 = vrot.slane %v2316_v39, 5  ;;  %v420_v48 = vsel %vm7183_vm2, %v415_v40, %v419_v17  ;;  %v2322_v57 = vrot.slane %v2320_v44, 4  ;;  %6350 = vmatprep.mubr.bf16.mxu0 %v5591_v55  ;;  %v451_v11 = vshll.u32 %v274_v54, 16  ;;  %v5544_v52 = vld [vmem:[%s7151_s16 + $0x60] sm:$0xf] }
  0x48   : > { %6195 = vmatpush3.bf16.msra.mxu1 %v6895_v35  ;;  %v423_v35 = vrot.slane %v421_v18, 4  ;;  %6386 = vmatprep.subr.bf16.mxu0 %v6889_v15  ;;  %v2314_v1 = vrot.slane %v2313_v56, 4  ;;  %v437_v10 = vrot.slane %v435_v63, 5  ;;  %v447_v18 = vrot.slane %v445_v3, 4 }
  0x49   : > { %6196 = vmatprep.subr.bf16.mxu1 %v6897_v2  ;;  %v2323_v5 = vor.u32 %v2322_v57, %v2318_v50  ;;  %v453_v21 = vrot.slane %v451_v11, 5  ;;  %v2331_v25 = vshrl.u32 %v5541_v58, 16  ;;  %v2334_v29 = vshll.u32 %v5541_v58, 16 }
  0x4a   : > { %v424_v49 = vor.u32 %v423_v35, %v419_v17  ;;  %v2319_v13 = vsel %vm7183_vm2, %v2314_v1, %v2318_v50  ;;  %v438_v17 = vor.u32 %v437_v10, %v434_v9  ;;  %v2340_v30 = vshll.u32 %v7367_v0, 16  ;;  %v234_v35 = vld [vmem:[%s7151_s16 + $0x54] sm:$0xf]  ;;  %v275_v50 = vld [vmem:[%s7151_s16 + $0x5c] sm:$0x1] }
  0x4b   : > { %6387 = vmatpush3.bf16.msra.mxu0 %v6889_v15  ;;  %v2324_v15 = vrot.slane %v2323_v5, 4  ;;  %v2344_v34 = vshrl.u32 %v7367_v0, 16  ;;  %v2333_v42 = vrot.slane %v2331_v25, 4  ;;  %v456_v55 = vshrl.u32 %v234_v35, 16  ;;  %v7407_v25 = vld [vmem:[%s7151_s16 + $0x60] sm:$0xf] }
  0x4c   : > { %6197 = vmatpush3.bf16.msra.mxu1 %v6897_v2  ;;  %v425_v59 = vrot.slane %v424_v49, 4  ;;  %v441_v2 = vshll.u32 %v233_v53, 16  ;;  %6388 = vmatprep.subr.bf16.mxu0 %v6890_v31  ;;  %v439_v39 = vrot.slane %v438_v17, 4  ;;  %v2342_v44 = vrot.slane %v2340_v30, 5  ;;  %v7403_v17 = vld [vmem:[%s7151_s16 + $0x68] sm:$0x1] }
  0x4d   : > { %6230 = vmatprep.subr.bf16.mxu1 %v7353_v4  ;;  %v2329_v26 = vsel %vm7183_vm2, %v2324_v15, %v2328_v60  ;;  %v2346_v47 = vrot.slane %v2344_v34, 4  ;;  %v2350_v49 = vshll.u32 %v7379_v20, 16  ;;  %v7394_v60 = vld [vmem:[%s7151_s16 + $0x64] sm:$0xf]  ;;  %v458_v63 = vrot.slane %v456_v55, 4 }
  0x4e   : > { %v430_v7 = vsel %vm7183_vm2, %v425_v59, %v429_v38  ;;  %v443_v16 = vrot.slane %v441_v2, 5  ;;  %v5592_v38 = vcombine.low %v2319_v13, %v2329_v26  ;;  %v465_v59 = vshll.u32 %v235_v43, 16 }
  0x4f   : > { %v5352_v12 = vcombine.low %v420_v48, %v430_v7  ;;  %6389 = vmatpush3.bf16.msra.mxu0 %v6890_v31  ;;  %v2336_v31 = vrot.slane %v2334_v29, 5  ;;  %v459_v48 = vshll.u32 %v234_v35, 16  ;;  %v2347_v57 = vor.u32 %v2346_v47, %v2342_v44  ;;  %v7410_v35 = vld [vmem:[%s7151_s16 + $0x64] sm:$0xf] }
  0x50   : > { %6422 = vmatprep.subr.bf16.mxu0 %v7372_v6  ;;  %v448_v40 = vor.u32 %v447_v18, %v443_v16  ;;  %6351 = vmatmul.mubr.bf16.gmra.mrb[8].mxu0 %v5592_v38  ;;  %v444_v53 = vsel %vm7183_vm2, %v439_v39, %v443_v16  ;;  %v2352_v58 = vrot.slane %v2350_v49, 5  ;;  %v469_v5 = vshrl.u32 %v235_v43, 16  ;;  %v276_v43 = vld [vmem:[%s7151_s16 + $0x68] sm:$0x1] }
  0x51   : > { %6159 = vmatmul.mubr.bf16.gmra.mrb[8].mxu1 %v5352_v12  ;;  %v2337_v56 = vor.u32 %v2336_v31, %v2333_v42  ;;  %v461_v1 = vrot.slane %v459_v48, 5  ;;  %v2348_v7 = vrot.slane %v2347_v57, 4  ;;  %v467_v9 = vrot.slane %v465_v59, 5 }
  0x52   : > { %v449_v54 = vrot.slane %v448_v40, 4  ;;  %v471_v11 = vrot.slane %v469_v5, 4  ;;  %v475_v12 = vshll.u32 %v275_v50, 16  ;;  %v2355_v13 = vshrl.u32 %v5544_v52, 16  ;;  %v5611_v50 = vld [vmem:[%s7151_s16 + $0xc] sm:$0xe] }
  0x53   : > { %v2338_v3 = vrot.slane %v2337_v56, 4  ;;  %v462_v10 = vor.u32 %v461_v1, %v458_v63  ;;  %v2353_v16 = vsel %vm7183_vm2, %v2348_v7, %v2352_v58  ;;  %v2358_v18 = vshll.u32 %v5544_v52, 16  ;;  %v7425_v5 = vld [vmem:[%s7151_s16 + $0x6c] sm:$0xf] }
  0x54   : > { %v454_v61 = vsel %vm7183_vm2, %v449_v54, %v453_v21  ;;  %v2364_v21 = vshll.u32 %v7394_v60, 16  ;;  %v472_v30 = vor.u32 %v471_v11, %v467_v9  ;;  %v477_v34 = vrot.slane %v475_v12, 5 }
  0x55   : > { %v5353_v2 = vcombine.low %v444_v53, %v454_v61  ;;  %v2343_v15 = vsel %vm7183_vm2, %v2338_v3, %v2342_v44  ;;  %v463_v29 = vrot.slane %v462_v10, 4  ;;  %v2357_v38 = vrot.slane %v2355_v13, 4 }
  0x56   : > { %v5593_v26 = vcombine.low %v2343_v15, %v2353_v16  ;;  %v2360_v39 = vrot.slane %v2358_v18, 5  ;;  %v2366_v40 = vrot.slane %v2364_v21, 5  ;;  %v2368_v42 = vshrl.u32 %v7394_v60, 16  ;;  %v7437_v21 = vld [vmem:[%s7151_s16 + $0x70] sm:$0xf] }
  0x57   : > { %6162 = vmatprep.mubr.bf16.mxu1 %v5353_v2  ;;  %v468_v31 = vsel %vm7183_vm2, %v463_v29, %v467_v9  ;;  %v473_v44 = vrot.slane %v472_v30, 4  ;;  %v2374_v47 = vshll.u32 %v7403_v17, 16  ;;  %v480_v49 = vshrl.u32 %v7407_v25, 16  ;;  %v6981_v9 = vld [vmem:[%s7151_s16 + $0xb4] sm:$0xff]  }
  0x58   : > { %6354 = vmatprep.mubr.bf16.mxu0 %v5593_v26  ;;  %v2361_v52 = vor.u32 %v2360_v39, %v2357_v38  ;;  %v2370_v53 = vrot.slane %v2368_v42, 4  ;;  %v483_v54 = vshll.u32 %v7407_v25, 16  ;;  %v489_v55 = vshll.u32 %v7410_v35, 16 }
  0x59   : > { %v478_v48 = vsel %vm7183_vm2, %v473_v44, %v477_v34  ;;  %v2376_v56 = vrot.slane %v2374_v47, 5  ;;  %v482_v57 = vrot.slane %v480_v49, 4  ;;  %v493_v58 = vshrl.u32 %v7410_v35, 16  ;;  %v7448_v47 = vld [vmem:[%s7151_s16 + $0x78] sm:$0xf] }
  0x5a   : > { %v5354_v59 = vcombine.low %v468_v31, %v478_v48  ;;  %v2362_v61 = vrot.slane %v2361_v52, 4  ;;  %v2371_v63 = vor.u32 %v2370_v53, %v2366_v40  ;;  %v485_v1 = vrot.slane %v483_v54, 5  ;;  %v7459_v54 = vld [vmem:[%s7151_s16 + $0x7c] sm:$0xf] }
  0x5b   : > { %v491_v2 = vrot.slane %v489_v55, 5  ;;  %v495_v3 = vrot.slane %v493_v58, 4  ;;  %v499_v7 = vshll.u32 %v276_v43, 16  ;;  %v5627_v10 = vrot.slane %v5611_v50, 9  ;;  %v278_v58 = vld [vmem:[%s7151_s16 + $0x80] sm:$0x1] }
  0x5c   : > { %6163 = vmatmul.mubr.bf16.gmra.mrb[12].mxu1 %v5354_v59  ;;  %v2367_v11 = vsel %vm7183_vm2, %v2362_v61, %v2366_v40  ;;  %v2372_v12 = vrot.slane %v2371_v63, 4  ;;  %v486_v13 = vor.u32 %v485_v1, %v482_v57  ;;  %v2958_v15 = vrot.slane %v7164_v23, 5  ;;  %v277_v40 = vld [vmem:[%s7151_s16 + $0x74] sm:$0x1]  ;;  %v5612_v23 = vld [vmem:[%s7151_s16 + $0x18] sm:$0xe] }
  0x5d   : > { %v496_v16 = vor.u32 %v495_v3, %v491_v2  ;;  %v501_v18 = vrot.slane %v499_v7, 5  ;;  %v504_v26 = vshrl.u32 %v7425_v5, 16  ;;  %v507_v29 = vshll.u32 %v7425_v5, 16 }
  0x5e   : > { %v2377_v30 = vsel %vm7183_vm2, %v2372_v12, %v2376_v56  ;;  %v487_v34 = vrot.slane %v486_v13, 4  ;;  %v2959_v38 = vsel %vm7429_vm5, %v5627_v10, %v2958_v15  ;;  %v2960_v39 = vrot.slane %v2958_v15, 4  ;;  %v5613_v13 = vld [vmem:[%s7151_s16 + $0x24] sm:$0xe] }
  0x5f   : > { %v5594_v42 = vcombine.low %v2367_v11, %v2377_v30  ;;  %v497_v43 = vrot.slane %v496_v16, 4  ;;  %v506_v31 = vrot.slane %v504_v26, 4  ;;  %v509_v44 = vrot.slane %v507_v29, 5  ;;  %v7481_v16 = vld [vmem:[%s7151_s16 + $0x84] sm:$0xf]  ;;  %v6894_v29 = vld [vmem:[%s8949_s1 + $0x188] sm:$0xff]  }
  0x60   : > { %v492_v49 = vsel %vm7183_vm2, %v487_v34, %v491_v2  ;;  %v2962_v50 = vsel %vm7429_vm5, %v2960_v39, %v2961_v41  ;;  %v513_v52 = vshll.u32 %v7437_v21, 16  ;;  %v517_v53 = vshrl.u32 %v7437_v21, 16 }
  0x61   : > { %6355 = vmatmul.mubr.bf16.gmra.mrb[12].mxu0 %v5594_v42  ;;  %v502_v55 = vsel %vm7183_vm2, %v497_v43, %v501_v18  ;;  %v5659_v48 = vcombine.low %v2959_v38, %v2962_v50  ;;  %v510_v56 = vor.u32 %v509_v44, %v506_v31  ;;  %v523_v57 = vshll.u32 %v277_v40, 16  ;;  %v7489_v40 = vld [vmem:[%s7151_s16 + $0x88] sm:$0xf]  ;;  %v279_v31 = vld [vmem:[%s7151_s16 + $0x8c] sm:$0x1] }
  0x62   : > { %v5355_v59 = vcombine.low %v492_v49, %v502_v55  ;;  %v515_v24 = vrot.slane %v513_v52, 5  ;;  %v519_v61 = vrot.slane %v517_v53, 4  ;;  %v5628_v63 = vrot.slane %v5612_v23, 9 }
  0x63   : > { %6390 = vmatprep.mubr.bf16.mxu0 %v5659_v48  ;;  %v511_v41 = vrot.slane %v510_v56, 4  ;;  %v525_v1 = vrot.slane %v523_v57, 5  ;;  %v2969_v2 = vsel %vm7429_vm5, %v7232_v36, %v2968_v32  ;;  %v528_v3 = vshrl.u32 %v7448_v47, 16 }
  0x64   : > { %6166 = vmatprep.mubr.bf16.mxu1 %v5355_v59  ;;  %v520_v7 = vor.u32 %v519_v61, %v515_v24  ;;  %v2966_v10 = vsel %vm7429_vm5, %v5628_v63, %v2965_v27  ;;  %v531_v11 = vshll.u32 %v7448_v47, 16  ;;  %v537_v12 = vshll.u32 %v7459_v54, 16 }
  0x65   : > { %v516_v8 = vsel %vm7183_vm2, %v511_v41, %v515_v24  ;;  %v5660_v15 = vcombine.low %v2966_v10, %v2969_v2  ;;  %v530_v32 = vrot.slane %v528_v3, 4  ;;  %v541_v36 = vshrl.u32 %v7459_v54, 16  ;;  %v7510_v2 = vld [vmem:[%s7151_s16 + $0x90] sm:$0xf]  ;;  %v7513_v3 = vld [vmem:[%s7151_s16 + $0x94] sm:$0xf] }
  0x66   : > { %v521_v62 = vrot.slane %v520_v7, 4  ;;  %v533_v18 = vrot.slane %v531_v11, 5  ;;  %v539_v26 = vrot.slane %v537_v12, 5  ;;  %v547_v27 = vshll.u32 %v278_v58, 16 }
  0x67   : > { %v543_v30 = vrot.slane %v541_v36, 4  ;;  %v5629_v34 = vrot.slane %v5613_v13, 9  ;;  %v2972_v38 = vrot.slane %v7236_v45, 5  ;;  %v2975_v39 = vrot.slane %v7242_v51, 5  ;;  %v5614_v45 = vld [vmem:[%s7151_s16 + $0x30] sm:$0xe] }
  0x68   : > { %v526_v23 = vsel %vm7183_vm2, %v521_v62, %v525_v1  ;;  %v534_v42 = vor.u32 %v533_v18, %v530_v32  ;;  %v549_v43 = vrot.slane %v547_v27, 5  ;;  %v552_v44 = vshrl.u32 %v7481_v16, 16  ;;  %v280_v62 = vld [vmem:[%s7151_s16 + $0x98] sm:$0x1] }
  0x69   : > { %v5356_v49 = vcombine.low %v516_v8, %v526_v23  ;;  %6391 = vmatmul.mubr.bf16.vlgmr.msra.gmra.mrb[0].mxu0 %v5660_v15  ;;  %v544_v50 = vor.u32 %v543_v30, %v539_v26  ;;  %v2973_v52 = vsel %vm7429_vm5, %v5629_v34, %v2972_v38  ;;  %v2974_v53 = vrot.slane %v2972_v38, 4  ;;  %v6898_v30 = vld [vmem:[%s8949_s1 + $0x198] sm:$0xff]  }
  0x6a   : > { %6423 = vmatpush3.bf16.msra.mxu0 %v7372_v6  ;;  %v535_v51 = vrot.slane %v534_v42, 4  ;;  %v554_v55 = vrot.slane %v552_v44, 4  ;;  %v555_v48 = vshll.u32 %v7481_v16, 16  ;;  %v561_v56 = vshll.u32 %v7489_v40, 16  ;;  %v6896_v6 = vld [vmem:[%s8949_s1 + $0x190] sm:$0xff]  }
  0x6b   : > { %6167 = vmatmul.mubr.bf16.gmra.mrb[16].mxu1 %v5356_v49  ;;  %v545_v57 = vrot.slane %v544_v50, 4  ;;  %v2976_v58 = vsel %vm7429_vm5, %v2974_v53, %v2975_v39  ;;  %v565_v59 = vshrl.u32 %v7489_v40, 16  ;;  %v571_v24 = vshll.u32 %v279_v31, 16  ;;  %6424 = vmatprep.subr.bf16.mxu0 %v6894_v29  ;;  %v5615_v38 = vld [vmem:[%s7151_s16 + $0x3c] sm:$0xe] }
  0x6c   : > { %v540_v61 = vsel %vm7183_vm2, %v535_v51, %v539_v26  ;;  %v5661_v63 = vcombine.low %v2973_v52, %v2976_v58  ;;  %v557_v41 = vrot.slane %v555_v48, 5  ;;  %v563_v1 = vrot.slane %v561_v56, 5  ;;  %v7531_v31 = vld [vmem:[%s7151_s16 + $0x9c] sm:$0xf]  ;;  %v7540_v48 = vld [vmem:[%s7151_s16 + $0xa0] sm:$0xf] }
  0x6d   : > { %v550_v7 = vsel %vm7183_vm2, %v545_v57, %v549_v43  ;;  %v567_v10 = vrot.slane %v565_v59, 4  ;;  %v573_v11 = vrot.slane %v571_v24, 5  ;;  %v5630_v12 = vrot.slane %v5614_v45, 9  ;;  %v6902_v56 = vld [vmem:[%s8949_s1 + $0x1a0] sm:$0xff]  }
  0x6e   : > { %v5357_v13 = vcombine.low %v540_v61, %v550_v7  ;;  %6394 = vmatprep.mubr.bf16.mxu0 %v5661_v63  ;;  %v558_v8 = vor.u32 %v557_v41, %v554_v55  ;;  %v2979_v15 = vrot.slane %v7267_v33, 5  ;;  %v2982_v32 = vrot.slane %v7278_v46, 5  ;;  %6425 = vmatpush3.bf16.msra.mxu0 %v6894_v29  ;;  %v281_v61 = vld [vmem:[%s7151_s16 + $0xa4] sm:$0x1] }
  0x6f   : > { %v568_v36 = vor.u32 %v567_v10, %v563_v1  ;;  %v576_v18 = vshrl.u32 %v7510_v2, 16  ;;  %v579_v26 = vshll.u32 %v7510_v2, 16  ;;  %v585_v27 = vshll.u32 %v7513_v3, 16  ;;  %6426 = vmatprep.subr.bf16.mxu0 %v6896_v6 }
  0x70   : > { %6170 = vmatprep.mubr.bf16.mxu1 %v5357_v13  ;;  %v559_v34 = vrot.slane %v558_v8, 4  ;;  %v2980_v33 = vsel %vm7429_vm5, %v5630_v12, %v2979_v15  ;;  %v2981_v46 = vrot.slane %v2979_v15, 4  ;;  %v589_v29 = vshrl.u32 %v7513_v3, 16  ;;  %v5616_v15 = vld [vmem:[%s7151_s16 + $0x48] sm:$0xe] }
  0x71   : > { %v569_v39 = vrot.slane %v568_v36, 4  ;;  %v578_v23 = vrot.slane %v576_v18, 4  ;;  %v581_v42 = vrot.slane %v579_v26, 5  ;;  %v587_v43 = vrot.slane %v585_v27, 5  ;;  %v7565_v27 = vld [vmem:[%s7151_s16 + $0xa8] sm:$0xf] }
  0x72   : > { %v564_v44 = vsel %vm7183_vm2, %v559_v34, %v563_v1  ;;  %v2983_v49 = vsel %vm7429_vm5, %v2981_v46, %v2982_v32  ;;  %v591_v50 = vrot.slane %v589_v29, 4  ;;  %v595_v52 = vshll.u32 %v280_v62, 16  ;;  %6427 = vmatpush3.bf16.msra.mxu0 %v6896_v6  ;;  %v6906_v32 = vld [vmem:[%s8949_s1 + $0x1a8] sm:$0xff]  }
  0x73   : > { %v574_v53 = vsel %vm7183_vm2, %v569_v39, %v573_v11  ;;  %v5662_v45 = vcombine.low %v2980_v33, %v2983_v49  ;;  %v582_v51 = vor.u32 %v581_v42, %v578_v23  ;;  %v5631_v55 = vrot.slane %v5615_v38, 9  ;;  %6428 = vmatprep.subr.bf16.mxu0 %v6898_v30  ;;  %v7568_v29 = vld [vmem:[%s7151_s16 + $0xac] sm:$0xf] }
  0x74   : > { %v5358_v57 = vcombine.low %v564_v44, %v574_v53  ;;  %v592_v58 = vor.u32 %v591_v50, %v587_v43  ;;  %v597_v59 = vrot.slane %v595_v52, 5  ;;  %v2986_v24 = vrot.slane %v7301_v19, 5  ;;  %v5617_v53 = vld [vmem:[%s7151_s16 + $0x54] sm:$0xe] }
  0x75   : > { %6395 = vmatmul.mubr.bf16.gmra.mrb[4].mxu0 %v5662_v45  ;;  %v583_v6 = vrot.slane %v582_v51, 4  ;;  %v2989_v63 = vrot.slane %v7309_v28, 5  ;;  %v600_v41 = vshrl.u32 %v7531_v31, 16  ;;  %v603_v1 = vshll.u32 %v7531_v31, 16  ;;  %v6910_v45 = vld [vmem:[%s8949_s1 + $0x1b0] sm:$0xff]  }
  0x76   : > { %6171 = vmatmul.mubr.bf16.gmra.mrb[20].mxu1 %v5358_v57  ;;  %v593_v7 = vrot.slane %v592_v58, 4  ;;  %v2987_v10 = vsel %vm7429_vm5, %v5631_v55, %v2986_v24  ;;  %v2988_v11 = vrot.slane %v2986_v24, 4  ;;  %v609_v12 = vshll.u32 %v7540_v48, 16  ;;  %6429 = vmatpush3.bf16.msra.mxu0 %v6898_v30 }
  0x77   : > { %v588_v19 = vsel %vm7183_vm2, %v583_v6, %v587_v43  ;;  %v602_v13 = vrot.slane %v600_v41, 4  ;;  %v605_v28 = vrot.slane %v603_v1, 5  ;;  %v613_v8 = vshrl.u32 %v7540_v48, 16  ;;  %6430 = vmatprep.subr.bf16.mxu0 %v6902_v56  ;;  %v282_v43 = vld [vmem:[%s7151_s16 + $0xb0] sm:$0x1] }
  0x78   : > { %v598_v36 = vsel %vm7183_vm2, %v593_v7, %v597_v59  ;;  %v2990_v62 = vsel %vm7429_vm5, %v2988_v11, %v2989_v63  ;;  %v611_v18 = vrot.slane %v609_v12, 5  ;;  %v619_v26 = vshll.u32 %v281_v61, 16  ;;  %v7588_v41 = vld [vmem:[%s7151_s16 + $0xb4] sm:$0xf]  ;;  %v7593_v12 = vld [vmem:[%s7151_s16 + $0xb8] sm:$0xf] }
  0x79   : > { %v5359_v30 = vcombine.low %v588_v19, %v598_v36  ;;  %v5663_v34 = vcombine.low %v2987_v10, %v2990_v62  ;;  %v606_v33 = vor.u32 %v605_v28, %v602_v13  ;;  %v615_v46 = vrot.slane %v613_v8, 4  ;;  %v283_v19 = vld [vmem:[%s7151_s16 + $0xbc] sm:$0x1] }
  0x7a   : > { %v621_v38 = vrot.slane %v619_v26, 5  ;;  %v5632_v39 = vrot.slane %v5616_v15, 9  ;;  %v2993_v23 = vrot.slane %v7336_v14, 5  ;;  %v2996_v42 = vrot.slane %v7342_v22, 5  ;;  %6431 = vmatpush3.bf16.msra.mxu0 %v6902_v56  ;;  %v6914_v13 = vld [vmem:[%s8949_s1 + $0x1b8] sm:$0xff]  }
  0x7b   : > { %6174 = vmatprep.mubr.bf16.mxu1 %v5359_v30  ;;  %6398 = vmatprep.mubr.bf16.mxu0 %v5663_v34  ;;  %v607_v44 = vrot.slane %v606_v33, 4  ;;  %v616_v49 = vor.u32 %v615_v46, %v611_v18  ;;  %v624_v50 = vshrl.u32 %v7565_v27, 16  ;;  %v627_v52 = vshll.u32 %v7565_v27, 16  ;;  %v5618_v30 = vld [vmem:[%s7151_s16 + $0x60] sm:$0xe] }
  0x7c   : > { %v2994_v14 = vsel %vm7429_vm5, %v5632_v39, %v2993_v23  ;;  %v2995_v22 = vrot.slane %v2993_v23, 4  ;;  %v633_v51 = vshll.u32 %v7568_v29, 16  ;;  %v637_v55 = vshrl.u32 %v7568_v29, 16  ;;  %6432 = vmatprep.subr.bf16.mxu0 %v6906_v32  ;;  %v5548_v39 = vld [vmem:[%s7151_s16 + $0x70] sm:$0xf] }
  0x7d   : > { %v612_v56 = vsel %vm7183_vm2, %v607_v44, %v611_v18  ;;  %v617_v57 = vrot.slane %v616_v49, 4  ;;  %v626_v58 = vrot.slane %v624_v50, 4  ;;  %v629_v59 = vrot.slane %v627_v52, 5  ;;  %v7615_v44 = vld [vmem:[%s8949_s1 + $0x1c0] sm:$0xff]  }
  0x7e   : > { %v2997_v24 = vsel %vm7429_vm5, %v2995_v22, %v2996_v42  ;;  %v635_v61 = vrot.slane %v633_v51, 5  ;;  %v639_v6 = vrot.slane %v637_v55, 4  ;;  %v643_v63 = vshll.u32 %v282_v43, 16  ;;  %6433 = vmatpush3.bf16.msra.mxu0 %v6906_v32  ;;  %v5619_v43 = vld [vmem:[%s7151_s16 + $0x6c] sm:$0xe] }
  0x7f   : > { %v622_v1 = vsel %vm7183_vm2, %v617_v57, %v621_v38  ;;  %v5664_v7 = vcombine.low %v2994_v14, %v2997_v24  ;;  %v630_v10 = vor.u32 %v629_v59, %v626_v58  ;;  %v5633_v11 = vrot.slane %v5617_v53, 9  ;;  %6434 = vmatprep.subr.bf16.mxu0 %v6910_v45  ;;  %v5549_v55 = vld [vmem:[%s7151_s16 + $0x74] sm:$0x1]  ;;  %v5620_v24 = vld [vmem:[%s7151_s16 + $0x78] sm:$0xe] }
  0x80   : > { %v5360_v28 = vcombine.low %v612_v56, %v622_v1  ;;  %v640_v8 = vor.u32 %v639_v6, %v635_v61  ;;  %v645_v15 = vrot.slane %v643_v63, 5  ;;  %v3000_v32 = vrot.slane %v7367_v0, 5 }
  0x81   : > { %6399 = vmatmul.mubr.bf16.gmra.mrb[8].mxu0 %v5664_v7  ;;  %v631_v36 = vrot.slane %v630_v10, 4  ;;  %v3003_v62 = vrot.slane %v7379_v20, 5  ;;  %v648_v18 = vshrl.u32 %v7588_v41, 16  ;;  %v651_v26 = vshll.u32 %v7588_v41, 16 }
  0x82   : > { %6175 = vmatmul.mubr.bf16.gmra.mrb[24].mxu1 %v5360_v28  ;;  %v641_v34 = vrot.slane %v640_v8, 4  ;;  %v3001_v33 = vsel %vm7429_vm5, %v5633_v11, %v3000_v32  ;;  %v3002_v46 = vrot.slane %v3000_v32, 4  ;;  %v657_v38 = vshll.u32 %v7593_v12, 16  ;;  %6435 = vmatpush3.bf16.msra.mxu0 %v6910_v45  ;;  %v7628_v11 = vld [vmem:[%s7151_s16 + $0x7c] sm:$0xf] }
  0x83   : > { %v636_v0 = vsel %vm7183_vm2, %v631_v36, %v635_v61  ;;  %v650_v20 = vrot.slane %v648_v18, 4  ;;  %v653_v23 = vrot.slane %v651_v26, 5  ;;  %v661_v42 = vshrl.u32 %v7593_v12, 16  ;;  %6436 = vmatprep.subr.bf16.mxu0 %v6914_v13  ;;  %v6983_v36 = vld [vmem:[%s7151_s16] sm:$0xf] }
  0x84   : > { %v646_v49 = vsel %vm7183_vm2, %v641_v34, %v645_v15  ;;  %v3004_v50 = vsel %vm7429_vm5, %v3002_v46, %v3003_v62  ;;  %v659_v52 = vrot.slane %v657_v38, 5  ;;  %v667_v53 = vshll.u32 %v283_v19, 16  ;;  %v5554_v15 = vld [vmem:[%s7151_s16 + $0x88] sm:$0xf]  ;;  %v7643_v62 = vld [vmem:[%s7151_s16 + $0x4] sm:$0xf] }
  0x85   : > { %v5361_v45 = vcombine.low %v636_v0, %v646_v49  ;;  %v5665_v14 = vcombine.low %v3001_v33, %v3004_v50  ;;  %v654_v22 = vor.u32 %v653_v23, %v650_v20  ;;  %v663_v51 = vrot.slane %v661_v42, 4  ;;  %v5555_v26 = vld [vmem:[%s7151_s16 + $0x8c] sm:$0x1]  ;;  %v5558_v23 = vld [vmem:[%s7151_s16 + $0x98] sm:$0x1] }
  0x86   : > { %v669_v56 = vrot.slane %v667_v53, 5  ;;  %v5634_v57 = vrot.slane %v5618_v30, 9  ;;  %v3007_v58 = vrot.slane %v7394_v60, 5  ;;  %v3010_v59 = vrot.slane %v7403_v17, 5  ;;  %6437 = vmatpush3.bf16.msra.mxu0 %v6914_v13  ;;  %v7631_v17 = vld [vmem:[%s7151_s16 + $0x80] sm:$0x1] }
  0x87   : > { %6178 = vmatprep.mubr.bf16.mxu1 %v5361_v45  ;;  %6402 = vmatprep.mubr.bf16.mxu0 %v5665_v14  ;;  %v655_v61 = vrot.slane %v654_v22, 4  ;;  %v664_v6 = vor.u32 %v663_v51, %v659_v52  ;;  %v5635_v63 = vrot.slane %v5619_v43, 9  ;;  %v3014_v1 = vrot.slane %v5548_v39, 5  ;;  %v5621_v30 = vld [vmem:[%s7151_s16 + $0x84] sm:$0xe] }
  0x88   : > { %v3008_v7 = vsel %vm7429_vm5, %v5634_v57, %v3007_v58  ;;  %v3009_v10 = vrot.slane %v3007_v58, 4  ;;  %v3017_v60 = vrot.slane %v5549_v55, 5  ;;  %6470 = vmatprep.subr.bf16.mxu0 %v7615_v44  ;;  %v5371_v18 = vcombine.low %v6983_v36, %v7643_v62  ;;  %v5557_v39 = vld [vmem:[%s7151_s16 + $0x94] sm:$0xf]  ;;  %v5622_v42 = vld [vmem:[%s7151_s16 + $0x90] sm:$0xe] }
  0x89   : > { %v660_v19 = vsel %vm7183_vm2, %v655_v61, %v659_v52  ;;  %v665_v13 = vrot.slane %v664_v6, 4  ;;  %v3015_v28 = vsel %vm7429_vm5, %v5635_v63, %v3014_v1  ;;  %v3016_v8 = vrot.slane %v3014_v1, 4  ;;  %v5623_v50 = vld [vmem:[%s7151_s16 + $0x9c] sm:$0xe]  ;;  %v5560_v14 = vld [vmem:[%s7151_s16 + $0xa0] sm:$0xf] }
  0x8a   : > { %v3011_v32 = vsel %vm7429_vm5, %v3009_v10, %v3010_v59  ;;  %v5636_v38 = vrot.slane %v5620_v24, 9  ;;  %v3021_v43 = vrot.slane %v7628_v11, 5  ;;  %v3024_v49 = vrot.slane %v7631_v17, 5  ;;  %v5561_v22 = vld [vmem:[%s7151_s16 + $0xa4] sm:$0x1] }
  0x8b   : > { %v670_v34 = vsel %vm7183_vm2, %v665_v13, %v669_v56  ;;  %v5666_v33 = vcombine.low %v3008_v7, %v3011_v32  ;;  %v3018_v46 = vsel %vm7429_vm5, %v3016_v8, %v3017_v60  ;;  %v5637_v52 = vrot.slane %v5621_v30, 9  ;;  %v5563_v59 = vld [vmem:[%s7151_s16 + $0xac] sm:$0xf]  ;;  %v7667_v61 = vld [vmem:[%s7151_s16 + $0x10] sm:$0xf] }
  0x8c   : > { %v5362_v0 = vcombine.low %v660_v19, %v670_v34  ;;  %v5667_v20 = vcombine.low %v3015_v28, %v3018_v46  ;;  %v3028_v53 = vrot.slane %v5554_v15, 5  ;;  %v3031_v45 = vrot.slane %v5555_v26, 5  ;;  %v6985_v24 = vld [vmem:[%s7151_s16 + $0xc] sm:$0xf]  ;;  %v6987_v8 = vld [vmem:[%s7151_s16 + $0x18] sm:$0xf] }
  0x8d   : > { %6403 = vmatmul.mubr.bf16.gmra.mrb[12].mxu0 %v5666_v33  ;;  %v3022_v51 = vsel %vm7429_vm5, %v5636_v38, %v3021_v43  ;;  %v3023_v55 = vrot.slane %v3021_v43, 4  ;;  %v3035_v58 = vrot.slane %v5557_v39, 5  ;;  %v5372_v6 = vcombine.low %v6985_v24, %v7667_v61  ;;  %v6905_v19 = vld [vmem:[%s8949_s1 + $0x88] sm:$0xff]   ;;  %v7679_v15 = vld [vmem:[%s7151_s16 + $0x1c] sm:$0xf] }
  0x8e   : > { %6179 = vmatmul.mubr.bf16.gmra.mrb[28].mxu1 %v5362_v0  ;;  %6406 = vmatprep.mubr.bf16.mxu0 %v5667_v20  ;;  %v3029_v56 = vsel %vm7429_vm5, %v5637_v52, %v3028_v53  ;;  %v3030_v57 = vrot.slane %v3028_v53, 4  ;;  %v5638_v1 = vrot.slane %v5622_v42, 9  ;;  %v3038_v7 = vrot.slane %v5558_v23, 5  ;;  %v5564_v30 = vld [vmem:[%s7151_s16 + $0xb0] sm:$0x1] }
  0x8f   : > { %6198 = vmatprep.mubr.bf16.mxu1 %v5371_v18  ;;  %v3025_v63 = vsel %vm7429_vm5, %v3023_v55, %v3024_v49  ;;  %v3037_v13 = vrot.slane %v3035_v58, 4  ;;  %v5639_v28 = vrot.slane %v5623_v50, 9  ;;  %v5373_v32 = vcombine.low %v6987_v8, %v7679_v15  ;;  %v5624_v34 = vld [vmem:[%s7151_s16 + $0xa8] sm:$0xe]  ;;  %v5566_v33 = vld [vmem:[%s7151_s16 + $0xb8] sm:$0xf] }
  0x90   : > { %v5668_v10 = vcombine.low %v3022_v51, %v3025_v63  ;;  %v3032_v60 = vsel %vm7429_vm5, %v3030_v57, %v3031_v45  ;;  %v3042_v18 = vrot.slane %v5560_v14, 5  ;;  %v3045_v26 = vrot.slane %v5561_v22, 5  ;;  %v5567_v20 = vld [vmem:[%s7151_s16 + $0xbc] sm:$0x1]  ;;  %v5625_v23 = vld [vmem:[%s7151_s16 + $0xb4] sm:$0xe] }
  0x91   : > { %v5669_v36 = vcombine.low %v3029_v56, %v3032_v60  ;;  %v3049_v38 = vrot.slane %v5563_v59, 5  ;;  %v3036_v39 = vsel %vm7429_vm5, %v5638_v1, %v3035_v58  ;;  %v3039_v0 = vsel %vm7429_vm5, %v3037_v13, %v3038_v7  ;;  %v6909_v50 = vld [vmem:[%s8949_s1 + $0x90] sm:$0xff]   ;;  %v5569_v53 = vld [vmem:[%s7151_s16 + $0xc4] sm:$0xf]  ;;  %v7702_v51 = vld [vmem:[%s7151_s16 + $0x28] sm:$0xf] }
  0x92   : > { %v3044_v46 = vrot.slane %v3042_v18, 4  ;;  %v3043_v42 = vsel %vm7429_vm5, %v5639_v28, %v3042_v18  ;;  %v3056_v49 = vrot.slane %v5566_v33, 5  ;;  %v5640_v52 = vrot.slane %v5624_v34, 9  ;;  %v6989_v22 = vld [vmem:[%s7151_s16 + $0x24] sm:$0xf]  ;;  %v6913_v1 = vld [vmem:[%s8949_s1 + $0x98] sm:$0xff]  }
  0x93   : > { %v5670_v45 = vcombine.low %v3036_v39, %v3039_v0  ;;  %v3051_v14 = vrot.slane %v3049_v38, 4  ;;  %v5374_v55 = vcombine.low %v6989_v22, %v7702_v51  ;;  %v6991_v57 = vld [vmem:[%s7151_s16 + $0x30] sm:$0xf]  ;;  %v7707_v58 = vld [vmem:[%s7151_s16 + $0x34] sm:$0xf]  ;;  %v5641_v24 = vrot.slane %v5625_v23, 9 }
  0x94   : > { %v3046_v43 = vsel %vm7429_vm5, %v3044_v46, %v3045_v26  ;;  %v5375_v59 = vcombine.low %v6991_v57, %v7707_v58  ;;  %v3059_v63 = vrot.slane %v5567_v20, 5  ;;  %v5626_v7 = vld [vmem:[%s7151_s16 + $0xc0] sm:$0xe]  ;;  %v3050_v60 = vsel %vm7429_vm5, %v5640_v52, %v3049_v38  ;;  %v5570_v8 = vld [vmem:[%s7151_s16 + $0xc8] sm:$0x1]  ;;  %v6916_v22 = vld [vmem:[%s7151_s16 + $0x18] sm:$0xff]  }
  0x95   : > { %6407 = vmatmul.mubr.bf16.gmra.mrb[16].mxu0 %v5668_v10  ;;  %v5671_v56 = vcombine.low %v3043_v42, %v3046_v43  ;;  %v3063_v10 = vrot.slane %v5569_v53, 5  ;;  %v3057_v13 = vsel %vm7429_vm5, %v5641_v24, %v3056_v49  ;;  %v5642_v18 = vrot.slane %v5626_v7, 9  ;;  %v6993_v26 = vld [vmem:[%s7151_s16 + $0x3c] sm:$0xf]  ;;  %v6995_v39 = vld [vmem:[%s7151_s16 + $0x48] sm:$0xf] }
  0x96   : > { %6199 = vmatmul.mubr.bf16.vlgmr.msra.gmra.mrb[0].mxu1 %v5372_v6  ;;  %6410 = vmatprep.mubr.bf16.mxu0 %v5669_v36  ;;  %v3058_v6 = vrot.slane %v3056_v49, 4  ;;  %v3066_v38 = vrot.slane %v5570_v8, 5  ;;  %v7733_v0 = vld [vmem:[%s7151_s16 + $0x4c] sm:$0xf]  ;;  %v6930_v49 = vld [vmem:[%s8949_s1 + $0xb0] sm:$0xff]   ;;  %v2416_v52 = vshrl.u32 %v7628_v11, 16 }
  0x97   : > { %6231 = vmatpush3.bf16.msra.mxu1 %v7353_v4  ;;  %6202 = vmatprep.mubr.bf16.mxu1 %v5373_v32  ;;  %v3052_v4 = vrot.slane %v5564_v30, 5  ;;  %v6918_v32 = vld [vmem:[%s8949_s1 + $0xa0] sm:$0xff]   ;;  %v3065_v46 = vrot.slane %v3063_v10, 4  ;;  %v5377_v20 = vcombine.low %v6995_v39, %v7733_v0  ;;  %v6924_v23 = vld [vmem:[%s8949_s1 + $0xa8] sm:$0xff]   ;;  %v3064_v42 = vsel %vm7429_vm5, %v5642_v18, %v3063_v10  ;;  %v6922_v18 = vld [vmem:[%s7151_s16 + $0x30] sm:$0xff]  }
  0x98   : > { %6232 = vmatprep.subr.bf16.mxu1 %v6905_v19  ;;  %v3060_v28 = vsel %vm7429_vm5, %v3058_v6, %v3059_v63  ;;  %v7728_v30 = vld [vmem:[%s7151_s16 + $0x40] sm:$0xf]  ;;  %v7761_v57 = vrot.slane %v2416_v52, 4  ;;  %v6919_v6 = vld [vmem:[%s7151_s16 + $0x24] sm:$0xff]   ;;  %v1326_v7 = vrot.slane %v7667_v61, 5  ;;  %v2422_v8 = vshll.u32 %v7631_v17, 16 }
  0x99   : > { %v5376_v34 = vcombine.low %v6993_v26, %v7728_v30  ;;  %v5673_v33 = vcombine.low %v3057_v13, %v3060_v28  ;;  %v3067_v43 = vsel %vm7429_vm5, %v3065_v46, %v3066_v38  ;;  %v1266_v63 = vld [vmem:[%s7151_s16] sm:$0xe]  ;;  %v1267_v10 = vld [vmem:[%s7151_s16 + $0xc] sm:$0xe]  ;;  %v1333_v13 = vrot.slane %v7679_v15, 5 }
  0x9a   : > { %v5674_v53 = vcombine.low %v3064_v42, %v3067_v43  ;;  %v1269_v61 = vld [vmem:[%s7151_s16 + $0x24] sm:$0xe]  ;;  %v5382_v15 = vcombine.low %v7481_v16, %v7489_v40  ;;  %v5383_v26 = vcombine.low %v7510_v2, %v7513_v3  ;;  %v5395_v17 = vrot.slane %v1266_v63, 9  ;;  %v7001_v38 = vld [vmem:[%s7151_s16 + $0x20] sm:$0x1]  ;;  %v6931_v2 = vld [vmem:[%s7151_s16 + $0x54] sm:$0xff]  }
  0x9b   : > { %6233 = vmatpush3.bf16.msra.mxu1 %v6905_v19  ;;  %v3053_v19 = vsel %vm7429_vm5, %v3051_v14, %v3052_v4  ;;  %v7750_v14 = vld [vmem:[%s7151_s16 + $0x58] sm:$0xf]  ;;  %v1335_v46 = vrot.slane %v1333_v13, 4  ;;  %v1336_v39 = vrot.slane %v7001_v38, 5  ;;  %v7002_v43 = vld [vmem:[%s7151_s16 + $0x2c] sm:$0x1] }
  0x9c   : > { %6234 = vmatprep.subr.bf16.mxu1 %v6909_v50  ;;  %v5672_v36 = vcombine.low %v3050_v60, %v3053_v19  ;;  %v7776_v60 = vld [vmem:[%s8949_s1 + $0xc0] sm:$0xff]   ;;  %v1268_v19 = vld [vmem:[%s7151_s16 + $0x18] sm:$0xe]  ;;  %v7005_v38 = vld [vmem:[%s7151_s16 + $0x50] sm:$0x1]  ;;  %v1368_v16 = vrot.slane %v7750_v14, 5 }
  0x9d   : > { %6411 = vmatmul.mubr.bf16.gmra.mrb[20].mxu0 %v5670_v45  ;;  %v6997_v45 = vld [vmem:[%s7151_s16 + $0x54] sm:$0xf]  ;;  %v7899_v40 = vld [vmem:[%s7151_s16 + $0x64] sm:$0xf] }
  0x9e   : > { %6203 = vmatmul.mubr.bf16.gmra.mrb[4].mxu1 %v5374_v55  ;;  %6414 = vmatprep.mubr.bf16.mxu0 %v5671_v56  ;;  %v5378_v4 = vcombine.low %v6997_v45, %v7750_v14  ;;  %v5379_v55 = vcombine.low %v7407_v25, %v7410_v35  ;;  %v6936_v56 = vld [vmem:[%s8949_s1 + $0xb8] sm:$0xff]   ;;  %v7000_v25 = vld [vmem:[%s7151_s16 + $0x14] sm:$0x1]  ;;  %v6934_v3 = vld [vmem:[%s7151_s16 + $0x60] sm:$0xff]  }
  0x9f   : > { %6206 = vmatprep.mubr.bf16.mxu1 %v5375_v59  ;;  %6235 = vmatpush3.bf16.msra.mxu1 %v6909_v50  ;;  %v2412_v50 = vshll.u32 %v7628_v11, 16  ;;  %v7764_v59 = vld [vmem:[%s7151_s16 + $0x8] sm:$0x1]  ;;  %v1329_v35 = vrot.slane %v7000_v25, 5 }
  0xa0   : > { %6236 = vmatprep.subr.bf16.mxu1 %v6913_v1  ;;  %v1322_v24 = vrot.slane %v7764_v59, 5 }
  0xa1   : > { %v7759_v11 = vrot.slane %v2412_v50, 5 }
  0xa3   : > { %6237 = vmatpush3.bf16.msra.mxu1 %v6913_v1  ;;  %v1319_v1 = vrot.slane %v7643_v62, 5  ;;  %v5380_v62 = vcombine.low %v7425_v5, %v7437_v21  ;;  %v5396_v21 = vrot.slane %v1267_v10, 9  ;;  %v5755_v10 = vld [vmem:[%s7151_s16 + $0x18] sm:$0xf] }
  0xa4   : > { %6238 = vmatprep.subr.bf16.mxu1 %v6918_v32 }
  0xa5   : > { %6415 = vmatmul.mubr.bf16.gmra.mrb[24].mxu0 %v5672_v36  ;;  %v5381_v36 = vcombine.low %v7448_v47, %v7459_v54  ;;  %v1321_v5 = vrot.slane %v1319_v1, 4  ;;  %v6926_v47 = vld [vmem:[%s8949_s1 + $0x1c8] sm:$0xff]   ;;  %v5397_v54 = vrot.slane %v1268_v19, 9  ;;  %v7819_v59 = vsel %vm7429_vm5, %v5395_v17, %v1319_v1  ;;  %v5756_v19 = vld [vmem:[%s7151_s16 + $0x1c] sm:$0xf] }
  0xa6   : > { %6207 = vmatmul.mubr.bf16.gmra.mrb[8].mxu1 %v5376_v34  ;;  %6418 = vmatprep.mubr.bf16.mxu0 %v5673_v33  ;;  %v1347_v34 = vrot.slane %v7707_v58, 5  ;;  %v1328_v33 = vrot.slane %v1326_v7, 4  ;;  %v5398_v58 = vrot.slane %v1269_v61, 9  ;;  %v1361_v1 = vrot.slane %v7733_v0, 5  ;;  %v6928_v0 = vld [vmem:[%s7151_s16 + $0x48] sm:$0xff]  }
  0xa7   : > { %6210 = vmatprep.mubr.bf16.mxu1 %v5377_v20  ;;  %6239 = vmatpush3.bf16.msra.mxu1 %v6918_v32  ;;  %v1340_v32 = vrot.slane %v7702_v51, 5  ;;  %v1270_v51 = vld [vmem:[%s7151_s16 + $0x30] sm:$0xe]  ;;  %v5384_v20 = vcombine.low %v7531_v31, %v7540_v48  ;;  %v7827_v25 = vsel %vm7429_vm5, %v1321_v5, %v1322_v24  ;;  %v7835_v63 = vsel %vm7429_vm5, %v5397_v54, %v1333_v13  ;;  %v1272_v13 = vld [vmem:[%s7151_s16 + $0x48] sm:$0xe] }
  0xa8   : > { %6240 = vmatprep.subr.bf16.mxu1 %v6924_v23  ;;  %v5399_v50 = vrot.slane %v1270_v51, 9  ;;  %v1349_v52 = vrot.slane %v1347_v34, 4  ;;  %v3826_v5 = vshrl.u32 %v5755_v10, 16  ;;  %v3839_v51 = vshrl.u32 %v5756_v19, 16  ;;  %v6937_v48 = vld [vmem:[%s7151_s16 + $0x6c] sm:$0xff]  }
  0xa9   : > { %v1342_v42 = vrot.slane %v1340_v32, 4  ;;  %v7847_v24 = vsel %vm7429_vm5, %v5398_v58, %v1340_v32  ;;  %v7004_v32 = vld [vmem:[%s7151_s16 + $0x44] sm:$0x1]  ;;  %v5401_v54 = vrot.slane %v1272_v13, 9  ;;  %v5759_v13 = vld [vmem:[%s7151_s16 + $0x28] sm:$0xf] }
  0xaa   : > { %v7857_v61 = vsel %vm7429_vm5, %v5399_v50, %v1347_v34  ;;  %v1357_v17 = vrot.slane %v7004_v32, 5  ;;  %v5757_v50 = vld [vmem:[%s7151_s16 + $0x20] sm:$0x1]  ;;  %v1274_v32 = vld [vmem:[%s7151_s16 + $0x60] sm:$0xe] }
  0xab   : > { %6241 = vmatpush3.bf16.msra.mxu1 %v6924_v23  ;;  %v5385_v23 = vcombine.low %v7565_v27, %v7568_v29 }
  0xac   : > { %6242 = vmatprep.subr.bf16.mxu1 %v6930_v49 }
  0xad   : > { %6419 = vmatmul.mubr.bf16.gmra.mrb[28].mxu0 %v5674_v53  ;;  %v7003_v53 = vld [vmem:[%s7151_s16 + $0x38] sm:$0x1] }
  0xae   : > { %6211 = vmatmul.mubr.bf16.gmra.mrb[12].mxu1 %v5378_v4  ;;  %6438 = vmatprep.mubr.bf16.mxu0 %v6916_v22  ;;  %v1350_v45 = vrot.slane %v7003_v53, 5  ;;  %v1271_v4 = vld [vmem:[%s7151_s16 + $0x3c] sm:$0xe]  ;;  %v1354_v22 = vrot.slane %v7728_v30, 5  ;;  %v7823_v30 = vsel %vm7429_vm5, %v5396_v21, %v1326_v7  ;;  %v3829_v21 = vshll.u32 %v5755_v10, 16  ;;  %v6942_v53 = vld [vmem:[%s8949_s1 + $0x1e0] sm:$0xff]  }
  0xaf   : > { %6214 = vmatprep.mubr.bf16.mxu1 %v5379_v55  ;;  %6243 = vmatpush3.bf16.msra.mxu1 %v6930_v49  ;;  %v1343_v49 = vrot.slane %v7002_v43, 5  ;;  %v7810_v55 = vrot.slane %v2422_v8, 5  ;;  %v6925_v7 = vld [vmem:[%s7151_s16 + $0x3c] sm:$0xff]   ;;  %v7843_v8 = vsel %vm7429_vm5, %v1335_v46, %v1336_v39  ;;  %v1363_v46 = vrot.slane %v1361_v1, 4  ;;  %v5761_v43 = vld [vmem:[%s7151_s16 + $0x30] sm:$0xf] }
  0xb0   : > { %6244 = vmatprep.subr.bf16.mxu1 %v6936_v56  ;;  %v1364_v39 = vrot.slane %v7005_v38, 5  ;;  %v3828_v10 = vrot.slane %v3826_v5, 4 }
  0xb1   : > { %8970 = vst [vmem:[#allocation2_spill] sm:$0xff] %v7810_v55 }
  0xb3   : > { %6245 = vmatpush3.bf16.msra.mxu1 %v6936_v56  ;;  %v6932_v56 = vld [vmem:[%s8949_s1 + $0x1d0] sm:$0xff]  }
  0xb4   : > { %6278 = vmatprep.subr.bf16.mxu1 %v7776_v60 }
  0xb5   : > { %6439 = vmatmul.mubr.bf16.vlgmr.msra.gmra.mrb[0].mxu0 %v6919_v6  ;;  %v7831_v6 = vsel %vm7429_vm5, %v1328_v33, %v1329_v35  ;;  %v7851_v35 = vsel %vm7429_vm5, %v1342_v42, %v1343_v49  ;;  %v3835_v33 = vshll.u32 %v5756_v19, 16  ;;  %v3831_v19 = vrot.slane %v3829_v21, 5  ;;  %v1275_v21 = vld [vmem:[%s7151_s16 + $0x6c] sm:$0xe] }
  0xb6   : > { %6215 = vmatmul.mubr.bf16.gmra.mrb[16].mxu1 %v5380_v62  ;;  %6471 = vmatpush3.bf16.msra.mxu0 %v7615_v44  ;;  %v5400_v62 = vrot.slane %v1271_v4, 9  ;;  %v5404_v58 = vrot.slane %v1275_v21, 9 }
  0xb7   : > { %6218 = vmatprep.mubr.bf16.mxu1 %v5381_v36  ;;  %6442 = vmatprep.mubr.bf16.mxu0 %v6922_v18  ;;  %v7861_v36 = vsel %vm7429_vm5, %v1349_v52, %v1350_v45  ;;  %v1356_v18 = vrot.slane %v1354_v22, 4  ;;  %v5758_v52 = vld [vmem:[%s7151_s16 + $0x24] sm:$0xf]  ;;  %v3863_v45 = vshrl.u32 %v5759_v13, 16 }
  0xb8   : > { %6472 = vmatprep.subr.bf16.mxu0 %v6926_v47  ;;  %v7878_v49 = vsel %vm7429_vm5, %v5400_v62, %v1354_v22  ;;  %v7895_v22 = vld [vmem:[%s7151_s16 + $0x54] sm:$0xe]  ;;  %v3841_v62 = vrot.slane %v3839_v51, 4  ;;  %v3850_v38 = vshrl.u32 %v5758_v52, 16  ;;  %v3853_v28 = vshll.u32 %v5758_v52, 16 }
  0xb9   : > { %v7892_v4 = vsel %vm7429_vm5, %v1356_v18, %v1357_v17  ;;  %v3845_v17 = vshll.u32 %v5757_v50, 16  ;;  %v5402_v5 = vrot.slane %v7895_v22, 9  ;;  %v6946_v50 = vld [vmem:[%s8949_s1 + $0x1e8] sm:$0xff]   ;;  %v1370_v52 = vrot.slane %v1368_v16, 4 }
  0xba   : > { %6473 = vmatpush3.bf16.msra.mxu0 %v6926_v47  ;;  %v6938_v47 = vld [vmem:[%s8949_s1 + $0x1d8] sm:$0xff]   ;;  %v3832_v22 = vor.u32 %v3831_v19, %v3828_v10  ;;  %v3852_v34 = vrot.slane %v3850_v38, 4  ;;  %v3855_v44 = vrot.slane %v3853_v28, 5  ;;  %v7010_v10 = vld [vmem:[%s7151_s16 + $0x74] sm:$0x1]  ;;  %v3865_v28 = vrot.slane %v3863_v45, 4 }
  0xbb   : > { %6474 = vmatprep.subr.bf16.mxu0 %v6932_v56  ;;  %v7933_v42 = vrot.slane %v3845_v17, 5  ;;  %v1385_v19 = vrot.slane %v7010_v10, 5  ;;  %v3874_v38 = vshrl.u32 %v5761_v43, 16  ;;  %v7958_v27 = vsel %vm7429_vm5, %v5402_v5, %v1368_v16 }
  0xbc   : > { %v3833_v21 = vrot.slane %v3832_v22, 4 }
  0xbd   : > { %6443 = vmatmul.mubr.bf16.gmra.mrb[4].mxu0 %v6925_v7  ;;  %v7905_v7 = vrot.slane %v3835_v33, 5  ;;  %v7008_v33 = vld [vmem:[%s7151_s16 + $0x70] sm:$0xf] }
  0xbe   : > { %6219 = vmatmul.mubr.bf16.gmra.mrb[20].mxu1 %v5382_v15  ;;  %6446 = vmatprep.mubr.bf16.mxu0 %v6928_v0  ;;  %v1375_v15 = vrot.slane %v7899_v40, 5  ;;  %v7007_v0 = vld [vmem:[%s7151_s16 + $0x5c] sm:$0x1]  ;;  %v1382_v51 = vrot.slane %v7008_v33, 5 }
  0xbf   : > { %6222 = vmatprep.mubr.bf16.mxu1 %v5383_v26  ;;  %6475 = vmatpush3.bf16.msra.mxu0 %v6932_v56  ;;  %v1371_v18 = vrot.slane %v7007_v0, 5  ;;  %v7914_v26 = vsel %vm7429_vm5, %v5401_v54, %v1361_v1  ;;  %v7918_v56 = vsel %vm7429_vm5, %v1363_v46, %v1364_v39  ;;  %v7009_v1 = vld [vmem:[%s7151_s16 + $0x68] sm:$0x1]  ;;  %v3859_v0 = vshll.u32 %v5759_v13, 16  ;;  %v6954_v40 = vld [vmem:[%s8949_s1 + $0x1f8] sm:$0xff]  }
  0xc0   : > { %6476 = vmatprep.subr.bf16.mxu0 %v6938_v47  ;;  %v1378_v54 = vrot.slane %v7009_v1, 5  ;;  %v5403_v46 = vrot.slane %v1274_v32, 9  ;;  %v1377_v39 = vrot.slane %v1375_v15, 4  ;;  %v3842_v33 = vor.u32 %v3841_v62, %v7905_v7  ;;  %v5762_v1 = vld [vmem:[%s7151_s16 + $0x34] sm:$0xf] }
  0xc1   : > { %v1384_v32 = vrot.slane %v1382_v51, 4  ;;  %v5760_v62 = vld [vmem:[%s7151_s16 + $0x2c] sm:$0x1]  ;;  %v7945_v17 = vrot.slane %v3859_v0, 5  ;;  %v3883_v13 = vshll.u32 %v5762_v1, 16  ;;  %v3887_v31 = vshrl.u32 %v5762_v1, 16 }
  0xc2   : > { %v3843_v10 = vrot.slane %v3842_v33, 4  ;;  %v7962_v29 = vsel %vm7429_vm5, %v1370_v52, %v1371_v18  ;;  %v7969_v45 = vsel %vm7429_vm5, %v5403_v46, %v1375_v15  ;;  %v7973_v14 = vsel %vm7429_vm5, %v1377_v39, %v1378_v54  ;;  %v1276_v18 = vld [vmem:[%s7151_s16 + $0x78] sm:$0xe] }
  0xc3   : > { %6477 = vmatpush3.bf16.msra.mxu0 %v6938_v47  ;;  %v7977_v16 = vsel %vm7429_vm5, %v5404_v58, %v1382_v51  ;;  %v7987_v15 = vsel %vm7429_vm5, %v1384_v32, %v1385_v19  ;;  %v3866_v5 = vor.u32 %v3865_v28, %v7945_v17  ;;  %v3876_v52 = vrot.slane %v3874_v38, 4  ;;  %v5764_v58 = vld [vmem:[%s7151_s16 + $0x3c] sm:$0xf]  ;;  %v5765_v51 = vld [vmem:[%s7151_s16 + $0x40] sm:$0xf] }
  0xc4   : > { %6478 = vmatprep.subr.bf16.mxu0 %v6942_v53  ;;  %v3838_v0 = vsel %vm7183_vm2, %v3833_v21, %v7905_v7  ;;  %v3848_v46 = vsel %vm7183_vm2, %v3843_v10, %v7933_v42  ;;  %v7998_v39 = vrot.slane %v3883_v13, 5  ;;  %v3889_v22 = vrot.slane %v3887_v31, 4  ;;  %v7012_v19 = vld [vmem:[%s7151_s16 + $0x80] sm:$0x1]  ;;  %v8157_v47 = vld [vmem:[%s7151_s16 + $0x68] sm:$0x1] }
  0xc5   : > { %6447 = vmatmul.mubr.bf16.gmra.mrb[8].mxu0 %v6931_v2  ;;  %v3877_v2 = vshll.u32 %v5761_v43, 16  ;;  %v3869_v43 = vshll.u32 %v5760_v62, 16  ;;  %v5405_v32 = vrot.slane %v1276_v18, 9  ;;  %v1277_v62 = vld [vmem:[%s7151_s16 + $0x84] sm:$0xe]  ;;  %v3898_v28 = vshrl.u32 %v5764_v58, 16 }
  0xc6   : > { %6223 = vmatmul.mubr.bf16.gmra.mrb[24].mxu1 %v5384_v20  ;;  %6450 = vmatprep.mubr.bf16.mxu0 %v6934_v3  ;;  %v6950_v20 = vld [vmem:[%s8949_s1 + $0x1f0] sm:$0xff]   ;;  %v7011_v3 = vld [vmem:[%s7151_s16 + $0x7c] sm:$0xf]  ;;  %v3901_v7 = vshll.u32 %v5764_v58, 16  ;;  %v3907_v38 = vshll.u32 %v5765_v51, 16  ;;  %v8971_v42 = vcombine.low %v7588_v41, %v7593_v12  ;;  %v8009_v13 = vrot.slane %v3866_v5, 4 }
  0xc7   : > { %6226 = vmatprep.mubr.bf16.mxu1 %v5385_v23  ;;  %6479 = vmatpush3.bf16.msra.mxu0 %v6942_v53  ;;  %v3856_v23 = vor.u32 %v3855_v44, %v3852_v34  ;;  %v6939_v53 = vld [vmem:[%s7151_s16 + $0x78] sm:$0xff]   ;;  %v1389_v44 = vrot.slane %v7011_v3, 5  ;;  %v3879_v54 = vrot.slane %v3877_v2, 5  ;;  %v8002_v1 = vrot.slane %v3869_v43, 5  ;;  %v8014_v21 = vld [vmem:[%s8949_s1 + $0x200] sm:$0xff]   ;;  %8979 = vst [vmem:[#allocation5_spill] sm:$0xff] %v8157_v47 }
  0xc8   : > { %6480 = vmatprep.subr.bf16.mxu0 %v6946_v50  ;;  %v5763_v34 = vld [vmem:[%s7151_s16 + $0x38] sm:$0x1]  ;;  %v3911_v2 = vshrl.u32 %v5765_v51, 16  ;;  %v6941_v43 = vld [vmem:[%s7151_s16 + $0x84] sm:$0xff]   ;;  %v3890_v12 = vor.u32 %v3889_v22, %v7998_v39  ;;  %v3903_v58 = vrot.slane %v3901_v7, 5  ;;  %v8036_v51 = vrot.slane %v3907_v38, 5 }
  0xc9   : > { %v8000_v33 = vrot.slane %v3856_v23, 4  ;;  %v1391_v10 = vrot.slane %v1389_v44, 4  ;;  %v3880_v31 = vor.u32 %v3879_v54, %v3876_v52  ;;  %v8972_v23 = vcombine.low %v7819_v59, %v7827_v25  ;;  %v7013_v18 = vld [vmem:[%s7151_s16 + $0x88] sm:$0xf]  ;;  %v5766_v5 = vld [vmem:[%s7151_s16 + $0x44] sm:$0x1] }
  0xca   : > { %v1396_v3 = vrot.slane %v7013_v18, 5  ;;  %v8027_v59 = vcombine.low %v3838_v0, %v3848_v46  ;;  %v5767_v52 = vld [vmem:[%s7151_s16 + $0x48] sm:$0xf]  ;;  %v3900_v54 = vrot.slane %v3898_v28, 4  ;;  %v3913_v22 = vrot.slane %v3911_v2, 4 }
  0xcb   : > { %6481 = vmatpush3.bf16.msra.mxu0 %v6946_v50  ;;  %v1392_v50 = vrot.slane %v7012_v19, 5  ;;  %v6943_v19 = vld [vmem:[%s7151_s16 + $0x90] sm:$0xff]   ;;  %v3862_v0 = vsel %vm7183_vm2, %v8000_v33, %v7945_v17  ;;  %v3881_v46 = vrot.slane %v3880_v31, 4  ;;  %v3872_v28 = vsel %vm7183_vm2, %v8009_v13, %v8002_v1  ;;  %v8058_v33 = vld [vmem:[%s7151_s16 + $0x58] sm:$0xf]  ;;  %v6944_v31 = vld [vmem:[%s8949_s1 + $0xc8] sm:$0xff]  }
  0xcc   : > { %6482 = vmatprep.subr.bf16.mxu0 %v6950_v20  ;;  %v3891_v38 = vrot.slane %v3890_v12, 4  ;;  %v1398_v2 = vrot.slane %v1396_v3, 4  ;;  %v5770_v17 = vld [vmem:[%s7151_s16 + $0x54] sm:$0xf]  ;;  %v3917_v1 = vshll.u32 %v5766_v5, 16  ;;  %v3922_v13 = vshrl.u32 %v5767_v52, 16 }
  0xcd   : > { %6451 = vmatmul.mubr.bf16.gmra.mrb[12].mxu0 %v6937_v48  ;;  %v3893_v48 = vshll.u32 %v5763_v34, 16  ;;  %v8054_v7 = vsel %vm7429_vm5, %v1391_v10, %v1392_v50  ;;  %v3925_v50 = vshll.u32 %v5767_v52, 16  ;;  %v3904_v10 = vor.u32 %v3903_v58, %v3900_v54  ;;  %v6945_v54 = vld [vmem:[%s7151_s16 + $0x9c] sm:$0xff]   ;;  %v7019_v41 = vld [vmem:[%s7151_s16 + $0xac] sm:$0xf] }
  0xce   : > { %6227 = vmatmul.mubr.bf16.gmra.mrb[28].mxu1 %v8971_v42  ;;  %6454 = vmatprep.mubr.bf16.mxu0 %v6939_v53  ;;  %v5406_v53 = vrot.slane %v1277_v62, 9  ;;  %v7014_v42 = vld [vmem:[%s7151_s16 + $0x8c] sm:$0x1]  ;;  %v3955_v5 = vshll.u32 %v8058_v33, 16  ;;  %v8974_v52 = vcombine.low %v7835_v63, %v7843_v8  ;;  %v8094_v63 = vld [vmem:[%s7151_s16 + $0x50] sm:$0x1] }
  0xcf   : > { %6246 = vmatprep.mubr.bf16.mxu1 %v8972_v23  ;;  %6483 = vmatpush3.bf16.msra.mxu0 %v6950_v20  ;;  %v8033_v20 = vsel %vm7429_vm5, %v5405_v32, %v1389_v44  ;;  %v3895_v62 = vrot.slane %v3893_v48, 5  ;;  %v1399_v23 = vrot.slane %v7014_v42, 5  ;;  %v1278_v44 = vld [vmem:[%s7151_s16 + $0x90] sm:$0xe]  ;;  %v8046_v32 = vld [vmem:[%s7151_s16 + $0x4c] sm:$0xf]  ;;  %v3914_v48 = vor.u32 %v3913_v22, %v8036_v51 }
  0xd0   : > { %6484 = vmatprep.subr.bf16.mxu0 %v6954_v40  ;;  %v3931_v12 = vshll.u32 %v8046_v32, 16  ;;  %v3935_v18 = vshrl.u32 %v8046_v32, 16  ;;  %v8973_v42 = vcombine.low %v7823_v30, %v7831_v6  ;;  %v6948_v30 = vld [vmem:[%s8949_s1 + $0xd0] sm:$0xff]   ;;  %v3886_v6 = vsel %vm7183_vm2, %v3881_v46, %v7998_v39  ;;  %v6947_v8 = vld [vmem:[%s7151_s16 + $0xa8] sm:$0xff]   ;;  %v8101_v39 = vld [vmem:[%s7151_s16 + $0x5c] sm:$0x1] }
  0xd1   : > { %v3896_v58 = vsel %vm7183_vm2, %v3891_v38, %v3895_v62  ;;  %v5407_v22 = vrot.slane %v1278_v44, 9  ;;  %v3927_v25 = vrot.slane %v3925_v50, 5  ;;  %8975 = vst [vmem:[#allocation3_spill] sm:$0xff] %v8101_v39  ;;  %v3905_v46 = vrot.slane %v3904_v10, 4 }
  0xd2   : > { %v3915_v62 = vrot.slane %v3914_v48, 4  ;;  %v8103_v38 = vrot.slane %v3931_v12, 5  ;;  %v8105_v34 = vrot.slane %v3955_v5, 5  ;;  %v8110_v50 = vcombine.low %v3862_v0, %v3872_v28  ;;  %v5773_v28 = vld [vmem:[%s7151_s16 + $0x60] sm:$0xf] }
  0xd3   : > { %6485 = vmatpush3.bf16.msra.mxu0 %v6954_v40  ;;  %v8066_v40 = vsel %vm7429_vm5, %v5406_v53, %v1396_v3  ;;  %v3946_v53 = vshrl.u32 %v5770_v17, 16  ;;  %v3949_v3 = vshll.u32 %v5770_v17, 16  ;;  %v7015_v17 = vld [vmem:[%s7151_s16 + $0x94] sm:$0xf]  ;;  %v8114_v48 = vcombine.low %v3886_v6, %v3896_v58 }
  0xd4   : > { %6518 = vmatprep.subr.bf16.mxu0 %v8014_v21  ;;  %v3941_v0 = vshll.u32 %v8094_v63, 16  ;;  %v3910_v6 = vsel %vm7183_vm2, %v3905_v46, %v8036_v51  ;;  %v8978_v46 = vcombine.low %v7857_v61, %v7861_v36 }
  0xd5   : > { %6455 = vmatmul.mubr.bf16.gmra.mrb[16].mxu0 %v6941_v43  ;;  %v3959_v43 = vshrl.u32 %v8058_v33, 16  ;;  %v3948_v44 = vrot.slane %v3946_v53, 4  ;;  %v7016_v53 = vld [vmem:[%s7151_s16 + $0x98] sm:$0x1] }
  0xd6   : > { %6247 = vmatmul.mubr.bf16.vlgmr.msra.gmra.mrb[0].mxu1 %v8973_v42  ;;  %6458 = vmatprep.mubr.bf16.mxu0 %v6943_v19  ;;  %v8097_v19 = vrot.slane %v3917_v1, 5  ;;  %v1403_v42 = vrot.slane %v7015_v17, 5  ;;  %v7017_v17 = vld [vmem:[%s7151_s16 + $0xa0] sm:$0xf]  ;;  %v3943_v36 = vrot.slane %v3941_v0, 5 }
  0xd7   : > { %6279 = vmatpush3.bf16.msra.mxu1 %v7776_v60  ;;  %6250 = vmatprep.mubr.bf16.mxu1 %v8974_v52  ;;  %v8091_v60 = vsel %vm7429_vm5, %v1398_v2, %v1399_v23  ;;  %v3924_v52 = vrot.slane %v3922_v13, 4  ;;  %v3937_v23 = vrot.slane %v3935_v18, 4  ;;  %v3951_v2 = vrot.slane %v3949_v3, 5  ;;  %v6952_v13 = vld [vmem:[%s8949_s1 + $0xd8] sm:$0xff]  }
  0xd8   : > { %6280 = vmatprep.subr.bf16.mxu1 %v6944_v31  ;;  %v3961_v1 = vrot.slane %v3959_v43, 4  ;;  %v1279_v18 = vld [vmem:[%s7151_s16 + $0x9c] sm:$0xe]  ;;  %v1406_v3 = vrot.slane %v7016_v53, 5  ;;  %v8127_v43 = vld [vmem:[%s7151_s16 + $0x64] sm:$0xf] }
  0xd9   : > { %v3928_v5 = vor.u32 %v3927_v25, %v3924_v52  ;;  %8976 = vst [vmem:[#allocation4_spill] sm:$0xff] %v8127_v43  ;;  %v3938_v58 = vor.u32 %v3937_v23, %v8103_v38  ;;  %v1410_v12 = vrot.slane %v7017_v17, 5  ;;  %v8977_v25 = vcombine.low %v7847_v24, %v7851_v35  ;;  %v6949_v23 = vld [vmem:[%s7151_s16 + $0xb4] sm:$0xff]   ;;  %v6955_v24 = vld [vmem:[%s8949_s1 + $0xe0] sm:$0xff]   ;;  %v5776_v17 = vld [vmem:[%s7151_s16 + $0x6c] sm:$0xf] }
  0xda   : > { %v1405_v52 = vrot.slane %v1403_v42, 4  ;;  %v3952_v53 = vor.u32 %v3951_v2, %v3948_v44  ;;  %v3962_v51 = vor.u32 %v3961_v1, %v8105_v34  ;;  %v3970_v35 = vshrl.u32 %v5773_v28, 16  ;;  %v7018_v2 = vld [vmem:[%s7151_s16 + $0xa4] sm:$0x1] }
  0xdb   : > { %6281 = vmatpush3.bf16.msra.mxu1 %v6944_v31  ;;  %v8121_v31 = vsel %vm7429_vm5, %v5407_v22, %v1403_v42  ;;  %v3965_v22 = vshll.u32 %v8101_v39, 16  ;;  %v3983_v42 = vshrl.u32 %v8127_v43, 16  ;;  %v3929_v61 = vrot.slane %v3928_v5, 4  ;;  %v8296_v39 = vld [vmem:[%s7151_s16 + $0x98] sm:$0x1] }
  0xdc   : > { %6282 = vmatprep.subr.bf16.mxu1 %v6948_v30  ;;  %v5408_v44 = vrot.slane %v1279_v18, 9  ;;  %v1413_v1 = vrot.slane %v7018_v2, 5  ;;  %v3953_v5 = vrot.slane %v3952_v53, 4  ;;  %v3963_v18 = vrot.slane %v3962_v51, 4  ;;  %8992 = vst [vmem:[#allocation14_spill] sm:$0xff] %v8296_v39 }
  0xdd   : > { %6459 = vmatmul.mubr.bf16.gmra.mrb[20].mxu0 %v6945_v54  ;;  %v3920_v54 = vsel %vm7183_vm2, %v3915_v62, %v8097_v19  ;;  %v3979_v19 = vshll.u32 %v8127_v43, 16  ;;  %v6951_v62 = vld [vmem:[%s7151_s16 + $0xc0] sm:$0xff]   ;;  %v3967_v10 = vrot.slane %v3965_v22, 5  ;;  %v8163_v43 = vsel %vm7429_vm5, %v1405_v52, %v1406_v3 }
  0xde   : > { %6251 = vmatmul.mubr.bf16.gmra.mrb[4].mxu1 %v8977_v25  ;;  %6462 = vmatprep.mubr.bf16.mxu0 %v6947_v8  ;;  %v3973_v8 = vshll.u32 %v5773_v28, 16  ;;  %v3939_v25 = vrot.slane %v3938_v58, 4  ;;  %v1417_v28 = vrot.slane %v7019_v41, 5  ;;  %v8159_v55 = vcombine.low %v3910_v6, %v3920_v54  ;;  %v6957_v41 = vld [vmem:[%s8949_s1 + $0xe8] sm:$0xff]  }
  0xdf   : > { %6254 = vmatprep.mubr.bf16.mxu1 %v8978_v46  ;;  %6283 = vmatpush3.bf16.msra.mxu1 %v6948_v30  ;;  %v1280_v30 = vld [vmem:[%s7151_s16 + $0xa8] sm:$0xe]  ;;  %v1412_v46 = vrot.slane %v1410_v12, 4  ;;  %v3972_v0 = vrot.slane %v3970_v35, 4  ;;  %v8165_v58 = vrot.slane %v3979_v19, 5  ;;  %v3985_v22 = vrot.slane %v3983_v42, 4 }
  0xe0   : > { %6284 = vmatprep.subr.bf16.mxu1 %v6952_v13  ;;  %v3975_v2 = vrot.slane %v3973_v8, 5  ;;  %v3934_v3 = vsel %vm7183_vm2, %v3929_v61, %v8103_v38  ;;  %v8175_v6 = vsel %vm7429_vm5, %v5408_v44, %v1410_v12  ;;  %v3994_v54 = vshrl.u32 %v5776_v17, 16  ;;  %v7020_v38 = vld [vmem:[%s7151_s16 + $0xb0] sm:$0x1]  ;;  %v1281_v19 = vld [vmem:[%s7151_s16 + $0xb4] sm:$0xe] }
  0xe1   : > { %v3997_v52 = vshll.u32 %v5776_v17, 16  ;;  %v3944_v53 = vsel %vm7183_vm2, %v3939_v25, %v3943_v36  ;;  %v8184_v51 = vsel %vm7429_vm5, %v1412_v46, %v1413_v1  ;;  %v5409_v35 = vrot.slane %v1280_v30, 9  ;;  %v8206_v30 = vld [vmem:[%s7151_s16 + $0x74] sm:$0x1]  ;;  %v7021_v25 = vld [vmem:[%s7151_s16 + $0xb8] sm:$0xf] }
  0xe2   : > { %v1420_v8 = vrot.slane %v7020_v38, 5  ;;  %v8981_v12 = vcombine.low %v7878_v49, %v7892_v4  ;;  %v3958_v42 = vsel %vm7183_vm2, %v3953_v5, %v8105_v34  ;;  %v3968_v61 = vsel %vm7183_vm2, %v3963_v18, %v3967_v10  ;;  %v6953_v4 = vld [vmem:[%s7151_s16 + $0xcc] sm:$0xff]   ;;  %8983 = vst [vmem:[#allocation7_spill] sm:$0xff] %v8206_v30  ;;  %v5782_v38 = vld [vmem:[%s7151_s16 + $0x84] sm:$0xf] }
  0xe3   : > { %6285 = vmatpush3.bf16.msra.mxu1 %v6952_v13  ;;  %v8178_v13 = vld [vmem:[%s7151_s16 + $0x70] sm:$0xf]  ;;  %v1419_v36 = vrot.slane %v1417_v28, 4  ;;  %v3989_v44 = vshll.u32 %v8157_v47, 16  ;;  %v8982_v49 = vcombine.low %v7914_v26, %v7918_v56  ;;  %v3986_v1 = vor.u32 %v3985_v22, %v8165_v58  ;;  %v8223_v22 = vld [vmem:[%s7151_s16 + $0x7c] sm:$0xf] }
  0xe4   : > { %6286 = vmatprep.subr.bf16.mxu1 %v6955_v24  ;;  %8980 = vst [vmem:[#allocation6_spill] sm:$0xff] %v8178_v13  ;;  %v4003_v34 = vshll.u32 %v8178_v13, 16  ;;  %v4007_v10 = vshrl.u32 %v8178_v13, 16  ;;  %v5410_v17 = vrot.slane %v1281_v19, 9  ;;  %v1424_v46 = vrot.slane %v7021_v25, 5  ;;  %8984 = vst [vmem:[#allocation8_spill] sm:$0xff] %v8223_v22 }
  0xe5   : > { %6463 = vmatmul.mubr.bf16.gmra.mrb[24].mxu0 %v6949_v23  ;;  %v6959_v23 = vld [vmem:[%s8949_s1 + $0xf0] sm:$0xff]   ;;  %v3996_v26 = vrot.slane %v3994_v54, 4  ;;  %v3999_v56 = vrot.slane %v3997_v52, 5  ;;  %v8214_v18 = vcombine.low %v3934_v3, %v3944_v53  ;;  %v8226_v19 = vcombine.low %v3958_v42, %v3968_v61  ;;  %v7022_v3 = vld [vmem:[%s7151_s16 + $0xbc] sm:$0x1] }
  0xe6   : > { %6255 = vmatmul.mubr.bf16.gmra.mrb[8].mxu1 %v8981_v12  ;;  %6466 = vmatprep.mubr.bf16.mxu0 %v6951_v62  ;;  %v3976_v62 = vor.u32 %v3975_v2, %v3972_v0  ;;  %v8220_v2 = vsel %vm7429_vm5, %v5409_v35, %v1417_v28  ;;  %v8230_v54 = vsel %vm7429_vm5, %v1419_v36, %v1420_v8  ;;  %v8232_v52 = vrot.slane %v3989_v44, 5  ;;  %v6961_v12 = vld [vmem:[%s8949_s1 + $0xf8] sm:$0xff]   ;;  %v8239_v28 = vld [vmem:[%s7151_s16 + $0x88] sm:$0xf] }
  0xe7   : > { %6258 = vmatprep.mubr.bf16.mxu1 %v8982_v49  ;;  %6287 = vmatpush3.bf16.msra.mxu1 %v6955_v24  ;;  %v5779_v24 = vld [vmem:[%s7151_s16 + $0x78] sm:$0xf]  ;;  %v1427_v53 = vrot.slane %v7022_v3, 5  ;;  %8985 = vst [vmem:[#allocation9_spill] sm:$0xff] %v8239_v28  ;;  %v8243_v42 = vrot.slane %v3986_v1, 4  ;;  %v8245_v61 = vrot.slane %v4003_v34, 5  ;;  %v8249_v36 = vsel %vm7429_vm5, %v5410_v17, %v1424_v46 }
  0xe8   : > { %6288 = vmatprep.subr.bf16.mxu1 %v6957_v41  ;;  %v8241_v35 = vrot.slane %v3976_v62, 4  ;;  %v4009_v8 = vrot.slane %v4007_v10, 4  ;;  %v1426_v44 = vrot.slane %v1424_v46, 4  ;;  %v4000_v49 = vor.u32 %v3999_v56, %v3996_v26  ;;  %v5785_v3 = vld [vmem:[%s7151_s16 + $0x90] sm:$0xf] }
  0xe9   : > { %v4013_v25 = vshll.u32 %v8206_v30, 16  ;;  %v4021_v0 = vshll.u32 %v5779_v24, 16  ;;  %v4027_v62 = vshll.u32 %v8223_v22, 16  ;;  %v4031_v1 = vshrl.u32 %v8223_v22, 16  ;;  %v8256_v34 = vld [vmem:[%s7151_s16 + $0x94] sm:$0xf] }
  0xea   : > { %8986 = vst [vmem:[#allocation10_spill] sm:$0xff] %v8256_v34  ;;  %v8987_v10 = vcombine.low %v7958_v27, %v7962_v29  ;;  %v4042_v17 = vshrl.u32 %v5782_v38, 16  ;;  %v4045_v46 = vshll.u32 %v5782_v38, 16  ;;  %v4055_v26 = vshrl.u32 %v8239_v28, 16  ;;  %v5788_v38 = vld [vmem:[%s7151_s16 + $0x9c] sm:$0xf] }
  0xeb   : > { %6289 = vmatpush3.bf16.msra.mxu1 %v6957_v41  ;;  %v4018_v41 = vshrl.u32 %v5779_v24, 16  ;;  %v8988_v56 = vcombine.low %v7969_v45, %v7973_v14  ;;  %v4010_v29 = vor.u32 %v4009_v8, %v8245_v61  ;;  %v4069_v24 = vshll.u32 %v5785_v3, 16  ;;  %v8278_v45 = vld [vmem:[%s7151_s16 + $0x80] sm:$0x1] }
  0xec   : > { %6290 = vmatprep.subr.bf16.mxu1 %v6959_v23  ;;  %v8275_v5 = vrot.slane %v4013_v25, 5  ;;  %8989 = vst [vmem:[#allocation11_spill] sm:$0xff] %v8278_v45  ;;  %v4075_v14 = vshll.u32 %v8256_v34, 16  ;;  %v4023_v27 = vrot.slane %v4021_v0, 5  ;;  %v4033_v8 = vrot.slane %v4031_v1, 4 }
  0xed   : > { %6467 = vmatmul.mubr.bf16.gmra.mrb[28].mxu0 %v6953_v4  ;;  %v4051_v4 = vshll.u32 %v8239_v28, 16  ;;  %v8282_v28 = vrot.slane %v4027_v62, 5  ;;  %v8288_v22 = vld [vmem:[%s7151_s16 + $0xa0] sm:$0xf]  ;;  %v4044_v25 = vrot.slane %v4042_v17, 4  ;;  %v4047_v30 = vrot.slane %v4045_v46, 5 }
  0xee   : > { %6259 = vmatmul.mubr.bf16.gmra.mrb[12].mxu1 %v8987_v10  ;;  %6486 = vmatprep.mubr.bf16.mxu0 %v8027_v59  ;;  %v4066_v59 = vshrl.u32 %v5785_v3, 16  ;;  %v8273_v10 = vrot.slane %v4000_v49, 4  ;;  %v8285_v3 = vld [vmem:[%s7151_s16 + $0x8c] sm:$0x1]  ;;  %8991 = vst [vmem:[#allocation13_spill] sm:$0xff] %v8288_v22  ;;  %v4057_v47 = vrot.slane %v4055_v26, 4  ;;  %v8305_v62 = vsel %vm7429_vm5, %v1426_v44, %v1427_v53 }
  0xef   : > { %6262 = vmatprep.mubr.bf16.mxu1 %v8988_v56  ;;  %6291 = vmatpush3.bf16.msra.mxu1 %v6959_v23  ;;  %v4079_v23 = vshrl.u32 %v8256_v34, 16  ;;  %v4020_v56 = vrot.slane %v4018_v41, 4  ;;  %8990 = vst [vmem:[#allocation12_spill] sm:$0xff] %v8285_v3  ;;  %v6958_v49 = vld [vmem:[%s8949_s1 + $0x208] sm:$0xff]   ;;  %v8293_v13 = vrot.slane %v4051_v4, 5  ;;  %v4071_v34 = vrot.slane %v4069_v24, 5 }
  0xf0   : > { %6292 = vmatprep.subr.bf16.mxu1 %v6961_v12  ;;  %v5791_v41 = vld [vmem:[%s7151_s16 + $0xa8] sm:$0xf]  ;;  %v4068_v1 = vrot.slane %v4066_v59, 4  ;;  %v8310_v17 = vld [vmem:[%s8949_s1 + $0x100] sm:$0xff]   ;;  %v8313_v46 = vrot.slane %v4075_v14, 5  ;;  %v4090_v26 = vshrl.u32 %v5788_v38, 16  ;;  %v8994_v24 = vcombine.low %v7977_v16, %v7987_v15 }
  0xf1   : > { %8993 = vst [vmem:[#allocation15_spill] sm:$0xff] %v8310_v17  ;;  %v4081_v4 = vrot.slane %v4079_v23, 4  ;;  %v4093_v0 = vshll.u32 %v5788_v38, 16  ;;  %v8316_v53 = vrot.slane %v4010_v29, 4  ;;  %v4099_v44 = vshll.u32 %v8288_v22, 16  ;;  %v6960_v16 = vld [vmem:[%s8949_s1 + $0x210] sm:$0xff]  }
  0xf2   : > { %v4103_v59 = vshrl.u32 %v8288_v22, 16  ;;  %v4024_v14 = vor.u32 %v4023_v27, %v4020_v56  ;;  %v4034_v38 = vor.u32 %v4033_v8, %v8282_v28  ;;  %v4048_v23 = vor.u32 %v4047_v30, %v4044_v25  ;;  %v8328_v29 = vld [vmem:[%s7151_s16 + $0xac] sm:$0xf]  ;;  %v8341_v25 = vld [vmem:[%s7151_s16 + $0xa4] sm:$0x1] }
  0xf3   : > { %6293 = vmatpush3.bf16.msra.mxu1 %v6961_v12  ;;  %v4037_v12 = vshll.u32 %v8278_v45, 16  ;;  %8995 = vst [vmem:[#allocation16_spill] sm:$0xff] %v8328_v29  ;;  %v4058_v15 = vor.u32 %v4057_v47, %v8293_v13  ;;  %v4114_v27 = vshrl.u32 %v5791_v41, 16  ;;  %v4117_v30 = vshll.u32 %v5791_v41, 16 }
  0xf4   : > { %6566 = vmatprep.subr.bf16.mxu1 %v8310_v17  ;;  %v8996_v17 = vcombine.low %v8033_v20, %v8054_v7  ;;  %v4072_v56 = vor.u32 %v4071_v34, %v4068_v1  ;;  %v4082_v8 = vor.u32 %v4081_v4, %v8313_v46  ;;  %v4092_v20 = vrot.slane %v4090_v26, 4 }
  0xf5   : > { %6487 = vmatmul.mubr.bf16.vlgmr.msra.gmra.mrb[0].mxu0 %v8110_v50  ;;  %v4061_v50 = vshll.u32 %v8285_v3, 16  ;;  %v4095_v7 = vrot.slane %v4093_v0, 5  ;;  %v4127_v22 = vshrl.u32 %v8328_v29, 16  ;;  %v4025_v47 = vrot.slane %v4024_v14, 4  ;;  %v6962_v0 = vld [vmem:[%s8949_s1 + $0x218] sm:$0xff]  }
  0xf6   : > { %6263 = vmatmul.mubr.bf16.gmra.mrb[16].mxu1 %v8994_v24  ;;  %6519 = vmatpush3.bf16.msra.mxu0 %v8014_v21  ;;  %v4085_v21 = vshll.u32 %v8296_v39, 16  ;;  %v4123_v24 = vshll.u32 %v8328_v29, 16  ;;  %v4035_v39 = vrot.slane %v4034_v38, 4  ;;  %v4039_v3 = vrot.slane %v4037_v12, 5 }
  0xf7   : > { %6266 = vmatprep.mubr.bf16.mxu1 %v8996_v17  ;;  %6490 = vmatprep.mubr.bf16.mxu0 %v8114_v48  ;;  %v8343_v17 = vrot.slane %v4099_v44, 5  ;;  %v4105_v48 = vrot.slane %v4103_v59, 4  ;;  %v4063_v41 = vrot.slane %v4061_v50, 5  ;;  %v4049_v34 = vrot.slane %v4048_v23, 4 }
  0xf8   : > { %6520 = vmatprep.subr.bf16.mxu0 %v6958_v49  ;;  %v4059_v1 = vrot.slane %v4058_v15, 4  ;;  %v4116_v4 = vrot.slane %v4114_v27, 4  ;;  %v4119_v45 = vrot.slane %v4117_v30, 5  ;;  %v4073_v26 = vrot.slane %v4072_v56, 4  ;;  %v8409_v27 = vld [vmem:[%s7151_s16 + $0xbc] sm:$0x1] }
  0xf9   : > { %v4087_v44 = vrot.slane %v4085_v21, 5  ;;  %v4096_v59 = vor.u32 %v4095_v7, %v4092_v20  ;;  %v4109_v29 = vshll.u32 %v8341_v25, 16  ;;  %v4106_v12 = vor.u32 %v4105_v48, %v8343_v17  ;;  %v8376_v21 = vld [vmem:[%s7151_s16 + $0xb0] sm:$0x1] }
  0xfa   : > { %6521 = vmatpush3.bf16.msra.mxu0 %v6958_v49  ;;  %v4083_v49 = vrot.slane %v4082_v8, 4  ;;  %v8353_v14 = vrot.slane %v4123_v24, 5  ;;  %v4129_v38 = vrot.slane %v4127_v22, 4  ;;  %v8997_v23 = vor.u32 %v7761_v57, %v7759_v11 }
  0xfb   : > { %6522 = vmatprep.subr.bf16.mxu0 %v6960_v16  ;;  %v8998_v15 = vcombine.low %v8066_v40, %v8091_v60  ;;  %v4016_v22 = vsel %vm7183_vm2, %v8316_v53, %v8275_v5  ;;  %v4030_v57 = vsel %vm7183_vm2, %v4025_v47, %v8282_v28  ;;  %v8999_v40 = vcombine.low %v8121_v31, %v8163_v43  ;;  %v6965_v31 = vld [vmem:[%s8949_s1 + $0x220] sm:$0xff]  }
  0xfc   : > { %v8358_v50 = vrot.slane %v8997_v23, 4  ;;  %v4040_v60 = vsel %vm7183_vm2, %v4035_v39, %v4039_v3  ;;  %v4120_v5 = vor.u32 %v4119_v45, %v4116_v4  ;;  %v4064_v28 = vsel %vm7183_vm2, %v4059_v1, %v4063_v41  ;;  %v5847_v41 = vld [vmem:[%s7151_s16 + $0x48] sm:$0xe] }
  0xfd   : > { %6491 = vmatmul.mubr.bf16.gmra.mrb[4].mxu0 %v8159_v55  ;;  %v4006_v55 = vsel %vm7183_vm2, %v8273_v10, %v8245_v61  ;;  %v5794_v61 = vld [vmem:[%s7151_s16 + $0xb4] sm:$0xf]  ;;  %v8388_v10 = vld [vmem:[%s7151_s16 + $0xb8] sm:$0xf]  ;;  %v4078_v39 = vsel %vm7183_vm2, %v4073_v26, %v8313_v46  ;;  %v8398_v43 = vrot.slane %v4096_v59, 4  ;;  %v8400_v3 = vrot.slane %v4109_v29, 5 }
  0xfe   : > { %6267 = vmatmul.mubr.bf16.gmra.mrb[20].mxu1 %v8998_v15  ;;  %6494 = vmatprep.mubr.bf16.mxu0 %v8214_v18  ;;  %v4054_v18 = vsel %vm7183_vm2, %v4049_v34, %v8293_v13  ;;  %v4088_v13 = vsel %vm7183_vm2, %v4083_v49, %v4087_v44  ;;  %v8404_v45 = vrot.slane %v4106_v12, 4  ;;  %v4130_v53 = vor.u32 %v4129_v38, %v8353_v14  ;;  %v5848_v26 = vld [vmem:[%s7151_s16 + $0x54] sm:$0xe] }
  0xff   : > { %6270 = vmatprep.mubr.bf16.mxu1 %v8999_v40  ;;  %6523 = vmatpush3.bf16.msra.mxu0 %v6960_v16  ;;  %v4133_v16 = vshll.u32 %v8376_v21, 16  ;;  %v9000_v46 = vsel %vm7183_vm2, %v8243_v42, %v8232_v52  ;;  %v9001_v29 = vsel %vm7183_vm2, %v8241_v35, %v8165_v58  ;;  %v4138_v56 = vshrl.u32 %v5794_v61, 16 }
 0x100   : > { %6524 = vmatprep.subr.bf16.mxu0 %v6962_v0  ;;  %v5825_v30 = vcombine.low %v9001_v29, %v9000_v46  ;;  %v4141_v8 = vshll.u32 %v5794_v61, 16  ;;  %v4147_v20 = vshll.u32 %v8388_v10, 16  ;;  %v5441_v7 = vcombine.low %v8220_v2, %v8230_v54  ;;  %v6968_v2 = vld [vmem:[%s8949_s1 + $0x228] sm:$0xff]   ;;  %v5797_v54 = vld [vmem:[%s7151_s16 + $0xc0] sm:$0xf]  ;;  %v9005_v29 = vld [vmem:[#allocation5_spill] sm:$0xff] }
 0x101   : > { %v5442_v48 = vcombine.low %v8249_v36, %v8305_v62  ;;  %v5826_v24 = vcombine.low %v4006_v55, %v4016_v22  ;;  %v8426_v52 = vrot.slane %v4120_v5, 4  ;;  %v5827_v42 = vcombine.low %v4030_v57, %v4040_v60 }
 0x102   : > { %v8428_v58 = vcombine.low %v4054_v18, %v4064_v28  ;;  %v8430_v35 = vcombine.low %v4078_v39, %v4088_v13  ;;  %v4102_v47 = vsel %vm7183_vm2, %v8398_v43, %v8343_v17  ;;  %v4112_v34 = vsel %vm7183_vm2, %v8404_v45, %v8400_v3  ;;  %v5850_v28 = vld [vmem:[%s7151_s16 + $0x6c] sm:$0xe] }
 0x103   : > { %6525 = vmatpush3.bf16.msra.mxu0 %v6962_v0  ;;  %v8446_v1 = vrot.slane %v4130_v53, 4  ;;  %v8448_v4 = vrot.slane %v4133_v16, 5  ;;  %v4151_v0 = vshrl.u32 %v8388_v10, 16  ;;  %v9002_v44 = vcombine.low %v8175_v6, %v8184_v51  ;;  %v6971_v6 = vld [vmem:[%s8949_s1 + $0x230] sm:$0xff]   ;;  %v8470_v51 = vld [vmem:[%s7151_s16 + $0xc4] sm:$0xf] }
 0x104   : > { %6526 = vmatprep.subr.bf16.mxu0 %v6965_v31  ;;  %v8455_v59 = vrot.slane %v4138_v56, 4  ;;  %v8459_v49 = vrot.slane %v4147_v20, 5  ;;  %v4157_v12 = vshll.u32 %v8409_v27, 16  ;;  %v4126_v38 = vsel %vm7183_vm2, %v8426_v52, %v8353_v14  ;;  %v5849_v14 = vld [vmem:[%s7151_s16 + $0x60] sm:$0xe]  ;;  %v9003_v39 = vld [vmem:[#allocation3_spill] sm:$0xff] }
 0x105   : > { %6495 = vmatmul.mubr.bf16.gmra.mrb[8].mxu0 %v8226_v19  ;;  %v8457_v19 = vrot.slane %v4141_v8, 5  ;;  %v4162_v23 = vshrl.u32 %v5797_v54, 16  ;;  %v5863_v15 = vrot.slane %v5847_v41, 9  ;;  %v4625_v55 = vrot.slane %v8046_v32, 5  ;;  %v6963_v13 = vld [vmem:[%s7151_s16 + $0xc] sm:$0xff]   ;;  %v6974_v56 = vld [vmem:[%s8949_s1 + $0x238] sm:$0xff]  }
 0x106   : > { %6271 = vmatmul.mubr.bf16.gmra.mrb[24].mxu1 %v9002_v44  ;;  %6498 = vmatprep.mubr.bf16.mxu0 %v5825_v30  ;;  %v4165_v22 = vshll.u32 %v5797_v54, 16  ;;  %v4628_v57 = vrot.slane %v8094_v63, 5  ;;  %v5864_v40 = vrot.slane %v5848_v26, 9  ;;  %v4632_v60 = vrot.slane %v8058_v33, 5  ;;  %v9004_v16 = vld [vmem:[#allocation4_spill] sm:$0xff]  ;;  %v9006_v52 = vld [vmem:[#allocation6_spill] sm:$0xff] }
 0x107   : > { %6274 = vmatprep.mubr.bf16.mxu1 %v5441_v7  ;;  %6527 = vmatpush3.bf16.msra.mxu0 %v6965_v31  ;;  %v4136_v18 = vsel %vm7183_vm2, %v8446_v1, %v8448_v4  ;;  %v8480_v5 = vrot.slane %v4151_v0, 4  ;;  %v8484_v61 = vsel %vm7429_vm5, %v5863_v15, %v4625_v55  ;;  %v4627_v32 = vrot.slane %v4625_v55, 4  ;;  %v9007_v4 = vld [vmem:[#allocation7_spill] sm:$0xff] }
 0x108   : > { %6528 = vmatprep.subr.bf16.mxu0 %v6968_v2  ;;  %v4171_v31 = vshll.u32 %v8470_v51, 16  ;;  %v8490_v63 = vsel %vm7429_vm5, %v5864_v40, %v4632_v60  ;;  %v4634_v33 = vrot.slane %v4632_v60, 4  ;;  %v4635_v3 = vrot.slane %v9003_v39, 5  ;;  %v8521_v26 = vld [vmem:[%s7151_s16 + $0xc8] sm:$0x1]  ;;  %v6964_v40 = vld [vmem:[%s7151_s16 + $0x18] sm:$0xff]  }
 0x109   : > { %v8496_v45 = vsel %vm7429_vm5, %v4627_v32, %v4628_v57  ;;  %v5865_v53 = vrot.slane %v5849_v14, 9  ;;  %v4639_v46 = vrot.slane %v9004_v16, 5  ;;  %v4642_v30 = vrot.slane %v9005_v29, 5  ;;  %v6966_v39 = vld [vmem:[%s7151_s16 + $0x24] sm:$0xff]  }
 0x10a   : > { %v5895_v8 = vcombine.low %v8484_v61, %v8496_v45  ;;  %v8507_v20 = vsel %vm7429_vm5, %v4634_v33, %v4635_v3  ;;  %v5866_v7 = vrot.slane %v5850_v28, 9  ;;  %v4649_v0 = vrot.slane %v9007_v4, 5  ;;  %v9009_v28 = vld [vmem:[#allocation11_spill] sm:$0xff]  ;;  %v5556_v61 = vld [vmem:[%s7151_s16 + $0x90] sm:$0xf] }
 0x10b   : > { %6529 = vmatpush3.bf16.msra.mxu0 %v6968_v2  ;;  %v4646_v2 = vrot.slane %v9006_v52, 5  ;;  %v5896_v54 = vcombine.low %v8490_v63, %v8507_v20  ;;  %v8514_v41 = vsel %vm7429_vm5, %v5865_v53, %v4639_v46  ;;  %v4641_v1 = vrot.slane %v4639_v46, 4  ;;  %v9010_v53 = vld [vmem:[#allocation2_spill] sm:$0xff]  ;;  %v6980_v45 = vld [vmem:[%s7151_s16 + $0xa8] sm:$0xff]  }
 0x10c   : > { %6530 = vmatprep.subr.bf16.mxu0 %v6971_v6  ;;  %v8523_v44 = vrot.slane %v4162_v23, 4  ;;  %v8536_v36 = vcombine.low %v4102_v47, %v4112_v34  ;;  %v4144_v62 = vor.u32 %v8457_v19, %v8455_v59  ;;  %v5851_v23 = vld [vmem:[%s7151_s16 + $0x78] sm:$0xe]  ;;  %v8548_v57 = vrot.slane %v4157_v12, 5  ;;  %v5800_v12 = vld [vmem:[%s7151_s16 + $0xcc] sm:$0xf] }
 0x10d   : > { %6499 = vmatmul.mubr.bf16.gmra.mrb[12].mxu0 %v5826_v24  ;;  %v8525_v24 = vrot.slane %v4165_v22, 5  ;;  %v8529_v15 = vsel %vm7429_vm5, %v5866_v7, %v4646_v2  ;;  %v4648_v55 = vrot.slane %v4646_v2, 4  ;;  %v8546_v22 = vcombine.low %v4126_v38, %v4136_v18  ;;  %v5550_v47 = vld [vmem:[%s7151_s16 + $0x78] sm:$0xf]  ;;  %v9008_v18 = vld [vmem:[#allocation8_spill] sm:$0xff] }
 0x10e   : > { %6275 = vmatmul.mubr.bf16.gmra.mrb[28].mxu1 %v5442_v48  ;;  %6502 = vmatprep.mubr.bf16.mxu0 %v5827_v42  ;;  %v4175_v48 = vshrl.u32 %v8470_v51, 16  ;;  %v8543_v42 = vsel %vm7429_vm5, %v4641_v1, %v4642_v30  ;;  %v4154_v34 = vor.u32 %v8480_v5, %v8459_v49  ;;  %v8559_v59 = vrot.slane %v4171_v31, 5  ;;  %v8573_v31 = vld [vmem:[%s7151_s16 + $0xd0] sm:$0xf]  ;;  %v9011_v1 = vld [vmem:[#allocation9_spill] sm:$0xff] }
 0x10f   : > { %6294 = vmatprep.mubr.bf16.mxu1 %v6963_v13  ;;  %6531 = vmatpush3.bf16.msra.mxu0 %v6971_v6  ;;  %v5897_v17 = vcombine.low %v8514_v41, %v8543_v42  ;;  %v8554_v43 = vsel %vm7429_vm5, %v4648_v55, %v4649_v0  ;;  %v4181_v19 = vshll.u32 %v8521_v26, 16  ;;  %v5852_v6 = vld [vmem:[%s7151_s16 + $0x84] sm:$0xe]  ;;  %v4168_v60 = vor.u32 %v8525_v24, %v8523_v44  ;;  %v9012_v24 = vld [vmem:[#allocation12_spill] sm:$0xff]  ;;  %v7044_v63 = vld [vmem:[%s7151_s16 + $0x8c] sm:$0x1] }
 0x110   : > { %6532 = vmatprep.subr.bf16.mxu0 %v6974_v56  ;;  %v5898_v38 = vcombine.low %v8529_v15, %v8554_v43  ;;  %v5867_v14 = vrot.slane %v5851_v23, 9  ;;  %v4653_v32 = vrot.slane %v9008_v18, 5  ;;  %v4656_v33 = vrot.slane %v9009_v28, 5 }
 0x111   : > { %v4177_v5 = vrot.slane %v4175_v48, 4  ;;  %v2403_v3 = vshrl.u32 %v5550_v47, 16  ;;  %v2406_v13 = vshll.u32 %v5550_v47, 16  ;;  %v2425_v16 = vsel %vm7183_vm2, %v8358_v50, %v9010_v53 }
 0x112   : > { %v4186_v46 = vshrl.u32 %v5800_v12, 16  ;;  %v8581_v29 = vsel %vm7429_vm5, %v5867_v14, %v4653_v32  ;;  %v4655_v30 = vrot.slane %v4653_v32, 4  ;;  %v5868_v7 = vrot.slane %v5852_v6, 9  ;;  %v7024_v6 = vld [vmem:[%s8949_s1 + $0x108] sm:$0xff]  }
 0x113   : > { %6533 = vmatpush3.bf16.msra.mxu0 %v6974_v56  ;;  %v4189_v52 = vshll.u32 %v5800_v12, 16  ;;  %v2405_v2 = vrot.slane %v2403_v3, 4  ;;  %v2408_v56 = vrot.slane %v2406_v13, 5  ;;  %v4660_v4 = vrot.slane %v9011_v1, 5  ;;  %v5853_v12 = vld [vmem:[%s7151_s16 + $0x90] sm:$0xe] }
 0x114   : > { %v4195_v50 = vshll.u32 %v8573_v31, 16  ;;  %v4199_v0 = vshrl.u32 %v8573_v31, 16  ;;  %v8590_v44 = vsel %vm7429_vm5, %v4655_v30, %v4656_v33  ;;  %v4663_v55 = vrot.slane %v9012_v24, 5  ;;  %v6967_v3 = vld [vmem:[%s7151_s16 + $0x30] sm:$0xff]  }
 0x115   : > { %6503 = vmatmul.mubr.bf16.gmra.mrb[16].mxu0 %v8428_v58  ;;  %v9013_v58 = vld [vmem:[#allocation15_spill] sm:$0xff]  ;;  %v4178_v48 = vor.u32 %v4177_v5, %v8559_v59  ;;  %v2409_v23 = vor.u32 %v2408_v56, %v2405_v2  ;;  %v4662_v47 = vrot.slane %v4660_v4, 4  ;;  %v4155_v14 = vrot.slane %v4154_v34, 4  ;;  %v8611_v13 = vld [vmem:[%s7151_s16 + $0xd4] sm:$0x1]  ;;  %v9014_v2 = vld [vmem:[#allocation10_spill] sm:$0xff] }
 0x116   : > { %6295 = vmatmul.mubr.bf16.vlgmr.msra.gmra.mrb[0].mxu1 %v6964_v40  ;;  %6506 = vmatprep.mubr.bf16.mxu0 %v8430_v35  ;;  %v5899_v35 = vcombine.low %v8581_v29, %v8590_v44  ;;  %v4145_v40 = vrot.slane %v4144_v62, 4  ;;  %v4183_v18 = vrot.slane %v4181_v19, 5  ;;  %v8603_v32 = vsel %vm7429_vm5, %v5868_v7, %v4660_v4  ;;  %v6969_v19 = vld [vmem:[%s7151_s16 + $0x3c] sm:$0xff]   ;;  %v7025_v1 = vld [vmem:[%s8949_s1 + $0x110] sm:$0xff]  }
 0x117   : > { %6574 = vmatpush3.bf16.msra.mxu1 %v9013_v58  ;;  %6298 = vmatprep.mubr.bf16.mxu1 %v6966_v39  ;;  %v4188_v28 = vrot.slane %v4186_v46, 4  ;;  %v4191_v33 = vrot.slane %v4189_v52, 5  ;;  %v2410_v39 = vrot.slane %v2409_v23, 4  ;;  %v8607_v5 = vsel %vm7429_vm5, %v4662_v47, %v4663_v55  ;;  %v7026_v47 = vld [vmem:[%s7151_s16 + $0x1c] sm:$0xf] }
 0x118   : > { %6567 = vmatprep.subr.bf16.mxu1 %v7024_v6  ;;  %v8613_v53 = vrot.slane %v4195_v50, 5  ;;  %v4201_v30 = vrot.slane %v4199_v0, 4  ;;  %v5900_v62 = vcombine.low %v8603_v32, %v8607_v5  ;;  %v5869_v34 = vrot.slane %v5853_v12, 9 }
 0x119   : > { %v4169_v7 = vrot.slane %v4168_v60, 4  ;;  %v4179_v46 = vrot.slane %v4178_v48, 4  ;;  %v2415_v52 = vsel %vm7183_vm2, %v2410_v39, %v7759_v11  ;;  %v4667_v56 = vrot.slane %v9014_v2, 5  ;;  %v9015_v11 = vld [vmem:[#allocation14_spill] sm:$0xff]  ;;  %v6970_v39 = vld [vmem:[%s7151_s16 + $0x48] sm:$0xff]  }
 0x11a   : > { %v4150_v4 = vsel %vm7183_vm2, %v4145_v40, %v8459_v49  ;;  %v4160_v60 = vsel %vm7183_vm2, %v4155_v14, %v8548_v57  ;;  %v8631_v50 = vcombine.low %v2415_v52, %v2425_v16  ;;  %v4670_v0 = vrot.slane %v9015_v11, 5  ;;  %v5843_v57 = vld [vmem:[%s7151_s16 + $0x18] sm:$0xe]  ;;  %v5854_v16 = vld [vmem:[%s7151_s16 + $0x9c] sm:$0xe] }
 0x11b   : > { %6575 = vmatpush3.bf16.msra.mxu1 %v7024_v6  ;;  %v4192_v24 = vor.u32 %v4191_v33, %v4188_v28  ;;  %v4205_v55 = vshll.u32 %v8611_v13, 16  ;;  %v8638_v58 = vsel %vm7429_vm5, %v5869_v34, %v4667_v56  ;;  %v4669_v48 = vrot.slane %v4667_v56, 4  ;;  %v7027_v40 = vld [vmem:[%s8949_s1 + $0x118] sm:$0xff]   ;;  %v7028_v2 = vld [vmem:[%s7151_s16 + $0x20] sm:$0x1] }
 0x11c   : > { %6568 = vmatprep.subr.bf16.mxu1 %v7025_v1  ;;  %v4202_v49 = vor.u32 %v4201_v30, %v8613_v53  ;;  %v4184_v23 = vsel %vm7183_vm2, %v4179_v46, %v4183_v18  ;;  %v4597_v12 = vrot.slane %v7026_v47, 5  ;;  %v5832_v6 = vcombine.low %v4150_v4, %v4160_v60  ;;  %v9016_v34 = vld [vmem:[#allocation13_spill] sm:$0xff]  ;;  %v5855_v11 = vld [vmem:[%s7151_s16 + $0xa8] sm:$0xe] }
 0x11d   : > { %6507 = vmatmul.mubr.bf16.gmra.mrb[20].mxu0 %v8536_v36  ;;  %v4174_v36 = vsel %vm7183_vm2, %v4169_v7, %v8559_v59  ;;  %v4193_v14 = vrot.slane %v4192_v24, 4  ;;  %v4207_v28 = vrot.slane %v4205_v55, 5  ;;  %v5859_v18 = vrot.slane %v5843_v57, 9  ;;  %v6972_v46 = vld [vmem:[%s7151_s16 + $0x54] sm:$0xff]   ;;  %v5844_v55 = vld [vmem:[%s7151_s16 + $0x24] sm:$0xe] }
 0x11e   : > { %6299 = vmatmul.mubr.bf16.gmra.mrb[4].mxu1 %v6967_v3  ;;  %6510 = vmatprep.mubr.bf16.mxu0 %v8546_v22  ;;  %v8652_v22 = vsel %vm7429_vm5, %v4669_v48, %v4670_v0  ;;  %v5870_v33 = vrot.slane %v5854_v16, 9  ;;  %v5833_v3 = vcombine.low %v4174_v36, %v4184_v23  ;;  %v4203_v30 = vrot.slane %v4202_v49, 4  ;;  %v7030_v48 = vld [vmem:[%s7151_s16 + $0x28] sm:$0xf]  ;;  %v7031_v36 = vld [vmem:[%s7151_s16 + $0x34] sm:$0xf] }
 0x11f   : > { %6302 = vmatprep.mubr.bf16.mxu1 %v6969_v19  ;;  %6576 = vmatpush3.bf16.msra.mxu1 %v7025_v1  ;;  %v5901_v59 = vcombine.low %v8638_v58, %v8652_v22  ;;  %v4674_v19 = vrot.slane %v9016_v34, 5  ;;  %v4677_v7 = vrot.slane %v8341_v25, 5  ;;  %v4599_v52 = vrot.slane %v4597_v12, 4  ;;  %v7029_v1 = vld [vmem:[%s8949_s1 + $0x120] sm:$0xff]  }
 0x120   : > { %6569 = vmatprep.subr.bf16.mxu1 %v7027_v40  ;;  %v4600_v56 = vrot.slane %v7028_v2, 5  ;;  %v4598_v25 = vsel %vm7429_vm5, %v5859_v18, %v4597_v12  ;;  %v4198_v0 = vsel %vm7183_vm2, %v4193_v14, %v8613_v53  ;;  %v4208_v24 = vsel %vm7183_vm2, %v4203_v30, %v4207_v28  ;;  %v5845_v12 = vld [vmem:[%s7151_s16 + $0x30] sm:$0xe]  ;;  %v6973_v30 = vld [vmem:[%s7151_s16 + $0x60] sm:$0xff]  }
 0x121   : > { %v8669_v4 = vsel %vm7429_vm5, %v5870_v33, %v4674_v19  ;;  %v4676_v60 = vrot.slane %v4674_v19, 4  ;;  %v4604_v49 = vrot.slane %v7030_v48, 5  ;;  %v4611_v23 = vrot.slane %v7031_v36, 5  ;;  %v7033_v33 = vld [vmem:[%s7151_s16 + $0x2c] sm:$0x1] }
 0x122   : > { %v4601_v16 = vsel %vm7429_vm5, %v4599_v52, %v4600_v56  ;;  %v5871_v47 = vrot.slane %v5855_v11, 9  ;;  %v5834_v28 = vcombine.low %v4198_v0, %v4208_v24  ;;  %v5860_v18 = vrot.slane %v5844_v55, 9  ;;  %v6975_v52 = vld [vmem:[%s7151_s16 + $0x6c] sm:$0xff]   ;;  %v5856_v11 = vld [vmem:[%s7151_s16 + $0xb4] sm:$0xe] }
 0x123   : > { %6577 = vmatpush3.bf16.msra.mxu1 %v7027_v40  ;;  %v8683_v57 = vsel %vm7429_vm5, %v4676_v60, %v4677_v7  ;;  %v9017_v40 = vld [vmem:[#allocation16_spill] sm:$0xff]  ;;  %v5891_v34 = vcombine.low %v4598_v25, %v4601_v16  ;;  %v4606_v19 = vrot.slane %v4604_v49, 4  ;;  %v5861_v2 = vrot.slane %v5845_v12, 9  ;;  %v5846_v0 = vld [vmem:[%s7151_s16 + $0x3c] sm:$0xe] }
 0x124   : > { %6570 = vmatprep.subr.bf16.mxu1 %v7029_v1  ;;  %v5902_v53 = vcombine.low %v8669_v4, %v8683_v57  ;;  %v4681_v14 = vrot.slane %v9017_v40, 5  ;;  %v4613_v56 = vrot.slane %v4611_v23, 4  ;;  %v7035_v24 = vld [vmem:[%s7151_s16 + $0x40] sm:$0xf]  ;;  %v4605_v48 = vsel %vm7429_vm5, %v5860_v18, %v4604_v49  ;;  %v7037_v18 = vld [vmem:[%s7151_s16 + $0x44] sm:$0x1] }
 0x125   : > { %6511 = vmatmul.mubr.bf16.gmra.mrb[24].mxu0 %v5832_v6  ;;  %v7032_v6 = vld [vmem:[%s8949_s1 + $0x128] sm:$0xff]   ;;  %v4618_v55 = vrot.slane %v7035_v24, 5  ;;  %v4688_v12 = vrot.slane %v8388_v10, 5  ;;  %v4612_v49 = vsel %vm7429_vm5, %v5861_v2, %v4611_v23  ;;  %v7038_v10 = vld [vmem:[%s8949_s1 + $0x138] sm:$0xff]   ;;  %v5857_v23 = vld [vmem:[%s7151_s16 + $0xc0] sm:$0xe] }
 0x126   : > { %6303 = vmatmul.mubr.bf16.gmra.mrb[8].mxu1 %v6970_v39  ;;  %6514 = vmatprep.mubr.bf16.mxu0 %v5833_v3  ;;  %v4607_v39 = vrot.slane %v7033_v33, 5  ;;  %v4684_v3 = vrot.slane %v8376_v21, 5  ;;  %v8700_v7 = vsel %vm7429_vm5, %v5871_v47, %v4681_v14  ;;  %v7036_v21 = vld [vmem:[%s8949_s1 + $0x130] sm:$0xff]   ;;  %v5872_v47 = vrot.slane %v5856_v11, 9 }
 0x127   : > { %6306 = vmatprep.mubr.bf16.mxu1 %v6972_v46  ;;  %6578 = vmatpush3.bf16.msra.mxu1 %v7029_v1  ;;  %v4683_v46 = vrot.slane %v4681_v14, 4  ;;  %v7034_v1 = vld [vmem:[%s7151_s16 + $0x38] sm:$0x1]  ;;  %v5862_v14 = vrot.slane %v5846_v0, 9  ;;  %v4621_v33 = vrot.slane %v7037_v18, 5  ;;  %v4695_v11 = vrot.slane %v8470_v51, 5 }
 0x128   : > { %6571 = vmatprep.subr.bf16.mxu1 %v7032_v6  ;;  %v4614_v60 = vrot.slane %v7034_v1, 5  ;;  %v4608_v36 = vsel %vm7429_vm5, %v4606_v19, %v4607_v39  ;;  %v4690_v39 = vrot.slane %v4688_v12, 4  ;;  %v5547_v19 = vld [vmem:[%s7151_s16 + $0x6c] sm:$0xf]  ;;  %v6978_v18 = vld [vmem:[%s7151_s16 + $0x90] sm:$0xff]   ;;  %v2446_v20 = vshll.u32 %v7044_v63, 16 }
 0x129   : > { %v8712_v25 = vsel %vm7429_vm5, %v4683_v46, %v4684_v3  ;;  %v5892_v3 = vcombine.low %v4605_v48, %v4608_v36  ;;  %v4619_v1 = vsel %vm7429_vm5, %v5862_v14, %v4618_v55  ;;  %v2379_v0 = vshrl.u32 %v5547_v19, 16  ;;  %v5858_v51 = vld [vmem:[%s7151_s16 + $0xcc] sm:$0xe] }
 0x12a   : > { %v5903_v16 = vcombine.low %v8700_v7, %v8712_v25  ;;  %v4615_v40 = vsel %vm7429_vm5, %v4613_v56, %v4614_v60  ;;  %v5873_v56 = vrot.slane %v5857_v23, 9  ;;  %v2382_v24 = vshll.u32 %v5547_v19, 16 }
 0x12b   : > { %6579 = vmatpush3.bf16.msra.mxu1 %v7032_v6  ;;  %v4691_v6 = vrot.slane %v8409_v27, 5  ;;  %v8732_v27 = vsel %vm7429_vm5, %v5872_v47, %v4688_v12  ;;  %v4698_v36 = vrot.slane %v8521_v26, 5  ;;  %v4697_v12 = vrot.slane %v4695_v11, 4 }
 0x12c   : > { %6572 = vmatprep.subr.bf16.mxu1 %v7036_v21  ;;  %v2384_v26 = vrot.slane %v2382_v24, 5  ;;  %v4705_v23 = vrot.slane %v8611_v13, 5 }
 0x12d   : > { %6515 = vmatmul.mubr.bf16.gmra.mrb[28].mxu0 %v5834_v28  ;;  %v4620_v28 = vrot.slane %v4618_v55, 4  ;;  %v8739_v46 = vsel %vm7429_vm5, %v4690_v39, %v4691_v6  ;;  %v8753_v55 = vsel %vm7429_vm5, %v5873_v56, %v4695_v11  ;;  %v4702_v39 = vrot.slane %v8573_v31, 5  ;;  %v7040_v56 = vld [vmem:[%s7151_s16 + $0x74] sm:$0x1] }
 0x12e   : > { %6307 = vmatmul.mubr.bf16.gmra.mrb[12].mxu1 %v6973_v30  ;;  %6534 = vmatprep.mubr.bf16.mxu0 %v5891_v34  ;;  %v6976_v30 = vld [vmem:[%s7151_s16 + $0x78] sm:$0xff]   ;;  %v5893_v34 = vcombine.low %v4612_v49, %v4615_v40  ;;  %v5904_v2 = vcombine.low %v8732_v27, %v8739_v46  ;;  %v8758_v49 = vsel %vm7429_vm5, %v4697_v12, %v4698_v36  ;;  %v2381_v40 = vrot.slane %v2379_v0, 4  ;;  %v7041_v0 = vld [vmem:[%s7151_s16 + $0x88] sm:$0xf] }
 0x12f   : > { %6310 = vmatprep.mubr.bf16.mxu1 %v6975_v52  ;;  %6580 = vmatpush3.bf16.msra.mxu1 %v7036_v21  ;;  %v6977_v52 = vld [vmem:[%s7151_s16 + $0x84] sm:$0xff]   ;;  %v4622_v60 = vsel %vm7429_vm5, %v4620_v28, %v4621_v33  ;;  %v7039_v21 = vld [vmem:[%s7151_s16 + $0x70] sm:$0xf]  ;;  %v5905_v28 = vcombine.low %v8753_v55, %v8758_v49  ;;  %v4704_v19 = vrot.slane %v4702_v39, 4  ;;  %v2436_v24 = vshll.u32 %v7041_v0, 16 }
 0x130   : > { %6573 = vmatprep.subr.bf16.mxu1 %v7038_v10  ;;  %v2388_v48 = vshll.u32 %v7039_v21, 16  ;;  %v2392_v47 = vshrl.u32 %v7039_v21, 16  ;;  %v5894_v6 = vcombine.low %v4619_v1, %v4622_v60  ;;  %v2398_v1 = vshll.u32 %v7040_v56, 16 }
 0x131   : > { %v8780_v11 = vsel %vm7429_vm5, %v4704_v19, %v4705_v23  ;;  %v2440_v21 = vshrl.u32 %v7041_v0, 16  ;;  %v7043_v19 = vld [vmem:[%s7151_s16 + $0xa0] sm:$0xf] }
 0x132   : > { %v8760_v14 = vrot.slane %v2388_v48, 5  ;;  %v2394_v33 = vrot.slane %v2392_v47, 4  ;;  %v2488_v56 = vshrl.u32 %v7043_v19, 16 }
 0x133   : > { %6581 = vmatpush3.bf16.msra.mxu1 %v7038_v10  ;;  %v5874_v10 = vrot.slane %v5858_v51, 9 }
 0x134   : > { %v2395_v31 = vor.u32 %v2394_v33, %v8760_v14  ;;  %v2454_v33 = vshll.u32 %v5556_v61, 16 }
 0x135   : > { %6535 = vmatmul.mubr.bf16.vlgmr.msra.gmra.mrb[0].mxu0 %v5892_v3  ;;  %v6979_v3 = vld [vmem:[%s7151_s16 + $0x9c] sm:$0xff]  }
 0x136   : > { %6311 = vmatmul.mubr.bf16.gmra.mrb[16].mxu1 %v6976_v30  ;;  %6538 = vmatprep.mubr.bf16.mxu0 %v5893_v34  ;;  %v5553_v30 = vld [vmem:[%s7151_s16 + $0x84] sm:$0xf]  ;;  %v8771_v34 = vsel %vm7429_vm5, %v5874_v10, %v4702_v39  ;;  %v2396_v47 = vrot.slane %v2395_v31, 4  ;;  %v7042_v10 = vld [vmem:[%s7151_s16 + $0x94] sm:$0xf]  ;;  %v2456_v0 = vrot.slane %v2454_v33, 5 }
 0x137   : > { %6314 = vmatprep.mubr.bf16.mxu1 %v6977_v52  ;;  %v2385_v52 = vor.u32 %v2384_v26, %v2381_v40  ;;  %v2427_v13 = vshrl.u32 %v5553_v30, 16  ;;  %v2430_v60 = vshll.u32 %v5553_v30, 16  ;;  %v5906_v48 = vcombine.low %v8771_v34, %v8780_v11 }
 0x138   : > { %v8789_v40 = vrot.slane %v2436_v24, 5  ;;  %v2442_v26 = vrot.slane %v2440_v21, 4  ;;  %v2460_v39 = vshll.u32 %v7042_v10, 16  ;;  %v2464_v23 = vshrl.u32 %v7042_v10, 16  ;;  %v7046_v10 = vld [vmem:[%s7151_s16 + $0xa4] sm:$0x1] }
 0x139   : > { %v2386_v36 = vrot.slane %v2385_v52, 4  ;;  %v2429_v12 = vrot.slane %v2427_v13, 4  ;;  %v2432_v51 = vrot.slane %v2430_v60, 5  ;;  %v2484_v52 = vshll.u32 %v7043_v19, 16  ;;  %v7047_v19 = vld [vmem:[%s7151_s16 + $0xac] sm:$0xf] }
 0x13a   : > { %v2443_v13 = vor.u32 %v2442_v26, %v8789_v40  ;;  %v8806_v41 = vrot.slane %v2460_v39, 5  ;;  %v2466_v42 = vrot.slane %v2464_v23, 4  ;;  %v2490_v21 = vrot.slane %v2488_v56, 4  ;;  %v5565_v23 = vld [vmem:[%s7151_s16 + $0xb4] sm:$0xf] }
 0x13b   : > { %v2494_v39 = vshll.u32 %v7046_v10, 16  ;;  %v2512_v15 = vshrl.u32 %v7047_v19, 16  ;;  %v2526_v63 = vshll.u32 %v5565_v23, 16 }
 0x13c   : > { %v2467_v26 = vor.u32 %v2466_v42, %v8806_v41 }
 0x13d   : > { %6539 = vmatmul.mubr.bf16.gmra.mrb[4].mxu0 %v5894_v6  ;;  %v5559_v6 = vld [vmem:[%s7151_s16 + $0x9c] sm:$0xf] }
 0x13e   : > { %6315 = vmatmul.mubr.bf16.gmra.mrb[20].mxu1 %v6978_v18  ;;  %6542 = vmatprep.mubr.bf16.mxu0 %v5895_v8  ;;  %v2400_v8 = vrot.slane %v2398_v1, 5  ;;  %v2451_v18 = vshrl.u32 %v5556_v61, 16  ;;  %v2478_v30 = vshll.u32 %v5559_v6, 16  ;;  %v2391_v1 = vsel %vm7183_vm2, %v2386_v36, %v8760_v14  ;;  %v6982_v61 = vld [vmem:[%s7151_s16 + $0xc0] sm:$0xff]  }
 0x13f   : > { %6318 = vmatprep.mubr.bf16.mxu1 %v6979_v3  ;;  %v2475_v3 = vshrl.u32 %v5559_v6, 16  ;;  %v8808_v14 = vrot.slane %v2484_v52, 5  ;;  %v2508_v52 = vshll.u32 %v7047_v19, 16 }
 0x140   : > { %v2401_v31 = vsel %vm7183_vm2, %v2396_v47, %v2400_v8  ;;  %v2453_v60 = vrot.slane %v2451_v18, 4  ;;  %v2480_v24 = vrot.slane %v2478_v30, 5  ;;  %v2448_v8 = vrot.slane %v2446_v20, 5  ;;  %v7048_v20 = vld [vmem:[%s7151_s16 + $0xb8] sm:$0xf] }
 0x141   : > { %v2444_v47 = vrot.slane %v2443_v13, 4  ;;  %v2491_v33 = vor.u32 %v2490_v21, %v8808_v14  ;;  %v2532_v29 = vshll.u32 %v7048_v20, 16  ;;  %v2536_v44 = vshrl.u32 %v7048_v20, 16 }
 0x143   : > { %v2492_v13 = vrot.slane %v2491_v33, 4 }
 0x145   : > { %6543 = vmatmul.mubr.bf16.gmra.mrb[8].mxu0 %v5896_v54  ;;  %v2433_v54 = vor.u32 %v2432_v51, %v2429_v12  ;;  %v2457_v12 = vor.u32 %v2456_v0, %v2453_v60  ;;  %v7045_v51 = vld [vmem:[%s7151_s16 + $0x98] sm:$0x1]  ;;  %v2496_v60 = vrot.slane %v2494_v39, 5 }
 0x146   : > { %6319 = vmatmul.mubr.bf16.gmra.mrb[24].mxu1 %v6980_v45  ;;  %6546 = vmatprep.mubr.bf16.mxu0 %v5897_v17  ;;  %v2477_v17 = vrot.slane %v2475_v3, 4  ;;  %v5595_v45 = vcombine.low %v2391_v1, %v2401_v31  ;;  %v2470_v6 = vshll.u32 %v7045_v51, 16  ;;  %v2523_v31 = vshrl.u32 %v5565_v23, 16 }
 0x147   : > { %6322 = vmatprep.mubr.bf16.mxu1 %v6981_v9  ;;  %v2434_v36 = vrot.slane %v2433_v54, 4  ;;  %v5562_v9 = vld [vmem:[%s7151_s16 + $0xa8] sm:$0xf]  ;;  %v2458_v56 = vrot.slane %v2457_v12, 4  ;;  %v2497_v32 = vsel %vm7183_vm2, %v2492_v13, %v2496_v60 }
 0x148   : > { %v2481_v18 = vor.u32 %v2480_v24, %v2477_v17  ;;  %v2499_v3 = vshrl.u32 %v5562_v9, 16  ;;  %v2502_v30 = vshll.u32 %v5562_v9, 16  ;;  %v2472_v1 = vrot.slane %v2470_v6, 5 }
 0x149   : > { %v2439_v43 = vsel %vm7183_vm2, %v2434_v36, %v8789_v40  ;;  %v2510_v17 = vrot.slane %v2508_v52, 5  ;;  %v2514_v24 = vrot.slane %v2512_v15, 4  ;;  %v2525_v21 = vrot.slane %v2523_v31, 4  ;;  %v5568_v36 = vld [vmem:[%s7151_s16 + $0xc0] sm:$0xf] }
 0x14a   : > { %v2482_v54 = vrot.slane %v2481_v18, 4  ;;  %v2501_v0 = vrot.slane %v2499_v3, 4  ;;  %v2504_v42 = vrot.slane %v2502_v30, 5  ;;  %v2547_v9 = vshrl.u32 %v5568_v36, 16  ;;  %v7050_v18 = vld [vmem:[%s7151_s16 + $0xc4] sm:$0xf] }
 0x14b   : > { %v2556_v33 = vshll.u32 %v7050_v18, 16 }
 0x14c   : > { %v2487_v51 = vsel %vm7183_vm2, %v2482_v54, %v8808_v14  ;;  %v2505_v5 = vor.u32 %v2504_v42, %v2501_v0  ;;  %v2560_v14 = vshrl.u32 %v7050_v18, 16  ;;  %v2549_v19 = vrot.slane %v2547_v9, 4 }
 0x14d   : > { %6547 = vmatmul.mubr.bf16.gmra.mrb[12].mxu0 %v5898_v38  ;;  %v2449_v38 = vsel %vm7183_vm2, %v2444_v47, %v2448_v8  ;;  %v2538_v8 = vrot.slane %v2536_v44, 4  ;;  %v2463_v47 = vsel %vm7183_vm2, %v2458_v56, %v8806_v41  ;;  %v7049_v41 = vld [vmem:[%s7151_s16 + $0xb0] sm:$0x1]  ;;  %v5599_v58 = vcombine.low %v2487_v51, %v2497_v32  ;;  %v7052_v44 = vld [vmem:[%s7151_s16 + $0xc8] sm:$0x1] }
 0x14e   : > { %6323 = vmatmul.mubr.bf16.gmra.mrb[28].mxu1 %v6982_v61  ;;  %6550 = vmatprep.mubr.bf16.mxu0 %v5899_v35  ;;  %v2468_v35 = vrot.slane %v2467_v26, 4  ;;  %v5597_v40 = vcombine.low %v2439_v43, %v2449_v38  ;;  %v2528_v61 = vrot.slane %v2526_v63, 5  ;;  %v2518_v6 = vshll.u32 %v7049_v41, 16 }
 0x14f   : > { %6358 = vmatprep.mubr.bf16.mxu1 %v5595_v45  ;;  %v2534_v45 = vrot.slane %v2532_v29, 5  ;;  %v2550_v26 = vshll.u32 %v5568_v36, 16  ;;  %v2506_v22 = vrot.slane %v2505_v5, 4  ;;  %v2558_v15 = vrot.slane %v2556_v33, 5 }
 0x150   : > { %v2473_v12 = vsel %vm7183_vm2, %v2468_v35, %v2472_v1  ;;  %v2529_v10 = vor.u32 %v2528_v61, %v2525_v21  ;;  %v2520_v30 = vrot.slane %v2518_v6, 5  ;;  %v2562_v43 = vrot.slane %v2560_v14, 4 }
 0x151   : > { %v2539_v39 = vor.u32 %v2538_v8, %v2534_v45  ;;  %v5598_v3 = vcombine.low %v2463_v47, %v2473_v12  ;;  %v2552_v52 = vrot.slane %v2550_v26, 5  ;;  %v2511_v31 = vsel %vm7183_vm2, %v2506_v22, %v2510_v17 }
 0x152   : > { %v2530_v38 = vrot.slane %v2529_v10, 4  ;;  %v2563_v29 = vor.u32 %v2562_v43, %v2558_v15  ;;  %v2566_v35 = vshll.u32 %v7052_v44, 16 }
 0x153   : > { %v2540_v56 = vrot.slane %v2539_v39, 4  ;;  %v2553_v20 = vor.u32 %v2552_v52, %v2549_v19 }
 0x154   : > { %v2535_v4 = vsel %vm7183_vm2, %v2530_v38, %v2534_v45  ;;  %v2568_v54 = vrot.slane %v2566_v35, 5 }
 0x155   : > { %6551 = vmatmul.mubr.bf16.gmra.mrb[16].mxu0 %v5900_v62  ;;  %v2515_v62 = vor.u32 %v2514_v24, %v2510_v17  ;;  %v2554_v25 = vrot.slane %v2553_v20, 4 }
 0x156   : > { %6359 = vmatmul.mubr.bf16.vlgmr.msra.gmra.mrb[16].mxu1 %v8631_v50  ;;  %6554 = vmatprep.mubr.bf16.mxu0 %v5901_v59  ;;  %v7051_v50 = vld [vmem:[%s7151_s16 + $0xbc] sm:$0x1]  ;;  %s5917_s16 = sshll.u32 %s9023_s12, 8 }
 0x157   : > { %6362 = vmatprep.mubr.bf16.mxu1 %v5597_v40  ;;  %v2542_v23 = vshll.u32 %v7051_v50, 16  ;;  %v2516_v59 = vrot.slane %v2515_v62, 4  ;;  %v2559_v13 = vsel %vm7183_vm2, %v2554_v25, %v2558_v15  ;;  %s8895_s27 = scalar_lea.vmem %s8950_s2, %s5917_s16 }
 0x159   : > { %v2544_v1 = vrot.slane %v2542_v23, 5  ;;  %v2521_v63 = vsel %vm7183_vm2, %v2516_v59, %v2520_v30 }
 0x15b   : > { %v2545_v57 = vsel %vm7183_vm2, %v2540_v56, %v2544_v1 }
 0x15c   : > { %v5601_v7 = vcombine.low %v2535_v4, %v2545_v57 }
 0x15d   : > { %6555 = vmatmul.mubr.bf16.gmra.mrb[20].mxu0 %v5902_v53  ;;  %v5600_v53 = vcombine.low %v2511_v31, %v2521_v63 }
 0x15e   : > { %6363 = vmatmul.mubr.bf16.gmra.mrb[20].mxu1 %v5598_v3  ;;  %6558 = vmatprep.mubr.bf16.mxu0 %v5903_v16  ;;  %v2564_v16 = vrot.slane %v2563_v29, 4 }
 0x15f   : > { %6366 = vmatprep.mubr.bf16.mxu1 %v5599_v58 }
 0x160   : > { %v2569_v60 = vsel %vm7183_vm2, %v2564_v16, %v2568_v54 }
 0x161   : > { %v5602_v0 = vcombine.low %v2559_v13, %v2569_v60 }
 0x165   : > { %6559 = vmatmul.mubr.bf16.gmra.mrb[24].mxu0 %v5904_v2 }
 0x166   : > { %6367 = vmatmul.mubr.bf16.gmra.mrb[24].mxu1 %v5600_v53  ;;  %6562 = vmatprep.mubr.bf16.mxu0 %v5905_v28 }
 0x167   : > { %6370 = vmatprep.mubr.bf16.mxu1 %v5601_v7 }
 0x16d   : > { %6563 = vmatmul.mubr.bf16.gmra.mrb[28].mxu0 %v5906_v48 }
 0x16e   : > { %6371 = vmatmul.mubr.bf16.gmra.mrb[28].mxu1 %v5602_v0 }
 0x1e9   : > { %v6296_v27 = vpop.f32.mrb[0].mxu1 }
 0x1ea   : > { %v1979_v46 = vpop.f32.mrb[1].mxu1 }
 0x1eb   : > { %v6297_v2 = vpop.f32.mrb[2].mxu1 }
 0x1ec   : > { %v1982_v42 = vpop.f32.mrb[3].mxu1 }
 0x1f1   : > { %v6300_v55 = vpop.f32.mrb[4].mxu1 }
 0x1f2   : > { %v1995_v49 = vpop.f32.mrb[5].mxu1 }
 0x1f3   : > { %v6301_v28 = vpop.f32.mrb[6].mxu1 }
 0x1f4   : > { %v1998_v17 = vpop.f32.mrb[7].mxu1 }
 0x1f9   : > { %v6304_v24 = vpop.f32.mrb[8].mxu1 }
 0x1fa   : > { %v2011_v40 = vpop.f32.mrb[9].mxu1 }
 0x1fb   : > { %v8879_v21 = vpop.f32.mrb[10].mxu1 }
 0x1fc   : > { %v8881_v37 = vpop.f32.mrb[11].mxu1 }
 0x201   : > { %v8883_v61 = vpop.f32.mrb[12].mxu1 }
 0x202   : > { %v8885_v34 = vpop.f32.mrb[13].mxu1 }
 0x203   : > { %v8887_v11 = vpop.f32.mrb[14].mxu1 }
 0x204   : > { %v8889_v48 = vpop.f32.mrb[15].mxu1 }
 0x208   : > { %v6536_v45 = vpop.f32.mrb[0].mxu0 }
 0x209   : > { %v6582_v8 = vadd.f32 %v6536_v45, %v6296_v27  ;;  %v4870_v36 = vpop.f32.mrb[1].mxu0 }
 0x20a   : > { %v6583_v47 = vadd.f32 %v4870_v36, %v1979_v46  ;;  %v6537_v12 = vpop.f32.mrb[2].mxu0 }
 0x20b   : > { %v5031_v51 = vmax.f32 %v6582_v8, 0.0  ;;  %v6584_v32 = vadd.f32 %v6537_v12, %v6297_v2  ;;  %v4873_v5 = vpop.f32.mrb[3].mxu0 }
 0x20c   : > { %v5029_v62 = vmax.f32 %v6583_v47, 0.0  ;;  %v6585_v41 = vadd.f32 %v4873_v5, %v1982_v42 }
 0x20d   : > { %5063 = vst [vmem:[%s8895_s27 + $0x10] sm:$0xff] %v5031_v51  ;;  %v5032_v6 = vmax.f32 %v6584_v32, 0.0  ;;  %v5133_v50 = vmul.f32 %v5031_v51, %v5031_v51 }
 0x20e   : > { %5061 = vst [vmem:[%s8895_s27] sm:$0xff] %v5029_v62  ;;  %v5030_v9 = vmax.f32 %v6585_v41, 0.0  ;;  %v5131_v26 = vmul.f32 %v5029_v62, %v5029_v62 }
 0x20f   : > { %5064 = vst [vmem:[%s8895_s27 + $0x18] sm:$0xff] %v5032_v6  ;;  %v5134_v59 = vmul.f32 %v5032_v6, %v5032_v6 }
 0x210   : > { %5062 = vst [vmem:[%s8895_s27 + $0x8] sm:$0xff] %v5030_v9  ;;  %v5093_v18 = vadd.f32 %v5030_v9, %v5029_v62  ;;  %v5132_v33 = vmul.f32 %v5030_v9, %v5030_v9  ;;  %v6540_v14 = vpop.f32.mrb[4].mxu0 }
 0x211   : > { %v6586_v10 = vadd.f32 %v6540_v14, %v6300_v55  ;;  %v4886_v39 = vpop.f32.mrb[5].mxu0 }
 0x212   : > { %v5094_v23 = vadd.f32 %v5093_v18, %v5031_v51  ;;  %v5163_v3 = vadd.f32 %v5132_v33, %v5131_v26  ;;  %v6587_v58 = vadd.f32 %v4886_v39, %v1995_v49  ;;  %v6541_v22 = vpop.f32.mrb[6].mxu0 }
 0x213   : > { %v5035_v30 = vmax.f32 %v6586_v10, 0.0  ;;  %v6588_v19 = vadd.f32 %v6541_v22, %v6301_v28  ;;  %v4889_v52 = vpop.f32.mrb[7].mxu0 }
 0x214   : > { %v5164_v15 = vadd.f32 %v5163_v3, %v5133_v50  ;;  %v5033_v43 = vmax.f32 %v6587_v58, 0.0  ;;  %v5095_v38 = vadd.f32 %v5094_v23, %v5032_v6  ;;  %v6589_v56 = vadd.f32 %v4889_v52, %v1998_v17 }
 0x215   : > { %5067 = vst [vmem:[%s8895_s27 + $0x30] sm:$0xff] %v5035_v30  ;;  %v5036_v1 = vmax.f32 %v6588_v19, 0.0  ;;  %v5137_v25 = vmul.f32 %v5035_v30, %v5035_v30 }
 0x216   : > { %5065 = vst [vmem:[%s8895_s27 + $0x20] sm:$0xff] %v5033_v43  ;;  %v5096_v31 = vadd.f32 %v5095_v38, %v5033_v43  ;;  %v5135_v63 = vmul.f32 %v5033_v43, %v5033_v43  ;;  %v5165_v20 = vadd.f32 %v5164_v15, %v5134_v59  ;;  %v5034_v29 = vmax.f32 %v6589_v56, 0.0 }
 0x217   : > { %5068 = vst [vmem:[%s8895_s27 + $0x38] sm:$0xff] %v5036_v1  ;;  %v5138_v0 = vmul.f32 %v5036_v1, %v5036_v1 }
 0x218   : > { %v5166_v44 = vadd.f32 %v5165_v20, %v5135_v63  ;;  %5066 = vst [vmem:[%s8895_s27 + $0x28] sm:$0xff] %v5034_v29  ;;  %v5097_v35 = vadd.f32 %v5096_v31, %v5034_v29  ;;  %v5136_v4 = vmul.f32 %v5034_v29, %v5034_v29  ;;  %v6544_v57 = vpop.f32.mrb[8].mxu0 }
 0x219   : > { %v6590_v53 = vadd.f32 %v6544_v57, %v6304_v24  ;;  %v4902_v7 = vpop.f32.mrb[9].mxu0 }
 0x21a   : > { %v5098_v16 = vadd.f32 %v5097_v35, %v5035_v30  ;;  %v5167_v54 = vadd.f32 %v5166_v44, %v5136_v4  ;;  %v6591_v13 = vadd.f32 %v4902_v7, %v2011_v40  ;;  %v6545_v60 = vpop.f32.mrb[10].mxu0 }
 0x21b   : > { %v5039_v27 = vmax.f32 %v6590_v53, 0.0  ;;  %v6592_v46 = vadd.f32 %v6545_v60, %v8879_v21  ;;  %v4905_v2 = vpop.f32.mrb[11].mxu0 }
 0x21c   : > { %v5168_v42 = vadd.f32 %v5167_v54, %v5137_v25  ;;  %v5037_v55 = vmax.f32 %v6591_v13, 0.0  ;;  %v5099_v49 = vadd.f32 %v5098_v16, %v5036_v1  ;;  %v6593_v28 = vadd.f32 %v4905_v2, %v8881_v37 }
 0x21d   : > { %5071 = vst [vmem:[%s8895_s27 + $0x50] sm:$0xff] %v5039_v27  ;;  %v5040_v17 = vmax.f32 %v6592_v46, 0.0  ;;  %v5141_v5 = vmul.f32 %v5039_v27, %v5039_v27 }
 0x21e   : > { %5069 = vst [vmem:[%s8895_s27 + $0x40] sm:$0xff] %v5037_v55  ;;  %v5100_v24 = vadd.f32 %v5099_v49, %v5037_v55  ;;  %v5139_v45 = vmul.f32 %v5037_v55, %v5037_v55  ;;  %v5169_v8 = vadd.f32 %v5168_v42, %v5138_v0  ;;  %v5038_v40 = vmax.f32 %v6593_v28, 0.0 }
 0x21f   : > { %5072 = vst [vmem:[%s8895_s27 + $0x58] sm:$0xff] %v5040_v17  ;;  %v5142_v9 = vmul.f32 %v5040_v17, %v5040_v17 }
 0x220   : > { %v5170_v36 = vadd.f32 %v5169_v8, %v5139_v45  ;;  %5070 = vst [vmem:[%s8895_s27 + $0x48] sm:$0xff] %v5038_v40  ;;  %v5101_v47 = vadd.f32 %v5100_v24, %v5038_v40  ;;  %v5140_v12 = vmul.f32 %v5038_v40, %v5038_v40  ;;  %v6548_v51 = vpop.f32.mrb[12].mxu0 }
 0x221   : > { %v6594_v21 = vadd.f32 %v6548_v51, %v8883_v61  ;;  %v4918_v32 = vpop.f32.mrb[13].mxu0 }
 0x222   : > { %v5102_v37 = vadd.f32 %v5101_v47, %v5039_v27  ;;  %v5171_v62 = vadd.f32 %v5170_v36, %v5140_v12  ;;  %v6595_v41 = vadd.f32 %v4918_v32, %v8885_v34  ;;  %v6549_v6 = vpop.f32.mrb[14].mxu0 }
 0x223   : > { %v5043_v26 = vmax.f32 %v6594_v21, 0.0  ;;  %v6596_v18 = vadd.f32 %v6549_v6, %v8887_v11  ;;  %v4921_v33 = vpop.f32.mrb[15].mxu0 }
 0x224   : > { %v5172_v14 = vadd.f32 %v5171_v62, %v5141_v5  ;;  %v5041_v10 = vmax.f32 %v6595_v41, 0.0  ;;  %v5103_v39 = vadd.f32 %v5102_v37, %v5040_v17  ;;  %v6597_v61 = vadd.f32 %v4921_v33, %v8889_v48 }
 0x225   : > { %5075 = vst [vmem:[%s8895_s27 + $0x70] sm:$0xff] %v5043_v26  ;;  %v5044_v50 = vmax.f32 %v6596_v18, 0.0  ;;  %v5145_v15 = vmul.f32 %v5043_v26, %v5043_v26 }
 0x226   : > { %5073 = vst [vmem:[%s8895_s27 + $0x60] sm:$0xff] %v5041_v10  ;;  %v5104_v23 = vadd.f32 %v5103_v39, %v5041_v10  ;;  %v5143_v3 = vmul.f32 %v5041_v10, %v5041_v10  ;;  %v5173_v58 = vadd.f32 %v5172_v14, %v5142_v9  ;;  %v5042_v34 = vmax.f32 %v6597_v61, 0.0 }
 0x227   : > { %5076 = vst [vmem:[%s8895_s27 + $0x78] sm:$0xff] %v5044_v50  ;;  %v5146_v31 = vmul.f32 %v5044_v50, %v5044_v50 }
 0x228   : > { %v5174_v22 = vadd.f32 %v5173_v58, %v5143_v3  ;;  %5074 = vst [vmem:[%s8895_s27 + $0x68] sm:$0xff] %v5042_v34  ;;  %v5105_v59 = vadd.f32 %v5104_v23, %v5042_v34  ;;  %v5144_v30 = vmul.f32 %v5042_v34, %v5042_v34  ;;  %v6552_v19 = vpop.f32.mrb[16].mxu0 }
 0x229   : > { %v6360_v11 = vpop.f32.mrb[16].mxu1  ;;  %v4934_v52 = vpop.f32.mrb[17].mxu0 }
 0x22a   : > { %v5106_v43 = vadd.f32 %v5105_v59, %v5043_v26  ;;  %v5175_v38 = vadd.f32 %v5174_v22, %v5144_v30  ;;  %v6598_v48 = vadd.f32 %v6552_v19, %v6360_v11  ;;  %v2797_v56 = vpop.f32.mrb[17].mxu1  ;;  %v6553_v1 = vpop.f32.mrb[18].mxu0 }
 0x22b   : > { %v6599_v63 = vadd.f32 %v4934_v52, %v2797_v56  ;;  %v6361_v20 = vpop.f32.mrb[18].mxu1  ;;  %v4937_v29 = vpop.f32.mrb[19].mxu0 }
 0x22c   : > { %v5176_v44 = vadd.f32 %v5175_v38, %v5145_v15  ;;  %v5047_v35 = vmax.f32 %v6598_v48, 0.0  ;;  %v5107_v4 = vadd.f32 %v5106_v43, %v5044_v50  ;;  %v6600_v57 = vadd.f32 %v6553_v1, %v6361_v20  ;;  %v2800_v53 = vpop.f32.mrb[19].mxu1 }
 0x22d   : > { %v5045_v7 = vmax.f32 %v6599_v63, 0.0  ;;  %v6601_v25 = vadd.f32 %v4937_v29, %v2800_v53 }
 0x22e   : > { %5079 = vst [vmem:[%s8895_s27 + $0x90] sm:$0xff] %v5047_v35  ;;  %v5177_v16 = vadd.f32 %v5176_v44, %v5146_v31  ;;  %v5048_v54 = vmax.f32 %v6600_v57, 0.0  ;;  %v5149_v45 = vmul.f32 %v5047_v35, %v5047_v35 }
 0x22f   : > { %5077 = vst [vmem:[%s8895_s27 + $0x80] sm:$0xff] %v5045_v7  ;;  %v5108_v13 = vadd.f32 %v5107_v4, %v5045_v7  ;;  %v5147_v60 = vmul.f32 %v5045_v7, %v5045_v7  ;;  %v5046_v0 = vmax.f32 %v6601_v25, 0.0 }
 0x230   : > { %5080 = vst [vmem:[%s8895_s27 + $0x98] sm:$0xff] %v5048_v54  ;;  %v6556_v27 = vpop.f32.mrb[20].mxu0  ;;  %v5150_v51 = vmul.f32 %v5048_v54, %v5048_v54 }
 0x231   : > { %v5178_v46 = vadd.f32 %v5177_v16, %v5147_v60  ;;  %5078 = vst [vmem:[%s8895_s27 + $0x88] sm:$0xff] %v5046_v0  ;;  %v5109_v2 = vadd.f32 %v5108_v13, %v5046_v0  ;;  %v5148_v42 = vmul.f32 %v5046_v0, %v5046_v0  ;;  %v6364_v55 = vpop.f32.mrb[20].mxu1  ;;  %v4950_v49 = vpop.f32.mrb[21].mxu0 }
 0x232   : > { %v6602_v28 = vadd.f32 %v6556_v27, %v6364_v55  ;;  %v2813_v17 = vpop.f32.mrb[21].mxu1  ;;  %v6557_v24 = vpop.f32.mrb[22].mxu0 }
 0x233   : > { %v5110_v8 = vadd.f32 %v5109_v2, %v5047_v35  ;;  %v5179_v40 = vadd.f32 %v5178_v46, %v5148_v42  ;;  %v6603_v36 = vadd.f32 %v4950_v49, %v2813_v17  ;;  %v6365_v47 = vpop.f32.mrb[22].mxu1  ;;  %v4953_v12 = vpop.f32.mrb[23].mxu0 }
 0x234   : > { %v5051_v21 = vmax.f32 %v6602_v28, 0.0  ;;  %v6604_v32 = vadd.f32 %v6557_v24, %v6365_v47  ;;  %v2816_v5 = vpop.f32.mrb[23].mxu1 }
 0x235   : > { %v5180_v37 = vadd.f32 %v5179_v40, %v5149_v45  ;;  %v5049_v62 = vmax.f32 %v6603_v36, 0.0  ;;  %v5111_v41 = vadd.f32 %v5110_v8, %v5048_v54  ;;  %v6605_v6 = vadd.f32 %v4953_v12, %v2816_v5 }
 0x236   : > { %5083 = vst [vmem:[%s8895_s27 + $0xb0] sm:$0xff] %v5051_v21  ;;  %v5052_v9 = vmax.f32 %v6604_v32, 0.0  ;;  %v5153_v59 = vmul.f32 %v5051_v21, %v5051_v21 }
 0x237   : > { %5081 = vst [vmem:[%s8895_s27 + $0xa0] sm:$0xff] %v5049_v62  ;;  %v5112_v26 = vadd.f32 %v5111_v41, %v5049_v62  ;;  %v5151_v18 = vmul.f32 %v5049_v62, %v5049_v62  ;;  %v5181_v33 = vadd.f32 %v5180_v37, %v5150_v51  ;;  %v5050_v14 = vmax.f32 %v6605_v6, 0.0 }
 0x238   : > { %5084 = vst [vmem:[%s8895_s27 + $0xb8] sm:$0xff] %v5052_v9  ;;  %v6560_v10 = vpop.f32.mrb[24].mxu0  ;;  %v5154_v43 = vmul.f32 %v5052_v9, %v5052_v9 }
 0x239   : > { %v5182_v39 = vadd.f32 %v5181_v33, %v5151_v18  ;;  %5082 = vst [vmem:[%s8895_s27 + $0xa8] sm:$0xff] %v5050_v14  ;;  %v5113_v61 = vadd.f32 %v5112_v26, %v5050_v14  ;;  %v5152_v50 = vmul.f32 %v5050_v14, %v5050_v14  ;;  %v6368_v23 = vpop.f32.mrb[24].mxu1  ;;  %v4966_v3 = vpop.f32.mrb[25].mxu0 }
 0x23a   : > { %v6606_v58 = vadd.f32 %v6560_v10, %v6368_v23  ;;  %v2829_v34 = vpop.f32.mrb[25].mxu1  ;;  %v6561_v22 = vpop.f32.mrb[26].mxu0 }
 0x23b   : > { %v5114_v30 = vadd.f32 %v5113_v61, %v5051_v21  ;;  %v5183_v19 = vadd.f32 %v5182_v39, %v5152_v50  ;;  %v6607_v11 = vadd.f32 %v4966_v3, %v2829_v34  ;;  %v6369_v52 = vpop.f32.mrb[26].mxu1  ;;  %v4969_v15 = vpop.f32.mrb[27].mxu0 }
 0x23c   : > { %v5055_v38 = vmax.f32 %v6606_v58, 0.0  ;;  %v6608_v48 = vadd.f32 %v6561_v22, %v6369_v52  ;;  %v2832_v56 = vpop.f32.mrb[27].mxu1 }
 0x23d   : > { %v5184_v1 = vadd.f32 %v5183_v19, %v5153_v59  ;;  %v5053_v31 = vmax.f32 %v6607_v11, 0.0  ;;  %v5115_v63 = vadd.f32 %v5114_v30, %v5052_v9  ;;  %v6609_v20 = vadd.f32 %v4969_v15, %v2832_v56 }
 0x23e   : > { %5087 = vst [vmem:[%s8895_s27 + $0xd0] sm:$0xff] %v5055_v38  ;;  %v5056_v29 = vmax.f32 %v6608_v48, 0.0  ;;  %v5157_v46 = vmul.f32 %v5055_v38, %v5055_v38 }
 0x23f   : > { %5085 = vst [vmem:[%s8895_s27 + $0xc0] sm:$0xff] %v5053_v31  ;;  %v5116_v44 = vadd.f32 %v5115_v63, %v5053_v31  ;;  %v5155_v35 = vmul.f32 %v5053_v31, %v5053_v31  ;;  %v5185_v4 = vadd.f32 %v5184_v1, %v5154_v43  ;;  %v5054_v57 = vmax.f32 %v6609_v20, 0.0 }
 0x240   : > { %5088 = vst [vmem:[%s8895_s27 + $0xd8] sm:$0xff] %v5056_v29  ;;  %v6564_v53 = vpop.f32.mrb[28].mxu0  ;;  %v5158_v17 = vmul.f32 %v5056_v29, %v5056_v29 }
 0x241   : > { %v5186_v7 = vadd.f32 %v5185_v4, %v5155_v35  ;;  %5086 = vst [vmem:[%s8895_s27 + $0xc8] sm:$0xff] %v5054_v57  ;;  %v5117_v25 = vadd.f32 %v5116_v44, %v5054_v57  ;;  %v5156_v16 = vmul.f32 %v5054_v57, %v5054_v57  ;;  %v6372_v54 = vpop.f32.mrb[28].mxu1  ;;  %v4982_v13 = vpop.f32.mrb[29].mxu0 }
 0x242   : > { %v6610_v60 = vadd.f32 %v6564_v53, %v6372_v54  ;;  %v2845_v0 = vpop.f32.mrb[29].mxu1  ;;  %v6565_v27 = vpop.f32.mrb[30].mxu0 }
 0x243   : > { %v5118_v2 = vadd.f32 %v5117_v25, %v5055_v38  ;;  %v5187_v42 = vadd.f32 %v5186_v7, %v5156_v16  ;;  %v6611_v55 = vadd.f32 %v4982_v13, %v2845_v0  ;;  %v6373_v49 = vpop.f32.mrb[30].mxu1  ;;  %v4985_v28 = vpop.f32.mrb[31].mxu0 }
 0x244   : > { %v5059_v24 = vmax.f32 %v6610_v60, 0.0  ;;  %v6612_v45 = vadd.f32 %v6565_v27, %v6373_v49  ;;  %v2848_v8 = vpop.f32.mrb[31].mxu1 }
 0x245   : > { %v5188_v40 = vadd.f32 %v5187_v42, %v5157_v46  ;;  %v5057_v36 = vmax.f32 %v6611_v55, 0.0  ;;  %v5119_v47 = vadd.f32 %v5118_v2, %v5056_v29  ;;  %v6613_v12 = vadd.f32 %v4985_v28, %v2848_v8 }
 0x246   : > { %5091 = vst [vmem:[%s8895_s27 + $0xf0] sm:$0xff] %v5059_v24  ;;  %v5060_v51 = vmax.f32 %v6612_v45, 0.0  ;;  %v5161_v9 = vmul.f32 %v5059_v24, %v5059_v24 }
 0x247   : > { %5089 = vst [vmem:[%s8895_s27 + $0xe0] sm:$0xff] %v5057_v36  ;;  %v5120_v21 = vadd.f32 %v5119_v47, %v5057_v36  ;;  %v5159_v32 = vmul.f32 %v5057_v36, %v5057_v36  ;;  %v5189_v5 = vadd.f32 %v5188_v40, %v5158_v17  ;;  %v5058_v37 = vmax.f32 %v6613_v12, 0.0 }
 0x248   : > { %5092 = vst [vmem:[%s8895_s27 + $0xf8] sm:$0xff] %v5060_v51  ;;  %v5162_v33 = vmul.f32 %v5060_v51, %v5060_v51 }
 0x249   : > { %v5190_v62 = vadd.f32 %v5189_v5, %v5159_v32  ;;  %5090 = vst [vmem:[%s8895_s27 + $0xe8] sm:$0xff] %v5058_v37  ;;  %v5121_v41 = vadd.f32 %v5120_v21, %v5058_v37  ;;  %v5160_v6 = vmul.f32 %v5058_v37, %v5058_v37 }
 0x24b   : > { %v5122_v26 = vadd.f32 %v5121_v41, %v5059_v24  ;;  %v5191_v18 = vadd.f32 %v5190_v62, %v5160_v6 }
 0x24d   : > { %v5123_v14 = vadd.f32 %v5122_v26, %v5060_v51  ;;  %v5192_v10 = vadd.f32 %v5191_v18, %v5161_v9 }
 0x24f   : > { %v5124_v39 = vrot.slane %v5123_v14, 4  ;;  %v5193_v61 = vadd.f32 %v5192_v10, %v5162_v33 }
 0x251   : > { %v5125_v50 = vadd.f32 %v5124_v39, %v5123_v14  ;;  %v5194_v23 = vrot.slane %v5193_v61, 4 }
 0x253   : > { %v5126_v3 = vrot.slane %v5125_v50, 2  ;;  %v5195_v58 = vadd.f32 %v5194_v23, %v5193_v61 }
 0x255   : > { %v5127_v34 = vadd.f32 %v5126_v3, %v5125_v50  ;;  %v5196_v22 = vrot.slane %v5195_v58, 2 }
 0x257   : > { %v5128_v59 = vrot.slane %v5127_v34, 1  ;;  %v5197_v30 = vadd.f32 %v5196_v22, %v5195_v58 }
 0x259   : > { %v5129_v19 = vadd.f32 %v5128_v59, %v5127_v34  ;;  %v5198_v11 = vrot.slane %v5197_v30, 1 }
 0x25b   : > { %5130 = vst [vmem:[%s217_s4] sm:$0x1] %v5129_v19  ;;  %v5199_v52 = vadd.f32 %v5198_v11, %v5197_v30 }
 0x25d   : > { %5200 = vst [vmem:[%s217_s4 + $0x1] sm:$0x1] %v5199_v52 }
 0x25e PF: > { %s14_s14 = sadd.s32 1, %s7075_s14   ;;  %s9018_s12 = smov %s7071_s13 }
 0x25f   : > { %p11_p5 = scmp.ge.s32.totalorder %s14_s14, 4   ;;  %s9019_s13 = smov %s9021_s15 }
 0x261   :  { %13 = sbr.rel (!%p11_p5) target bundleno = 2 (0x2), region = 80 }

</bundles_post_ra>
